<compile_context>
chip_gen: v5e
topology: v5e:2x2
jax: 0.10.0
libtpu: 0.0.40
codegen_flags: <defaults>
</compile_context>

<pallas_src>
import functools

import jax
import jax.numpy as jnp
from jax import lax
from jax.experimental import pallas as pl
from jax.experimental.pallas import tpu as pltpu

NEG_SLOPE = 0.01   # torch.nn.LeakyReLU default
BN_EPS = 1e-5      # torch.nn.BatchNorm1d default

ARG_ORDER = ("w0", "b0", "w1", "g1", "be1", "w2", "g2", "be2", "w3", "b3")


def _round_up(x, m):
    return ((x + m - 1) // m) * m


def _pad_batch(b):
    # bf16 LHS packs 16 rows per vreg; 16-row alignment is all the MXU needs.
    return max(16, _round_up(b, 16))


def _vmem_limit_bytes():
    kind = jax.devices()[0].device_kind.lower()
    if "v7" in kind:
        return 48 << 20     # v7x: 64 MiB physical per TensorCore
    return 96 << 20         # v5e / v6e: 128 MiB physical


def _leaky_relu(x):
    # valid for 0 < slope < 1: max(x, slope*x) == leaky_relu(x)
    return jnp.maximum(x, NEG_SLOPE * x)


def _batchnorm(x, stat_row, inv_n, gamma, beta):
    # Training-mode BatchNorm1d over the *valid* batch rows only.
    # Batch reductions are done on the MXU ((1,B) row @ (B,N) matrix) so the
    # XLU/VPU stay free; var = E[x^2] - E[x]^2 in one fused pass.
    # TODO(synk): E[x^2]-E[x]^2 can cancel for badly conditioned activations;
    # switch to a two-pass variance if gamma/beta move far from init.
    sums = jnp.dot(stat_row, x, preferred_element_type=jnp.float32)
    sq_sums = jnp.dot(stat_row, x * x, preferred_element_type=jnp.float32)
    mean = sums * inv_n
    mean_sq = sq_sums * inv_n
    var = jnp.maximum(mean_sq - mean * mean, 0.0)
    scale = gamma * lax.rsqrt(var + BN_EPS)        # (1, N)
    shift = beta - mean * scale                    # (1, N)
    return x * scale + shift                       # 2 VPU ops / element


def generator_kernel(use_mask, n_ref, z_ref,
                     w0_ref, b0_ref,
                     w1_ref, g1_ref, be1_ref,
                     w2_ref, g2_ref, be2_ref,
                     w3_ref, b3_ref,
                     out_ref):
    b_pad = z_ref.shape[0]
    n_valid = n_ref[0]                              # SMEM scalar (int32)
    inv_n = 1.0 / n_valid.astype(jnp.float32)

    if use_mask:
        # Row-vector mask selecting the real (non-padded) batch rows.
        stat_row = (lax.broadcasted_iota(jnp.int32, (1, b_pad), 1)
                    < n_valid).astype(jnp.float32)
    else:
        # Batch already 16-aligned: mask is all ones, skip the compare/mul.
        stat_row = jnp.ones((1, b_pad), jnp.float32)

    # Block 0: Linear(latent, h0) + bias -> LeakyReLU (normalize=False, no BN).
    h = jnp.dot(z_ref[...].astype(jnp.bfloat16), w0_ref[...],
                preferred_element_type=jnp.float32) + b0_ref[...]
    h = _leaky_relu(h)

    # Block 1: Linear(h0, h1, no bias) -> BatchNorm1d -> LeakyReLU.
    h = jnp.dot(h.astype(jnp.bfloat16), w1_ref[...],
                preferred_element_type=jnp.float32)
    h = _leaky_relu(_batchnorm(h, stat_row, inv_n, g1_ref[...], be1_ref[...]))

    # Block 2: Linear(h1, h2, no bias) -> BatchNorm1d -> LeakyReLU.
    h = jnp.dot(h.astype(jnp.bfloat16), w2_ref[...],
                preferred_element_type=jnp.float32)
    h = _leaky_relu(_batchnorm(h, stat_row, inv_n, g2_ref[...], be2_ref[...]))

    # Output head: Linear(h2, C*H*W) + bias -> Tanh; lane-dense 1024-wide bf16 store.
    h = jnp.dot(h.astype(jnp.bfloat16), w3_ref[...],
                preferred_element_type=jnp.float32) + b3_ref[...]
    out_ref[...] = jnp.tanh(h).astype(out_ref.dtype)


def make_gan_params(key, latent_dim, hidden_dims, out_features):
    """Deterministic init matching GAN.init_weights:
    Linear weights ~ xavier_normal (stored bf16, MXU operand dtype),
    Linear biases = 0.01 (f32), BN gamma=1 / beta=0 (f32)."""
    def xavier_normal(k, fan_in, fan_out):
        std = (2.0 / (fan_in + fan_out)) ** 0.5
        w = std * jax.random.normal(k, (fan_in, fan_out), dtype=jnp.float32)
        # stored as (in, out) so the kernel computes x @ W (== x @ W_torch.T)
        return w.astype(jnp.bfloat16)

    ks = jax.random.split(key, 4)
    h0, h1, h2 = hidden_dims
    return dict(
        w0=xavier_normal(ks[0], latent_dim, h0),
        b0=jnp.full((1, h0), 0.01, jnp.float32),
        w1=xavier_normal(ks[1], h0, h1),
        g1=jnp.ones((1, h1), jnp.float32),
        be1=jnp.zeros((1, h1), jnp.float32),
        w2=xavier_normal(ks[2], h1, h2),
        g2=jnp.ones((1, h2), jnp.float32),
        be2=jnp.zeros((1, h2), jnp.float32),
        w3=xavier_normal(ks[3], h2, out_features),
        b3=jnp.full((1, out_features), 0.01, jnp.float32),
    )


def gan_forward(z, params, in_channels, in_size):
    """Runs the fused generator kernel on z of shape (B, latent); returns (B, C, H, W) bf16."""
    B = z.shape[0]
    out_features = in_channels * in_size * in_size

    b_pad = _pad_batch(B)
    z_pad = z if b_pad == B else jnp.pad(z, ((0, b_pad - B), (0, 0)))
    use_mask = (b_pad != B)
    n_valid = jnp.full((1,), B, dtype=jnp.int32)    # SMEM scalar: valid batch rows

    args = (n_valid, z_pad) + tuple(params[k] for k in ARG_ORDER)
    smem = pl.BlockSpec(memory_space=pltpu.MemorySpace.SMEM)
    vmem = pl.BlockSpec(memory_space=pltpu.MemorySpace.VMEM)

    flat = pl.pallas_call(
        functools.partial(generator_kernel, use_mask),
        out_shape=jax.ShapeDtypeStruct((b_pad, out_features), jnp.bfloat16),
        in_specs=[smem] + [vmem] * (len(args) - 1),
        out_specs=vmem,
        compiler_params=pltpu.CompilerParams(vmem_limit_bytes=_vmem_limit_bytes()),
    )(*args)

    # TODO(synk): for batches whose activations exceed the per-chip VMEM ceiling
    # (~10k rows on v5e/v6e, ~5k on v7x), add a batch-tiled grid with a two-pass
    # (accumulate-then-normalize) BatchNorm so the output store is pipelined and
    # the batch axis can be split across v7x's two TensorCores (with a cross-core
    # reduction of the BN sums so statistics stay full-batch).

    # drop padded rows, then torch.nn.Unflatten(1, (C, H, W)) -> NCHW
    return flat[:B].reshape(B, in_channels, in_size, in_size)


def reference_forward(z, params, in_channels, in_size):
    """Pure-JAX reference (same bf16-matmul / f32-elementwise recipe, full-batch BN)."""
    def dot(x, w):
        return jnp.dot(x.astype(jnp.bfloat16), w, preferred_element_type=jnp.float32)

    def bn(x, g, b):
        mu = jnp.mean(x, axis=0, keepdims=True)
        var = jnp.mean((x - mu) ** 2, axis=0, keepdims=True)
        return g * (x - mu) * lax.rsqrt(var + BN_EPS) + b

    def lrelu(x):
        return jnp.where(x >= 0, x, NEG_SLOPE * x)

    h = lrelu(dot(z, params["w0"]) + params["b0"])
    h = lrelu(bn(dot(h, params["w1"]), params["g1"], params["be1"]))
    h = lrelu(bn(dot(h, params["w2"]), params["g2"], params["be2"]))
    h = jnp.tanh(dot(h, params["w3"]) + params["b3"])
    return h.reshape(z.shape[0], in_channels, in_size, in_size)


if __name__ == "__main__":
    # Small, module-consistent shapes.
    batch = 2
    in_size = 16
    in_channels = 4
    latent_dim = 32
    hidden_dims = [128, 256, 512]   # default hidden_dims of the module

    key = jax.random.PRNGKey(0)
    k_params, k_z = jax.random.split(key)

    params = make_gan_params(k_params, latent_dim, hidden_dims,
                             in_channels * in_size * in_size)

    # forward(input) only uses input.size(0); z ~ N(0, I) like torch.randn.
    z = jax.random.normal(k_z, (batch, latent_dim), dtype=jnp.float32)

    out = jax.block_until_ready(gan_forward(z, params, in_channels, in_size))
    ref = jax.block_until_ready(reference_forward(z, params, in_channels, in_size))

    assert out.shape == (batch, in_channels, in_size, in_size)
    assert out.dtype == jnp.bfloat16
    out_f32 = out.astype(jnp.float32)
    assert bool(jnp.all(jnp.isfinite(out_f32)))
    assert bool(jnp.all(jnp.abs(out_f32) <= 1.0))                    # tanh range
    max_err = float(jnp.max(jnp.abs(out_f32 - ref)))
    assert max_err < 2e-2, f"kernel vs reference mismatch: {max_err}"
    print("KERNEL_OK")
</pallas_src>

<mosaic_0001>
module attributes {stable_mosaic.version = 11 : i64} {
  func.func @generator_kernel(%arg0: memref<1xi32, #tpu.memory_space<smem>>, %arg1: memref<16x32xf32, #tpu.memory_space<vmem>>, %arg2: memref<32x128xbf16, #tpu.memory_space<vmem>>, %arg3: memref<1x128xf32, #tpu.memory_space<vmem>>, %arg4: memref<128x256xbf16, #tpu.memory_space<vmem>>, %arg5: memref<1x256xf32, #tpu.memory_space<vmem>>, %arg6: memref<1x256xf32, #tpu.memory_space<vmem>>, %arg7: memref<256x512xbf16, #tpu.memory_space<vmem>>, %arg8: memref<1x512xf32, #tpu.memory_space<vmem>>, %arg9: memref<1x512xf32, #tpu.memory_space<vmem>>, %arg10: memref<512x1024xbf16, #tpu.memory_space<vmem>>, %arg11: memref<1x1024xf32, #tpu.memory_space<vmem>>, %arg12: memref<16x1024xbf16, #tpu.memory_space<vmem>>) attributes {dimension_semantics = [], scalar_prefetch = 0 : i64, scratch_operands = 0 : i64, tpu.core_type = #tpu.core_type<tc>} {
    %c0 = arith.constant 0 : index
    %0 = memref.load %arg0[%c0] : memref<1xi32, #tpu.memory_space<smem>>
    %1 = arith.sitofp %0 : i32 to f32
    %cst = arith.constant 1.000000e+00 : f32
    %2 = arith.divf %cst, %1 : f32
    %3 = tpu.iota {dimensions = array<i32: 1>} : vector<1x16xi32>
    %4 = vector.broadcast %0 : i32 to vector<1x16xi32>
    %5 = arith.cmpi slt, %3, %4 : vector<1x16xi32>
    %6 = arith.extui %5 : vector<1x16xi1> to vector<1x16xi32>
    %7 = arith.sitofp %6 : vector<1x16xi32> to vector<1x16xf32>
    %c0_0 = arith.constant 0 : index
    %c0_1 = arith.constant 0 : index
    %8 = vector.load %arg1[%c0_0, %c0_1] : memref<16x32xf32, #tpu.memory_space<vmem>>, vector<16x32xf32>
    %9 = arith.truncf %8 : vector<16x32xf32> to vector<16x32xbf16>
    %c0_2 = arith.constant 0 : index
    %c0_3 = arith.constant 0 : index
    %10 = vector.load %arg2[%c0_2, %c0_3] : memref<32x128xbf16, #tpu.memory_space<vmem>>, vector<32x128xbf16>
    %cst_4 = arith.constant dense<0.000000e+00> : vector<16x128xf32>
    %11 = tpu.matmul %9, %10, %cst_4 {dimension_numbers = #tpu.dot_dimension_numbers<[1], [0], [0], [1], [0, 0, 1, 1], [], []>} : vector<16x32xbf16>, vector<32x128xbf16>, vector<16x128xf32> -> vector<16x128xf32>
    %c0_5 = arith.constant 0 : index
    %c0_6 = arith.constant 0 : index
    %12 = vector.load %arg3[%c0_5, %c0_6] : memref<1x128xf32, #tpu.memory_space<vmem>>, vector<1x128xf32>
    %13 = vector.broadcast %12 : vector<1x128xf32> to vector<16x128xf32>
    %14 = arith.addf %11, %13 : vector<16x128xf32>
    %cst_7 = arith.constant 0.00999999977 : f32
    %15 = vector.broadcast %cst_7 : f32 to vector<16x128xf32>
    %16 = arith.mulf %15, %14 : vector<16x128xf32>
    %17 = arith.maximumf %14, %16 : vector<16x128xf32>
    %18 = arith.truncf %17 : vector<16x128xf32> to vector<16x128xbf16>
    %c0_8 = arith.constant 0 : index
    %c0_9 = arith.constant 0 : index
    %19 = vector.load %arg4[%c0_8, %c0_9] : memref<128x256xbf16, #tpu.memory_space<vmem>>, vector<128x256xbf16>
    %cst_10 = arith.constant dense<0.000000e+00> : vector<16x256xf32>
    %20 = tpu.matmul %18, %19, %cst_10 {dimension_numbers = #tpu.dot_dimension_numbers<[1], [0], [0], [1], [0, 0, 1, 1], [], []>} : vector<16x128xbf16>, vector<128x256xbf16>, vector<16x256xf32> -> vector<16x256xf32>
    %c0_11 = arith.constant 0 : index
    %c0_12 = arith.constant 0 : index
    %21 = vector.load %arg5[%c0_11, %c0_12] : memref<1x256xf32, #tpu.memory_space<vmem>>, vector<1x256xf32>
    %c0_13 = arith.constant 0 : index
    %c0_14 = arith.constant 0 : index
    %22 = vector.load %arg6[%c0_13, %c0_14] : memref<1x256xf32, #tpu.memory_space<vmem>>, vector<1x256xf32>
    %cst_15 = arith.constant dense<0.000000e+00> : vector<1x256xf32>
    %23 = tpu.matmul %7, %20, %cst_15 {dimension_numbers = #tpu.dot_dimension_numbers<[1], [0], [0], [1], [0, 0, 1, 1], [], []>} : vector<1x16xf32>, vector<16x256xf32>, vector<1x256xf32> -> vector<1x256xf32>
    %24 = arith.mulf %20, %20 : vector<16x256xf32>
    %cst_16 = arith.constant dense<0.000000e+00> : vector<1x256xf32>
    %25 = tpu.matmul %7, %24, %cst_16 {dimension_numbers = #tpu.dot_dimension_numbers<[1], [0], [0], [1], [0, 0, 1, 1], [], []>} : vector<1x16xf32>, vector<16x256xf32>, vector<1x256xf32> -> vector<1x256xf32>
    %26 = vector.broadcast %2 : f32 to vector<1x256xf32>
    %27 = arith.mulf %23, %26 : vector<1x256xf32>
    %28 = vector.broadcast %2 : f32 to vector<1x256xf32>
    %29 = arith.mulf %25, %28 : vector<1x256xf32>
    %30 = arith.mulf %27, %27 : vector<1x256xf32>
    %31 = arith.subf %29, %30 : vector<1x256xf32>
    %cst_17 = arith.constant 0.000000e+00 : f32
    %32 = vector.broadcast %cst_17 : f32 to vector<1x256xf32>
    %33 = arith.maximumf %31, %32 : vector<1x256xf32>
    %cst_18 = arith.constant 9.99999974E-6 : f32
    %34 = vector.broadcast %cst_18 : f32 to vector<1x256xf32>
    %35 = arith.addf %33, %34 : vector<1x256xf32>
    %36 = math.rsqrt %35 : vector<1x256xf32>
    %37 = arith.mulf %21, %36 : vector<1x256xf32>
    %38 = arith.mulf %27, %37 : vector<1x256xf32>
    %39 = arith.subf %22, %38 : vector<1x256xf32>
    %40 = vector.broadcast %37 : vector<1x256xf32> to vector<16x256xf32>
    %41 = arith.mulf %20, %40 : vector<16x256xf32>
    %42 = vector.broadcast %39 : vector<1x256xf32> to vector<16x256xf32>
    %43 = arith.addf %41, %42 : vector<16x256xf32>
    %cst_19 = arith.constant 0.00999999977 : f32
    %44 = vector.broadcast %cst_19 : f32 to vector<16x256xf32>
    %45 = arith.mulf %44, %43 : vector<16x256xf32>
    %46 = arith.maximumf %43, %45 : vector<16x256xf32>
    %47 = arith.truncf %46 : vector<16x256xf32> to vector<16x256xbf16>
    %c0_20 = arith.constant 0 : index
    %c0_21 = arith.constant 0 : index
    %48 = vector.load %arg7[%c0_20, %c0_21] : memref<256x512xbf16, #tpu.memory_space<vmem>>, vector<256x512xbf16>
    %cst_22 = arith.constant dense<0.000000e+00> : vector<16x512xf32>
    %49 = tpu.matmul %47, %48, %cst_22 {dimension_numbers = #tpu.dot_dimension_numbers<[1], [0], [0], [1], [0, 0, 1, 1], [], []>} : vector<16x256xbf16>, vector<256x512xbf16>, vector<16x512xf32> -> vector<16x512xf32>
    %c0_23 = arith.constant 0 : index
    %c0_24 = arith.constant 0 : index
    %50 = vector.load %arg8[%c0_23, %c0_24] : memref<1x512xf32, #tpu.memory_space<vmem>>, vector<1x512xf32>
    %c0_25 = arith.constant 0 : index
    %c0_26 = arith.constant 0 : index
    %51 = vector.load %arg9[%c0_25, %c0_26] : memref<1x512xf32, #tpu.memory_space<vmem>>, vector<1x512xf32>
    %cst_27 = arith.constant dense<0.000000e+00> : vector<1x512xf32>
    %52 = tpu.matmul %7, %49, %cst_27 {dimension_numbers = #tpu.dot_dimension_numbers<[1], [0], [0], [1], [0, 0, 1, 1], [], []>} : vector<1x16xf32>, vector<16x512xf32>, vector<1x512xf32> -> vector<1x512xf32>
    %53 = arith.mulf %49, %49 : vector<16x512xf32>
    %cst_28 = arith.constant dense<0.000000e+00> : vector<1x512xf32>
    %54 = tpu.matmul %7, %53, %cst_28 {dimension_numbers = #tpu.dot_dimension_numbers<[1], [0], [0], [1], [0, 0, 1, 1], [], []>} : vector<1x16xf32>, vector<16x512xf32>, vector<1x512xf32> -> vector<1x512xf32>
    %55 = vector.broadcast %2 : f32 to vector<1x512xf32>
    %56 = arith.mulf %52, %55 : vector<1x512xf32>
    %57 = vector.broadcast %2 : f32 to vector<1x512xf32>
    %58 = arith.mulf %54, %57 : vector<1x512xf32>
    %59 = arith.mulf %56, %56 : vector<1x512xf32>
    %60 = arith.subf %58, %59 : vector<1x512xf32>
    %cst_29 = arith.constant 0.000000e+00 : f32
    %61 = vector.broadcast %cst_29 : f32 to vector<1x512xf32>
    %62 = arith.maximumf %60, %61 : vector<1x512xf32>
    %cst_30 = arith.constant 9.99999974E-6 : f32
    %63 = vector.broadcast %cst_30 : f32 to vector<1x512xf32>
    %64 = arith.addf %62, %63 : vector<1x512xf32>
    %65 = math.rsqrt %64 : vector<1x512xf32>
    %66 = arith.mulf %50, %65 : vector<1x512xf32>
    %67 = arith.mulf %56, %66 : vector<1x512xf32>
    %68 = arith.subf %51, %67 : vector<1x512xf32>
    %69 = vector.broadcast %66 : vector<1x512xf32> to vector<16x512xf32>
    %70 = arith.mulf %49, %69 : vector<16x512xf32>
    %71 = vector.broadcast %68 : vector<1x512xf32> to vector<16x512xf32>
    %72 = arith.addf %70, %71 : vector<16x512xf32>
    %cst_31 = arith.constant 0.00999999977 : f32
    %73 = vector.broadcast %cst_31 : f32 to vector<16x512xf32>
    %74 = arith.mulf %73, %72 : vector<16x512xf32>
    %75 = arith.maximumf %72, %74 : vector<16x512xf32>
    %76 = arith.truncf %75 : vector<16x512xf32> to vector<16x512xbf16>
    %c0_32 = arith.constant 0 : index
    %c0_33 = arith.constant 0 : index
    %77 = vector.load %arg10[%c0_32, %c0_33] : memref<512x1024xbf16, #tpu.memory_space<vmem>>, vector<512x1024xbf16>
    %cst_34 = arith.constant dense<0.000000e+00> : vector<16x1024xf32>
    %78 = tpu.matmul %76, %77, %cst_34 {dimension_numbers = #tpu.dot_dimension_numbers<[1], [0], [0], [1], [0, 0, 1, 1], [], []>} : vector<16x512xbf16>, vector<512x1024xbf16>, vector<16x1024xf32> -> vector<16x1024xf32>
    %c0_35 = arith.constant 0 : index
    %c0_36 = arith.constant 0 : index
    %79 = vector.load %arg11[%c0_35, %c0_36] : memref<1x1024xf32, #tpu.memory_space<vmem>>, vector<1x1024xf32>
    %80 = vector.broadcast %79 : vector<1x1024xf32> to vector<16x1024xf32>
    %81 = arith.addf %78, %80 : vector<16x1024xf32>
    %82 = math.tanh %81 : vector<16x1024xf32>
    %83 = arith.truncf %82 : vector<16x1024xf32> to vector<16x1024xbf16>
    %c0_37 = arith.constant 0 : index
    %c0_38 = arith.constant 0 : index
    %84 = vector.load %arg12[%c0_37, %c0_38] : memref<16x1024xbf16, #tpu.memory_space<vmem>>, vector<16x1024xbf16>
    tpu.vector_store %arg12[%c0_37, %c0_38], %83 {strides = array<i32>} : memref<16x1024xbf16, #tpu.memory_space<vmem>>, vector<16x1024xbf16>,
    return
  }
}

</mosaic_0001>

<bundles_post_ra>
// kernel: tpu_custom_call.1
= control target key start
LH: loop header
LB: loop body
LE: loop exit
PB: predicated region body
PF: predicated region fallthrough
CT: control target
= control target key end

     0   :  { %18 = vsyncpa [#allocation4], 0  ;;  %s5854_s0 = inlined_call_operand.<no memory space> [shape: s32[1], index: 0, kind: input, shape index: {}]   ;;  %s5855_s1 = inlined_call_operand.hbm [shape: f32[16,32], index: 1, kind: input, shape index: {}]   ;;  %s5856_s2 = inlined_call_operand.hbm [shape: bf16[32,128], index: 2, kind: input, shape index: {}]   ;;  %s5857_s3 = inlined_call_operand.vmem [shape: f32[1,128], index: 3, kind: input, shape index: {}]   ;;  %s5858_s4 = inlined_call_operand.hbm [shape: bf16[128,256], index: 4, kind: input, shape index: {}]   ;;  %s5859_s5 = inlined_call_operand.vmem [shape: f32[1,256], index: 5, kind: input, shape index: {}]   ;;  %s5860_s6 = inlined_call_operand.hbm [shape: f32[1,256], index: 6, kind: input, shape index: {}]   ;;  %s5861_s7 = inlined_call_operand.hbm [shape: bf16[256,512], index: 7, kind: input, shape index: {}]   ;;  %s5862_s8 = inlined_call_operand.hbm [shape: f32[1,512], index: 8, kind: input, shape index: {}]   ;;  %s5863_s9 = inlined_call_operand.hbm [shape: f32[1,512], index: 9, kind: input, shape index: {}]   ;;  %s5864_s10 = inlined_call_operand.hbm [shape: bf16[512,1024], index: 10, kind: input, shape index: {}]   ;;  %s5865_s11 = inlined_call_operand.vmem [shape: f32[1,1024], index: 11, kind: input, shape index: {}]   ;;  %s5866_s12 = inlined_call_operand.hbm [shape: bf16[16,1024], index: 12, kind: output, shape index: {}]  }
   0x1   :  { %19 = vsyncpa [#allocation7], 0 }
   0x2   :  { %20 = vsyncpa [#allocation10], 0 }
   0x3   :  { %21 = vsyncpa [#allocation13], 0 }
   0x4   :  { %22 = vsyncpa [#allocation16], 0  ;;  %s43_s23 = sshll.u32 %s5856_s2, 4  ;;  %s44_s23 = int_to_ptr.hbm [resolvable:$true] %s43_s23 }
   0x5   :  { %23 = vsyncpa [#allocation5], 0  ;;  %s5393_s24 = smov [#allocation6]   ;;  %s74_s28 = sshll.u32 %s5860_s6, 4  ;;  %s75_s28 = int_to_ptr.hbm [resolvable:$true] %s74_s28 }
   0x6   :  { %s45_s25 = sshll.u32 %s5393_s24, 4  ;;  %s5394_s29 = smov 64   ;;  %s46_s25 = int_to_ptr.vmem [resolvable:$true] %s45_s25 }
   0x7   :  { %s5395_s30 = smov 4   ;;  %s5396_s13 = smov [#allocation9]  }
   0x8   :  { %51 = dma.hbm_to_vmem [thread:$0]  %s44_s23, 256, %s46_s25, [#allocation7], %s5394_s29, %s5394_s29, %s5395_s30  }
   0x9   :  { %s76_s14 = sshll.u32 %s5396_s13, 4  ;;  %s98_s17 = sshll.u32 %s5862_s8, 4  ;;  %s77_s14 = int_to_ptr.vmem [resolvable:$true] %s76_s14  ;;  %s99_s17 = int_to_ptr.hbm [resolvable:$true] %s98_s17 }
   0xa   :  { %79 = dma.hbm_to_vmem [thread:$0]  %s75_s28, 32, %s77_s14, [#allocation10]  }
   0xb   :  { %s30_s19 = sshll.u32 %s5855_s1, 4  ;;  %s5397_s20 = smov [#allocation12]   ;;  %s31_s19 = int_to_ptr.hbm [resolvable:$true] %s30_s19 }
   0xc   :  { %s100_s21 = sshll.u32 %s5397_s20, 4  ;;  %s5398_s6 = smov [#allocation3]   ;;  %s101_s21 = int_to_ptr.vmem [resolvable:$true] %s100_s21 }
   0xd   :  { %103 = dma.hbm_to_vmem [thread:$0]  %s99_s17, 64, %s101_s21, [#allocation13]  }
   0xe   :  { %s32_s22 = sshll.u32 %s5398_s6, 4  ;;  %s5399_s23 = smov 128   ;;  %s33_s22 = int_to_ptr.vmem [resolvable:$true] %s32_s22 }
   0xf   :  { %s5400_s24 = smov 8   ;;  %s58_s26 = sshll.u32 %s5858_s4, 4  ;;  %s59_s26 = int_to_ptr.hbm [resolvable:$true] %s58_s26 }
  0x10   :  { %38 = dma.hbm_to_vmem [thread:$0]  %s31_s19, 256, %s33_s22, [#allocation4], %s5399_s23, %s5399_s23, %s5400_s24  }
  0x11   :  { %s5401_s27 = smov [#allocation8]   ;;  %s84_s30 = sshll.u32 %s5861_s7, 4  ;;  %s85_s30 = int_to_ptr.hbm [resolvable:$true] %s84_s30 }
  0x12   :  { %s60_s28 = sshll.u32 %s5401_s27, 4  ;;  %s5402_s13 = smov [#allocation11]   ;;  %s61_s28 = int_to_ptr.vmem [resolvable:$true] %s60_s28 }
  0x13   :  { %66 = dma.hbm_to_vmem [thread:$0]  %s59_s26, 2048, %s61_s28, [#allocation7], %s5399_s23, %s5399_s23, %s5400_s24  }
  0x14   :  { %s86_s14 = sshll.u32 %s5402_s13, 4  ;;  %s5403_s15 = smov 256   ;;  %s87_s14 = int_to_ptr.vmem [resolvable:$true] %s86_s14 }
  0x15   :  { %s5404_s16 = smov 16   ;;  %s109_s4 = sshll.u32 %s5863_s9, 4  ;;  %s110_s4 = int_to_ptr.hbm [resolvable:$true] %s109_s4 }
  0x16   :  { %92 = dma.hbm_to_vmem [thread:$0]  %s85_s30, 8192, %s87_s14, [#allocation10], %s5403_s15, %s5403_s15, %s5404_s16  }
  0x17   :  { %s5405_s18 = smov [#allocation14]   ;;  %s119_s7 = sshll.u32 %s5864_s10, 4  ;;  %s120_s7 = int_to_ptr.hbm [resolvable:$true] %s119_s7 }
  0x18   :  { %s111_s19 = sshll.u32 %s5405_s18, 4  ;;  %s5406_s6 = smov [#allocation15]   ;;  %s112_s19 = int_to_ptr.vmem [resolvable:$true] %s111_s19 }
  0x19   :  { %114 = dma.hbm_to_vmem [thread:$0]  %s110_s4, 64, %s112_s19, [#allocation13]  }
  0x1a   :  { %s121_s22 = sshll.u32 %s5406_s6, 4  ;;  %s5407_s23 = smov 512   ;;  %s122_s22 = int_to_ptr.vmem [resolvable:$true] %s121_s22 }
  0x1b   :  { %s5408_s24 = smov 32  }
  0x1c   :  { %127 = dma.hbm_to_vmem [thread:$0]  %s120_s7, 32768, %s122_s22, [#allocation16], %s5407_s23, %s5407_s23, %s5408_s24  }
  0x1d   :  { %5381 = dma.done.wait [#allocation4], 256  }
  0x1e   :  { %5382 = vsyncadd [#allocation4], 4294967040 }
  0x1f   :  { %5383 = dma.done.wait [#allocation7], 2304  }
  0x20   :  { %5384 = vsyncadd [#allocation7], 4294964992 }
  0x21   :  { %5385 = dma.done.wait [#allocation10], 8224  }
  0x22   :  { %5386 = vsyncadd [#allocation10], 4294959072 }
  0x23   :  { %5387 = dma.done.wait [#allocation13], 128  }
  0x24   :  { %5388 = vsyncadd [#allocation13], 4294967168 }
  0x25   :  { %5389 = dma.done.wait [#allocation16], 32768  }
  0x26   :  { %5390 = vsyncadd [#allocation16], 4294934528  ;;  %v4761_v0 = vld [vmem:[#allocation6 + $0x8] sm:$0xff]  ;;  %v4760_v1 = vld [vmem:[#allocation6] sm:$0xff]  ;;  %vm210_vm0 = vcmask 261120   ;;  %s164_s26 = scvt.s32.f32 %s5854_s0  ;;  %vm359_vm4 = vcmask 130048  }
  0x27   :  { %v187_v2 = vld [vmem:[#allocation3] sm:$0xff]  ;;  %v188_v3 = vld [vmem:[#allocation3 + $0x8] sm:$0xff]  ;;  %v3462_v4 = vld [vmem:[#allocation8 + $0x70] sm:$0xf]  ;;  %220 = vmatpush.bf16.msra.mxu0 %v4761_v0  ;;  %v181_v0 = vlaneseq  ;;  %vm483_vm11 = vcmask 1040384   ;;  %s3377_s15 = sshll.u32 %s5866_s12, 4  ;;  %s3378_s15 = int_to_ptr.hbm [resolvable:$true] %s3377_s15 }
  0x28   :  { %v4777_v5 = vld [vmem:[#allocation8 + $0x74] sm:$0xf0]  ;;  %v4776_v7 = vld [vmem:[#allocation8 + $0x74] sm:$0xf]  ;;  %v3464_v8 = vld [vmem:[#allocation8 + $0x78] sm:$0xf0]  ;;  %v189_v15 = vpack.c.bf16 %v188_v3, %v187_v2  ;;  %v165_v63 = vstv %s164_s26  ;;  %v183_v3 = vstv %s5854_s0 }
  0x29   :  { %v3463_v6 = vor.u32 %v4777_v5, %v3462_v4  ;;  %v3454_v9 = vld [vmem:[#allocation8 + $0x60] sm:$0xf]  ;;  %v3467_v10 = vor.u32 %v4776_v7, %v3464_v8  ;;  %v4775_v11 = vld [vmem:[#allocation8 + $0x64] sm:$0xf0]  ;;  %v4774_v12 = vld [vmem:[#allocation8 + $0x64] sm:$0xf]  ;;  %5119 = vrcp.f32 %v165_v63  ;;  %vm171_vm2 = vweird.f32 %v165_v63 }
  0x2a   :  { %v3456_v13 = vld [vmem:[#allocation8 + $0x68] sm:$0xf0]  ;;  %v3455_v14 = vor.u32 %v4775_v11, %v3454_v9  ;;  %v3446_v17 = vld [vmem:[#allocation8 + $0x50] sm:$0xf]  ;;  %v4773_v18 = vld [vmem:[#allocation8 + $0x54] sm:$0xf0] }
  0x2b   :  { %329 = vmatpush.bf16.msra.mxu1 %v3463_v6  ;;  %343 = vmatpush.bf16.msra.mxu2 %v3467_v10  ;;  %v3459_v16 = vor.u32 %v4774_v12, %v3456_v13  ;;  %v4772_v19 = vld [vmem:[#allocation8 + $0x54] sm:$0xf]  ;;  %v3448_v20 = vld [vmem:[#allocation8 + $0x58] sm:$0xf0]  ;;  %v3447_v21 = vor.u32 %v4773_v18, %v3446_v17  ;;  %v3438_v23 = vld [vmem:[#allocation8 + $0x40] sm:$0xf] }
  0x2c   :  { %221 = vmatpush.bf16.msra.mxu0 %v4760_v1  ;;  %v3451_v22 = vor.u32 %v4772_v19, %v3448_v20  ;;  %v4771_v24 = vld [vmem:[#allocation8 + $0x44] sm:$0xf0]  ;;  %v4770_v25 = vld [vmem:[#allocation8 + $0x44] sm:$0xf]  ;;  %v3440_v26 = vld [vmem:[#allocation8 + $0x48] sm:$0xf0] }
  0x2d   :  { %v3439_v27 = vor.u32 %v4771_v24, %v3438_v23  ;;  %v3443_v28 = vor.u32 %v4770_v25, %v3440_v26  ;;  %v3430_v29 = vld [vmem:[#allocation8 + $0x30] sm:$0xf]  ;;  %v4769_v30 = vld [vmem:[#allocation8 + $0x34] sm:$0xf0]  ;;  %v4768_v31 = vld [vmem:[#allocation8 + $0x34] sm:$0xf] }
  0x2e   :  { %v3431_v32 = vor.u32 %v4769_v30, %v3430_v29  ;;  %v3432_v33 = vld [vmem:[#allocation8 + $0x38] sm:$0xf0]  ;;  %v3422_v35 = vld [vmem:[#allocation8 + $0x20] sm:$0xf]  ;;  %v4767_v36 = vld [vmem:[#allocation8 + $0x24] sm:$0xf0] }
  0x2f   :  { %330 = vmatpush.bf16.msra.mxu1 %v3455_v14  ;;  %3403 = vmatmul.msk.bf16.vlgmr.msra.gmra.mxu0 %vm210_vm0, %v189_v15  ;;  %v3435_v34 = vor.u32 %v4768_v31, %v3432_v33  ;;  %v4766_v37 = vld [vmem:[#allocation8 + $0x24] sm:$0xf]  ;;  %v3423_v38 = vor.u32 %v4767_v36, %v3422_v35  ;;  %v3424_v39 = vld [vmem:[#allocation8 + $0x28] sm:$0xf0]  ;;  %v3414_v41 = vld [vmem:[#allocation8 + $0x10] sm:$0xf]  ;;  %v5120_v4 = vpop.eup %5119 }
  0x30   :  { %344 = vmatpush.bf16.msra.mxu2 %v3459_v16  ;;  %v3427_v40 = vor.u32 %v4766_v37, %v3424_v39  ;;  %v4765_v42 = vld [vmem:[#allocation8 + $0x14] sm:$0xf0]  ;;  %v4764_v43 = vld [vmem:[#allocation8 + $0x14] sm:$0xf]  ;;  %v3416_v45 = vld [vmem:[#allocation8 + $0x18] sm:$0xf0]  ;;  %v167_v5 = vmul.f32 %v5120_v4, %v165_v63  ;;  %vm172_vm3 = vweird.f32 %v5120_v4 }
  0x31   :  { %v3415_v44 = vor.u32 %v4765_v42, %v3414_v41  ;;  %v3419_v46 = vor.u32 %v4764_v43, %v3416_v45  ;;  %v3406_v47 = vld [vmem:[#allocation8] sm:$0xf]  ;;  %v4763_v48 = vld [vmem:[#allocation8 + $0x4] sm:$0xf0]  ;;  %v4762_v49 = vld [vmem:[#allocation8 + $0x4] sm:$0xf] }
  0x32   :  { %v3407_v50 = vor.u32 %v4763_v48, %v3406_v47  ;;  %v3408_v51 = vld [vmem:[#allocation8 + $0x8] sm:$0xf0]  ;;  %v5118_v54 = vld [vmem:[%s5857_s3] ss:$0 sm:$0xff]  ;;  %v182_v2 = vand.u32 127, %v181_v0  ;;  %v177_v6 = vand.u32 2147483648, %v165_v63  ;;  %vm173_vm5 = vmor %vm171_vm2, %vm172_vm3 }
  0x33   :  { %331 = vmatpush.bf16.msra.mxu1 %v3447_v21  ;;  %v3411_v52 = vor.u32 %v4762_v49, %v3408_v51  ;;  %v168_v8 = vsub.f32 1.0, %v167_v5  ;;  %v175_v9 = vand.u32 2147483647, %v165_v63  ;;  %v5409_v12 = vmov 0.0   ;;  %v3586_v23 = vld [vmem:[#allocation11 + $0xe0] sm:$0xf] }
  0x34   :  { %345 = vmatpush.bf16.msra.mxu2 %v3451_v22  ;;  %vm184_vm1 = vcmp.lt.s32.totalorder %v182_v2, %v183_v3  ;;  %v178_v14 = vor.u32 1.1754944e-38, %v177_v6  ;;  %v4808_v24 = vld [vmem:[#allocation11 + $0xec] sm:$0xf0]  ;;  %v3714_v25 = vld [vmem:[#allocation11 + $0x1e0] sm:$0xf] }
  0x35   :  { %v169_v11 = vmul.f32 %v5120_v4, %v168_v8  ;;  %v5519_v13 = vsel %vm184_vm1, 1.0, %v5409_v12  ;;  %vm176_vm6 = vcmp.eq.f32.partialorder %v175_v9, 8.507059e+37  ;;  %v3587_v26 = vor.u32 %v4808_v24, %v3586_v23  ;;  %v3588_v29 = vld [vmem:[#allocation11 + $0xf0] sm:$0xf0]  ;;  %v3570_v35 = vld [vmem:[#allocation11 + $0xc0] sm:$0xf] }
  0x36   :  { %v3716_v33 = vld [vmem:[#allocation11 + $0x1f0] sm:$0xf0]  ;;  %v4804_v36 = vld [vmem:[#allocation11 + $0xcc] sm:$0xf0]  ;;  %v3698_v37 = vld [vmem:[#allocation11 + $0x1c0] sm:$0xf] }
  0x37   :  { %332 = vmatpush.bf16.msra.mxu1 %v3439_v27  ;;  %v170_v15 = vadd.f32 %v5120_v4, %v169_v11  ;;  %v4840_v27 = vld [vmem:[#allocation11 + $0x1ec] sm:$0xf0]  ;;  %v3572_v41 = vld [vmem:[#allocation11 + $0xd0] sm:$0xf0]  ;;  %v3554_v47 = vld [vmem:[#allocation11 + $0xa0] sm:$0xf] }
  0x38   :  { %346 = vmatpush.bf16.msra.mxu2 %v3443_v28  ;;  %v4806_v28 = vld [vmem:[#allocation11 + $0xe4] sm:$0xf]  ;;  %v3715_v30 = vor.u32 %v4840_v27, %v3714_v25  ;;  %v4836_v39 = vld [vmem:[#allocation11 + $0x1cc] sm:$0xf0]  ;;  %v3700_v45 = vld [vmem:[#allocation11 + $0x1d0] sm:$0xf0] }
  0x39   :  { %v174_v16 = vsel %vm173_vm5, %v5120_v4, %v170_v15  ;;  %v3591_v31 = vor.u32 %v4806_v28, %v3588_v29  ;;  %v3699_v42 = vor.u32 %v4836_v39, %v3698_v37  ;;  %v4800_v48 = vld [vmem:[#allocation11 + $0xac] sm:$0xf0]  ;;  %v3682_v49 = vld [vmem:[#allocation11 + $0x1a0] sm:$0xf]  ;;  %v4794_v2 = vld [vmem:[#allocation11 + $0x84] sm:$0xf] }
  0x3a   :  { %v179_v17 = vsel %vm176_vm6, %v178_v14, %v174_v16  ;;  %v4832_v51 = vld [vmem:[#allocation11 + $0x1ac] sm:$0xf0]  ;;  %v3540_v3 = vld [vmem:[#allocation11 + $0x90] sm:$0xf0]  ;;  %v4826_v6 = vld [vmem:[#allocation11 + $0x184] sm:$0xf] }
  0x3b   :  { %333 = vmatpush.bf16.msra.mxu1 %v3431_v32  ;;  %5098 = vpush %v179_v17  ;;  %v4838_v32 = vld [vmem:[#allocation11 + $0x1e4] sm:$0xf]  ;;  %v4828_v0 = vld [vmem:[#allocation11 + $0x18c] sm:$0xf0]  ;;  %v3543_v5 = vor.u32 %v4794_v2, %v3540_v3  ;;  %v3668_v8 = vld [vmem:[#allocation11 + $0x190] sm:$0xf0] }
  0x3c   :  { %347 = vmatpush.bf16.msra.mxu2 %v3435_v34  ;;  %v3719_v34 = vor.u32 %v4838_v32, %v3716_v33  ;;  %v3671_v9 = vor.u32 %v4826_v6, %v3668_v8  ;;  %v3522_v11 = vld [vmem:[#allocation11 + $0x60] sm:$0xf]  ;;  %v4792_v12 = vld [vmem:[#allocation11 + $0x6c] sm:$0xf0]  ;;  %v4790_v17 = vld [vmem:[#allocation11 + $0x64] sm:$0xf] }
  0x3d   :  { %v3650_v14 = vld [vmem:[#allocation11 + $0x160] sm:$0xf]  ;;  %v3523_v15 = vor.u32 %v4792_v12, %v3522_v11  ;;  %v4824_v16 = vld [vmem:[#allocation11 + $0x16c] sm:$0xf0]  ;;  %v3652_v23 = vld [vmem:[#allocation11 + $0x170] sm:$0xf0] }
  0x3e   :  { %v4788_v27 = vld [vmem:[#allocation11 + $0x4c] sm:$0xf0]  ;;  %v3634_v28 = vld [vmem:[#allocation11 + $0x140] sm:$0xf]  ;;  %v4786_v33 = vld [vmem:[#allocation11 + $0x44] sm:$0xf] }
  0x3f   :  { %334 = vmatpush.bf16.msra.mxu1 %v3423_v38  ;;  %v3571_v38 = vor.u32 %v4804_v36, %v3570_v35  ;;  %v4820_v32 = vld [vmem:[#allocation11 + $0x14c] sm:$0xf0]  ;;  %v4818_v39 = vld [vmem:[#allocation11 + $0x144] sm:$0xf]  ;;  %v3476_v6 = vld [vmem:[#allocation11 + $0x10] sm:$0xf0] }
  0x40   :  { %348 = vmatpush.bf16.msra.mxu2 %v3427_v40  ;;  %v4802_v40 = vld [vmem:[#allocation11 + $0xc4] sm:$0xf]  ;;  %v3635_v37 = vor.u32 %v4820_v32, %v3634_v28  ;;  %v3604_v11 = vld [vmem:[#allocation11 + $0x110] sm:$0xf0]  ;;  %v3594_v12 = vld [vmem:[#allocation11 + $0xe8] sm:$0xf] }
  0x41   :  { %v3575_v43 = vor.u32 %v4802_v40, %v3572_v41  ;;  %v3636_v40 = vld [vmem:[#allocation11 + $0x150] sm:$0xf0]  ;;  %v4778_v2 = vld [vmem:[#allocation11 + $0x4] sm:$0xf] }
  0x42   :  { %v3639_v41 = vor.u32 %v4818_v39, %v3636_v40  ;;  %v4810_v8 = vld [vmem:[#allocation11 + $0x104] sm:$0xf]  ;;  %v3580_v39 = vld [vmem:[#allocation11 + $0xd8] sm:$0xf0]  ;;  %v4835_v40 = vld [vmem:[#allocation11 + $0x1cc] sm:$0xf] }
  0x43   :  { %335 = vmatpush.bf16.msra.mxu1 %v3415_v44  ;;  %v4834_v44 = vld [vmem:[#allocation11 + $0x1c4] sm:$0xf] }
  0x44   :  { %349 = vmatpush.bf16.msra.mxu2 %v3419_v46  ;;  %v3703_v46 = vor.u32 %v4834_v44, %v3700_v45  ;;  %v4784_v44 = vld [vmem:[#allocation11 + $0x2c] sm:$0xf0]  ;;  %v3618_v45 = vld [vmem:[#allocation11 + $0x120] sm:$0xf] }
  0x47   :  { %336 = vmatpush.bf16.msra.mxu1 %v3407_v50  ;;  %v3555_v50 = vor.u32 %v4800_v48, %v3554_v47  ;;  %v4816_v47 = vld [vmem:[#allocation11 + $0x12c] sm:$0xf0]  ;;  %v4782_v48 = vld [vmem:[#allocation11 + $0x24] sm:$0xf] }
  0x48   :  { %350 = vmatpush.bf16.msra.mxu2 %v3411_v52  ;;  %v4798_v52 = vld [vmem:[#allocation11 + $0xa4] sm:$0xf] }
  0x4b   :  { %935 = vmatpush.bf16.msrb.mxu1 %v3591_v31 }
  0x4c   :  { %949 = vmatpush.bf16.msrb.mxu2 %v3719_v34  ;;  %v3508_v34 = vld [vmem:[#allocation11 + $0x50] sm:$0xf0] }
  0x4f   :  { %936 = vmatpush.bf16.msrb.mxu1 %v3575_v43  ;;  %v3490_v43 = vld [vmem:[#allocation11 + $0x20] sm:$0xf] }
  0x50   :  { %950 = vmatpush.bf16.msrb.mxu2 %v3703_v46  ;;  %v3491_v46 = vor.u32 %v4784_v44, %v3490_v43  ;;  %v3562_v43 = vld [vmem:[#allocation11 + $0xa8] sm:$0xf]  ;;  %v4801_v44 = vld [vmem:[#allocation11 + $0xb4] sm:$0xf0] }
  0x6c   :  { %s5099_s0 = spop %5098 }
  0x6d   :  { %v5542_v29 = vstv %s5099_s0 }
  0xac   :  { %v223_v53 = vpop.f32.mrf.mxu0 }
  0xad   :  { %v224_v55 = vadd.f32 %v5118_v54, %v223_v53  ;;  %v3556_v53 = vld [vmem:[#allocation11 + $0xb0] sm:$0xf0] }
  0xaf   :  { %v228_v57 = vmul.f32 0.01, %v224_v55 }
  0xb1   :  { %v230_v60 = vmax.f32 %v224_v55, %v228_v57  ;;  %v3559_v55 = vor.u32 %v4798_v52, %v3556_v53  ;;  %v3684_v57 = vld [vmem:[#allocation11 + $0x1b0] sm:$0xf0]  ;;  %v3619_v52 = vor.u32 %v4816_v47, %v3618_v45  ;;  %v3690_v47 = vld [vmem:[#allocation11 + $0x1a8] sm:$0xf] }
  0xb3   :  { %937 = vmatpush.bf16.msrb.mxu1 %v3559_v55  ;;  %v3620_v55 = vld [vmem:[#allocation11 + $0x130] sm:$0xf0] }
  0xb4   :  { %v225_v56 = vpop.f32.mrf.mxu0 }
  0xb5   :  { %v226_v58 = vadd.f32 %v5118_v54, %v225_v56  ;;  %v3683_v54 = vor.u32 %v4832_v51, %v3682_v49  ;;  %v4830_v56 = vld [vmem:[#allocation11 + $0x1a4] sm:$0xf]  ;;  %v3492_v49 = vld [vmem:[#allocation11 + $0x30] sm:$0xf0] }
  0xb6   :  { %v3495_v53 = vor.u32 %v4782_v48, %v3492_v49  ;;  %v4833_v48 = vld [vmem:[#allocation11 + $0x1b4] sm:$0xf0]  ;;  %v4799_v49 = vld [vmem:[#allocation11 + $0xac] sm:$0xf] }
  0xb7   :  { %v229_v59 = vmul.f32 0.01, %v226_v58  ;;  %938 = vmatpush.bf16.msrb.mxu1 %v3543_v5 }
  0xb9   :  { %v231_v61 = vmax.f32 %v226_v58, %v229_v59  ;;  %v3687_v58 = vor.u32 %v4830_v56, %v3684_v57  ;;  %v3538_v59 = vld [vmem:[#allocation11 + $0x80] sm:$0xf] }
  0xbb   :  { %v232_v62 = vpack.c.bf16 %v231_v61, %v230_v60  ;;  %v4796_v60 = vld [vmem:[#allocation11 + $0x8c] sm:$0xf0]  ;;  %v3666_v61 = vld [vmem:[#allocation11 + $0x180] sm:$0xf]  ;;  %951 = vmatpush.bf16.msrb.mxu2 %v3687_v58 }
  0xbc   :  { %v3539_v63 = vor.u32 %v4796_v60, %v3538_v59  ;;  %v3667_v4 = vor.u32 %v4828_v0, %v3666_v61  ;;  %v3474_v58 = vld [vmem:[#allocation11] sm:$0xf]  ;;  %v4780_v59 = vld [vmem:[#allocation11 + $0xc] sm:$0xf0] }
  0xbd   :  { %337 = vmatmul.bf16.vlgmr.msra.gmra.mxu1 %v232_v62  ;;  %351 = vmatmul.bf16.vlgmr.msra.gmra.mxu2 %v232_v62  ;;  %v3475_v61 = vor.u32 %v4780_v59, %v3474_v58  ;;  %v4812_v0 = vld [vmem:[#allocation11 + $0x10c] sm:$0xf0]  ;;  %v3546_v59 = vld [vmem:[#allocation11 + $0x88] sm:$0xf] }
  0xbf   :  { %952 = vmatpush.bf16.msrb.mxu2 %v3671_v9  ;;  %v3479_v9 = vor.u32 %v4778_v2, %v3476_v6  ;;  %v4795_v2 = vld [vmem:[#allocation11 + $0x8c] sm:$0xf] }
 0x13a   :  { %v5509_v1 = vpop.f32.mrf.mxu1 }
 0x13b   :  { %v403_v22 = vmul.f32 %v5509_v1, %v5509_v1 }
 0x140   :  { %v5514_v7 = vpop.f32.mrf.mxu2 }
 0x141   :  { %v404_v21 = vmul.f32 %v5514_v7, %v5514_v7 }
 0x142   :  { %v5516_v10 = vpop.f32.mrf.mxu1 }
 0x143   :  { %377 = vmatpush.msra.mxu3 %v5516_v10  ;;  %v405_v20 = vmul.f32 %v5516_v10, %v5516_v10 }
 0x145   :  { %378 = vmatpush.msra.mxu3 %v5509_v1 }
 0x146   :  { %3468 = vmatmul.msk.f32.vlgmr.msra.gmra.mxu3 %vm359_vm4, %v5519_v13 }
 0x148   :  { %v5524_v18 = vpop.f32.mrf.mxu2 }
 0x149   :  { %397 = vmatpush.msrb.mxu3 %v5524_v18  ;;  %v406_v19 = vmul.f32 %v5524_v18, %v5524_v18 }
 0x14b   :  { %398 = vmatpush.msrb.mxu3 %v5514_v7  ;;  %441 = vmatpush.msrb.mxu0 %v406_v19  ;;  %v3524_v19 = vld [vmem:[#allocation11 + $0x70] sm:$0xf0] }
 0x14d   :  { %421 = vmatpush.msra.mxu3 %v405_v20  ;;  %442 = vmatpush.msrb.mxu0 %v404_v21  ;;  %v3651_v20 = vor.u32 %v4824_v16, %v3650_v14  ;;  %v3527_v21 = vor.u32 %v4790_v17, %v3524_v19  ;;  %v4809_v14 = vld [vmem:[#allocation11 + $0xf4] sm:$0xf0]  ;;  %v3607_v16 = vor.u32 %v4810_v8, %v3604_v11  ;;  %v3722_v17 = vld [vmem:[#allocation11 + $0x1e8] sm:$0xf] }
 0x14e   :  { %3469 = vmatmul.msk.f32.vlgmr.msrb.gmra.mxu3 %vm359_vm4, %v5519_v13  ;;  %3471 = vmatmul.msk.f32.vlgmr.msrb.gmra.mxu0 %vm359_vm4, %v5519_v13  ;;  %v4841_v19 = vld [vmem:[#allocation11 + $0x1f4] sm:$0xf0] }
 0x14f   :  { %422 = vmatpush.msra.mxu3 %v403_v22  ;;  %921 = vmatpush.bf16.msra.mxu0 %v3715_v30  ;;  %v4822_v22 = vld [vmem:[#allocation11 + $0x164] sm:$0xf] }
 0x150   :  { %v3655_v25 = vor.u32 %v4822_v22, %v3652_v23  ;;  %939 = vmatpush.bf16.msrb.mxu1 %v3527_v21  ;;  %v3595_v21 = vor.u32 %v4809_v14, %v3594_v12  ;;  %v3723_v22 = vor.u32 %v4841_v19, %v3722_v17  ;;  %v3596_v23 = vld [vmem:[#allocation11 + $0xf8] sm:$0xf0]  ;;  %v3530_v17 = vld [vmem:[#allocation11 + $0x68] sm:$0xf]  ;;  %v4793_v19 = vld [vmem:[#allocation11 + $0x74] sm:$0xf0] }
 0x151   :  { %907 = vmatpush.bf16.msrb.mxu3 %v3587_v26  ;;  %v3506_v26 = vld [vmem:[#allocation11 + $0x40] sm:$0xf] }
 0x152   :  { %953 = vmatpush.bf16.msrb.mxu2 %v3655_v25  ;;  %v3507_v31 = vor.u32 %v4788_v27, %v3506_v26  ;;  %v3724_v25 = vld [vmem:[#allocation11 + $0x1f8] sm:$0xf0] }
 0x153   :  { %922 = vmatpush.bf16.msra.mxu0 %v3699_v42 }
 0x155   :  { %908 = vmatpush.bf16.msrb.mxu3 %v3571_v38  ;;  %v3511_v38 = vor.u32 %v4786_v33, %v3508_v34  ;;  %v3706_v33 = vld [vmem:[#allocation11 + $0x1c8] sm:$0xf]  ;;  %v4837_v34 = vld [vmem:[#allocation11 + $0x1d4] sm:$0xf0] }
 0x156   :  { %3470 = vmatmul.msk.f32.vlgmr.msra.gmra.mxu3 %vm359_vm4, %v5519_v13  ;;  %954 = vmatpush.bf16.msrb.mxu2 %v3639_v41 }
 0x157   :  { %923 = vmatpush.bf16.msra.mxu0 %v3683_v54  ;;  %940 = vmatpush.bf16.msrb.mxu1 %v3511_v38  ;;  %v4814_v54 = vld [vmem:[#allocation11 + $0x124] sm:$0xf]  ;;  %v3707_v38 = vor.u32 %v4837_v34, %v3706_v33  ;;  %v4789_v33 = vld [vmem:[#allocation11 + $0x54] sm:$0xf0] }
 0x158   :  { %v3623_v56 = vor.u32 %v4814_v54, %v3620_v55  ;;  %v3564_v54 = vld [vmem:[#allocation11 + $0xb8] sm:$0xf0]  ;;  %v4831_v55 = vld [vmem:[#allocation11 + $0x1ac] sm:$0xf] }
 0x159   :  { %909 = vmatpush.bf16.msrb.mxu3 %v3555_v50 }
 0x15a   :  { %955 = vmatpush.bf16.msrb.mxu2 %v3623_v56  ;;  %v3692_v56 = vld [vmem:[#allocation11 + $0x1b8] sm:$0xf0] }
 0x15b   :  { %924 = vmatpush.bf16.msra.mxu0 %v3667_v4  ;;  %941 = vmatpush.bf16.msrb.mxu1 %v3495_v53  ;;  %v3691_v53 = vor.u32 %v4833_v48, %v3690_v47  ;;  %v3695_v58 = vor.u32 %v4831_v55, %v3692_v56  ;;  %v4819_v47 = vld [vmem:[#allocation11 + $0x14c] sm:$0xf]  ;;  %v3644_v48 = vld [vmem:[#allocation11 + $0x158] sm:$0xf0]  ;;  %v3626_v55 = vld [vmem:[#allocation11 + $0x128] sm:$0xf] }
 0x15c   :  { %v4817_v56 = vld [vmem:[#allocation11 + $0x134] sm:$0xf0] }
 0x15d   :  { %910 = vmatpush.bf16.msrb.mxu3 %v3539_v63  ;;  %v3602_v63 = vld [vmem:[#allocation11 + $0x100] sm:$0xf] }
 0x15e   :  { %v3603_v5 = vor.u32 %v4812_v0, %v3602_v63  ;;  %956 = vmatpush.bf16.msrb.mxu2 %v3607_v16  ;;  %v3674_v63 = vld [vmem:[#allocation11 + $0x188] sm:$0xf]  ;;  %v4829_v0 = vld [vmem:[#allocation11 + $0x194] sm:$0xf0] }
 0x15f   :  { %925 = vmatpush.bf16.msra.mxu0 %v3651_v20  ;;  %v4807_v20 = vld [vmem:[#allocation11 + $0xec] sm:$0xf]  ;;  %942 = vmatpush.bf16.msrb.mxu1 %v3479_v9  ;;  %v3675_v9 = vor.u32 %v4829_v0, %v3674_v63 }
 0x160   :  { %v3599_v27 = vor.u32 %v4807_v20, %v3596_v23  ;;  %v3531_v20 = vor.u32 %v4793_v19, %v3530_v17  ;;  %v3612_v17 = vld [vmem:[#allocation11 + $0x118] sm:$0xf0] }
 0x161   :  { %911 = vmatpush.bf16.msrb.mxu3 %v3523_v15 }
 0x163   :  { %926 = vmatpush.bf16.msra.mxu0 %v3635_v37  ;;  %991 = vmatpush.bf16.msra.mxu1 %v3599_v27  ;;  %v3532_v27 = vld [vmem:[#allocation11 + $0x78] sm:$0xf0] }
 0x165   :  { %912 = vmatpush.bf16.msrb.mxu3 %v3507_v31  ;;  %v4805_v31 = vld [vmem:[#allocation11 + $0xd4] sm:$0xf0] }
 0x167   :  { %927 = vmatpush.bf16.msra.mxu0 %v3619_v52  ;;  %v3563_v52 = vor.u32 %v4801_v44, %v3562_v43 }
 0x169   :  { %913 = vmatpush.bf16.msrb.mxu3 %v3491_v46 }
 0x16b   :  { %928 = vmatpush.bf16.msra.mxu0 %v3603_v5  ;;  %v3676_v5 = vld [vmem:[#allocation11 + $0x198] sm:$0xf0] }
 0x16d   :  { %914 = vmatpush.bf16.msrb.mxu3 %v3475_v61 }
 0x16f   :  { %977 = vmatpush.bf16.msrb.mxu0 %v3723_v22  ;;  %v4825_v22 = vld [vmem:[#allocation11 + $0x174] sm:$0xf0] }
 0x171   :  { %963 = vmatpush.bf16.msra.mxu3 %v3595_v21  ;;  %v3658_v21 = vld [vmem:[#allocation11 + $0x168] sm:$0xf] }
 0x173   :  { %978 = vmatpush.bf16.msrb.mxu0 %v3707_v38  ;;  %v3642_v38 = vld [vmem:[#allocation11 + $0x148] sm:$0xf] }
 0x177   :  { %979 = vmatpush.bf16.msrb.mxu0 %v3691_v53  ;;  %v3498_v53 = vld [vmem:[#allocation11 + $0x28] sm:$0xf] }
 0x17b   :  { %980 = vmatpush.bf16.msrb.mxu0 %v3675_v9  ;;  %v4813_v9 = vld [vmem:[#allocation11 + $0x114] sm:$0xf0] }
 0x1c9   :  { %v380_v62 = vpop.f32.mrf.mxu3 }
 0x1ca   :  { %v5551_v50 = vmul.f32 %v5542_v29, %v380_v62 }
 0x1cb   :  { %v444_v24 = vpop.f32.mrf.mxu0 }
 0x1cc   :  { %v451_v36 = vmul.f32 %v5542_v29, %v444_v24  ;;  %v452_v62 = vmul.f32 %v5551_v50, %v5551_v50  ;;  %v4839_v24 = vld [vmem:[#allocation11 + $0x1ec] sm:$0xf] }
 0x1cd   :  { %v3727_v28 = vor.u32 %v4839_v24, %v3724_v25  ;;  %v3659_v25 = vor.u32 %v4825_v22, %v3658_v21 }
 0x1cf   :  { %1005 = vmatpush.bf16.msra.mxu2 %v3727_v28  ;;  %v4823_v28 = vld [vmem:[#allocation11 + $0x16c] sm:$0xf]  ;;  %981 = vmatpush.bf16.msrb.mxu0 %v3659_v25  ;;  %v358_v25 = vld [vmem:[#allocation9] sm:$0x3] }
 0x1d1   :  { %v400_v30 = vpop.f32.mrf.mxu3 }
 0x1d2   :  { %v5545_v35 = vmul.f32 %v5542_v29, %v400_v30  ;;  %v3578_v30 = vld [vmem:[#allocation11 + $0xc8] sm:$0xf] }
 0x1d3   :  { %v3579_v32 = vor.u32 %v4805_v31, %v3578_v30  ;;  %v3660_v31 = vld [vmem:[#allocation11 + $0x178] sm:$0xf0] }
 0x1d4   :  { %v453_v42 = vmul.f32 %v5545_v35, %v5545_v35 }
 0x1d5   :  { %964 = vmatpush.bf16.msra.mxu3 %v3579_v32  ;;  %v3514_v32 = vld [vmem:[#allocation11 + $0x48] sm:$0xf] }
 0x1d6   :  { %v455_v51 = vsub.f32 %v451_v36, %v453_v42  ;;  %v4803_v36 = vld [vmem:[#allocation11 + $0xcc] sm:$0xf]  ;;  %v3708_v42 = vld [vmem:[#allocation11 + $0x1d8] sm:$0xf0]  ;;  %v3515_v44 = vor.u32 %v4789_v33, %v3514_v32 }
 0x1d7   :  { %v3583_v41 = vor.u32 %v4803_v36, %v3580_v39  ;;  %v3711_v46 = vor.u32 %v4835_v40, %v3708_v42  ;;  %v3663_v36 = vor.u32 %v4823_v28, %v3660_v31  ;;  %v4821_v39 = vld [vmem:[#allocation11 + $0x154] sm:$0xf0]  ;;  %v3516_v42 = vld [vmem:[#allocation11 + $0x58] sm:$0xf0] }
 0x1d8   :  { %v457_v57 = vmax.f32 %v455_v51, 0.0 }
 0x1d9   :  { %v424_v60 = vpop.f32.mrf.mxu3  ;;  %992 = vmatpush.bf16.msra.mxu1 %v3583_v41  ;;  %1006 = vmatpush.bf16.msra.mxu2 %v3711_v46  ;;  %v4787_v41 = vld [vmem:[#allocation11 + $0x4c] sm:$0xf]  ;;  %v3643_v46 = vor.u32 %v4821_v39, %v3642_v38 }
 0x1da   :  { %v5555_v3 = vadd.f32 1e-05, %v457_v57  ;;  %v450_v4 = vmul.f32 %v5542_v29, %v424_v60  ;;  %v3567_v57 = vor.u32 %v4799_v49, %v3564_v54  ;;  %v4797_v60 = vld [vmem:[#allocation11 + $0x94] sm:$0xf0]  ;;  %965 = vmatpush.bf16.msra.mxu3 %v3563_v52  ;;  %v357_v49 = vld [vmem:[%s5859_s5] sm:$0x3]  ;;  %v3647_v52 = vor.u32 %v4819_v47, %v3644_v48 }
 0x1db   :  { %v3547_v8 = vor.u32 %v4797_v60, %v3546_v59  ;;  %v4785_v54 = vld [vmem:[#allocation11 + $0x34] sm:$0xf0]  ;;  %v4815_v60 = vld [vmem:[#allocation11 + $0x12c] sm:$0xf]  ;;  %982 = vmatpush.bf16.msrb.mxu0 %v3643_v46 }
 0x1dc   :  { %5121 = vrsqrt.f32 %v5555_v3  ;;  %v454_v15 = vsub.f32 %v450_v4, %v452_v62  ;;  %v3548_v62 = vld [vmem:[#allocation11 + $0x98] sm:$0xf0]  ;;  %v4827_v4 = vld [vmem:[#allocation11 + $0x18c] sm:$0xf]  ;;  %vm476_vm8 = vweird.f32 %v5555_v3  ;;  %v3499_v0 = vor.u32 %v4785_v54, %v3498_v53 }
 0x1dd   :  { %993 = vmatpush.bf16.msra.mxu1 %v3567_v57  ;;  %1007 = vmatpush.bf16.msra.mxu2 %v3695_v58  ;;  %v3551_v12 = vor.u32 %v4795_v2, %v3548_v62  ;;  %v3679_v14 = vor.u32 %v4827_v4, %v3676_v5  ;;  %v4783_v57 = vld [vmem:[#allocation11 + $0x2c] sm:$0xf]  ;;  %v3500_v58 = vld [vmem:[#allocation11 + $0x38] sm:$0xf0]  ;;  %v3627_v2 = vor.u32 %v4817_v56, %v3626_v55  ;;  %v3482_v62 = vld [vmem:[#allocation11 + $0x8] sm:$0xf] }
 0x1de   :  { %v456_v26 = vmax.f32 %v454_v15, 0.0  ;;  %966 = vmatpush.bf16.msra.mxu3 %v3547_v8  ;;  %v4781_v4 = vld [vmem:[#allocation11 + $0x14] sm:$0xf0]  ;;  %v3610_v8 = vld [vmem:[#allocation11 + $0x108] sm:$0xf] }
 0x1df   :  { %983 = vmatpush.bf16.msrb.mxu0 %v3627_v2  ;;  %v3611_v21 = vor.u32 %v4813_v9, %v3610_v8 }
 0x1e0   :  { %v5559_v37 = vadd.f32 1e-05, %v456_v26  ;;  %v4791_v26 = vld [vmem:[#allocation11 + $0x6c] sm:$0xf] }
 0x1e1   :  { %994 = vmatpush.bf16.msra.mxu1 %v3551_v12  ;;  %1008 = vmatpush.bf16.msra.mxu2 %v3679_v14  ;;  %v3535_v30 = vor.u32 %v4791_v26, %v3532_v27  ;;  %v4779_v12 = vld [vmem:[#allocation11 + $0xc] sm:$0xf] }
 0x1e2   :  { %v5561_v45 = vpop.eup %5121  ;;  %5123 = vrsqrt.f32 %v5559_v37  ;;  %967 = vmatpush.bf16.msra.mxu3 %v3531_v20  ;;  %vm466_vm12 = vweird.f32 %v5559_v37  ;;  %v3483_v20 = vor.u32 %v4781_v4, %v3482_v62 }
 0x1e3   :  { %v471_v51 = vmul.f32 %v5561_v45, %v5555_v3  ;;  %vm477_vm7 = vweird.f32 %v5561_v45  ;;  %984 = vmatpush.bf16.msrb.mxu0 %v3611_v21  ;;  %v4902_v21 = vld [vmem:[#allocation15 + $0x1dc] sm:$0xf0] }
 0x1e4   :  { %vm5577_vm9 = vmor %vm476_vm8, %vm477_vm7 }
 0x1e5   :  { %v472_v61 = vmul.f32 %v5561_v45, %v471_v51  ;;  %995 = vmatpush.bf16.msra.mxu1 %v3535_v30  ;;  %1009 = vmatpush.bf16.msra.mxu2 %v3663_v36  ;;  %v3519_v51 = vor.u32 %v4787_v41, %v3516_v42 }
 0x1e6   :  { %968 = vmatpush.bf16.msra.mxu3 %v3515_v44 }
 0x1e7   :  { %v473_v6 = vmul.f32 0.5, %v472_v61  ;;  %v3628_v61 = vld [vmem:[#allocation11 + $0x138] sm:$0xf0] }
 0x1e8   :  { %v5567_v11 = vpop.eup %5123 }
 0x1e9   :  { %v474_v15 = vsub.f32 1.5, %v473_v6  ;;  %v461_v16 = vmul.f32 %v5567_v11, %v5559_v37  ;;  %vm467_vm10 = vweird.f32 %v5567_v11  ;;  %996 = vmatpush.bf16.msra.mxu1 %v3519_v51  ;;  %1010 = vmatpush.bf16.msra.mxu2 %v3647_v52  ;;  %v3503_v37 = vor.u32 %v4783_v57, %v3500_v58 }
 0x1ea   :  { %vm468_vm13 = vmor %vm466_vm12, %vm467_vm10  ;;  %v3631_v6 = vor.u32 %v4815_v60, %v3628_v61  ;;  %969 = vmatpush.bf16.msra.mxu3 %v3499_v0  ;;  %vm1263_vm12 = vcmask 1041408  }
 0x1eb   :  { %v475_v23 = vmul.f32 %v5561_v45, %v474_v15  ;;  %v462_v24 = vmul.f32 %v5567_v11, %v461_v16  ;;  %v3484_v15 = vld [vmem:[#allocation11 + $0x18] sm:$0xf0]  ;;  %v4811_v16 = vld [vmem:[#allocation11 + $0x10c] sm:$0xf] }
 0x1ec   :  { %v3487_v22 = vor.u32 %v4779_v12, %v3484_v15 }
 0x1ed   :  { %v463_v34 = vmul.f32 0.5, %v462_v24  ;;  %v479_v43 = vsel %vm5577_vm9, %v5561_v45, %v475_v23  ;;  %997 = vmatpush.bf16.msra.mxu1 %v3503_v37  ;;  %1011 = vmatpush.bf16.msra.mxu2 %v3631_v6  ;;  %v3615_v23 = vor.u32 %v4811_v16, %v3612_v17  ;;  %vm1261_vm9 = vcmask 1042434  }
 0x1ee   :  { %v482_v59 = vrot.slane %v479_v43, 7  ;;  %970 = vmatpush.bf16.msra.mxu3 %v3483_v20  ;;  %v3962_v20 = vld [vmem:[#allocation15 + $0x1c0] sm:$0xf] }
 0x1ef   :  { %v464_v3 = vsub.f32 1.5, %v463_v34 }
 0x1f1   :  { %v465_v45 = vmul.f32 %v5567_v11, %v464_v3  ;;  %998 = vmatpush.bf16.msra.mxu1 %v3487_v22  ;;  %1012 = vmatpush.bf16.msra.mxu2 %v3615_v23  ;;  %v4218_v22 = vld [vmem:[#allocation15 + $0x3c0] sm:$0xf]  ;;  %v3963_v23 = vor.u32 %v4902_v21, %v3962_v20 }
 0x1f2   :  { %v3834_v20 = vld [vmem:[#allocation15 + $0xc0] sm:$0xf] }
 0x1f3   :  { %v469_v63 = vsel %vm468_vm13, %v5567_v11, %v465_v45  ;;  %v4870_v21 = vld [vmem:[#allocation15 + $0xdc] sm:$0xf0] }
 0x1f4   :  { %v484_v5 = vsel %vm483_vm11, %v469_v63, %v482_v59 }
 0x1f5   :  { %v486_v14 = vmul.f32 %v484_v5, %v357_v49 }
 0x1f7   :  { %v488_v11 = vperm.slane %v486_v14, 0  ;;  %v489_v19 = vperm.slane %v486_v14, 1 }
 0x1f9   :  { %v493_v24 = vmul.f32 %v489_v19, %v5545_v35  ;;  %v492_v26 = vmul.f32 %v488_v11, %v5551_v50  ;;  %v500_v31 = vmul.f32 %v488_v11, %v5509_v1  ;;  %v502_v32 = vmul.f32 %v488_v11, %v5516_v10 }
 0x1fa   :  { %v501_v34 = vmul.f32 %v489_v19, %v5514_v7  ;;  %v503_v35 = vmul.f32 %v489_v19, %v5524_v18 }
 0x1fb   :  { %v496_v27 = vrot.slane %v493_v24, 7  ;;  %v4966_v24 = vld [vmem:[#allocation15 + $0x3dc] sm:$0xf0] }
 0x1fd   :  { %v497_v28 = vsel %vm483_vm11, %v492_v26, %v496_v27  ;;  %v5030_v26 = vld [vmem:[#allocation15 + $0x5dc] sm:$0xf0]  ;;  %v4219_v27 = vor.u32 %v4966_v24, %v4218_v22 }
 0x1fe   :  { %v499_v30 = vsub.f32 %v358_v25, %v497_v28  ;;  %v4474_v25 = vld [vmem:[#allocation15 + $0x5c0] sm:$0xf] }
 0x1ff   :  { %v4475_v28 = vor.u32 %v5030_v26, %v4474_v25  ;;  %v4090_v22 = vld [vmem:[#allocation15 + $0x2c0] sm:$0xf]  ;;  %v3835_v26 = vor.u32 %v4870_v21, %v3834_v20 }
 0x200   :  { %v505_v33 = vperm.slane %v499_v30, 0  ;;  %v506_v36 = vperm.slane %v499_v30, 1  ;;  %v4730_v30 = vld [vmem:[#allocation15 + $0x7c0] sm:$0xf] }
 0x201   :  { %v4250_v20 = vld [vmem:[#allocation15 + $0x400] sm:$0xf] }
 0x202   :  { %v509_v38 = vadd.f32 %v505_v33, %v500_v31  ;;  %v511_v50 = vadd.f32 %v505_v33, %v502_v32  ;;  %v510_v39 = vadd.f32 %v506_v36, %v501_v34  ;;  %v512_v40 = vadd.f32 %v506_v36, %v503_v35  ;;  %v5094_v31 = vld [vmem:[#allocation15 + $0x7dc] sm:$0xf0] }
 0x203   :  { %v4731_v32 = vor.u32 %v5094_v31, %v4730_v30  ;;  %v3930_v33 = vld [vmem:[#allocation15 + $0x180] sm:$0xf] }
 0x204   :  { %v513_v41 = vmul.f32 0.01, %v509_v38  ;;  %v515_v42 = vmul.f32 0.01, %v511_v50  ;;  %v514_v43 = vmul.f32 0.01, %v510_v39 }
 0x205   :  { %v516_v3 = vmul.f32 0.01, %v512_v40  ;;  %v4894_v34 = vld [vmem:[#allocation15 + $0x19c] sm:$0xf0] }
 0x206   :  { %v517_v44 = vmax.f32 %v509_v38, %v513_v41  ;;  %v519_v46 = vmax.f32 %v511_v50, %v515_v42  ;;  %v518_v47 = vmax.f32 %v510_v39, %v514_v43  ;;  %v4186_v35 = vld [vmem:[#allocation15 + $0x380] sm:$0xf] }
 0x207   :  { %v520_v1 = vmax.f32 %v512_v40, %v516_v3  ;;  %v4958_v36 = vld [vmem:[#allocation15 + $0x39c] sm:$0xf0] }
 0x208   :  { %v521_v48 = vpack.c.bf16 %v519_v46, %v517_v44  ;;  %v4442_v38 = vld [vmem:[#allocation15 + $0x580] sm:$0xf]  ;;  %v4187_v39 = vor.u32 %v4958_v36, %v4186_v35 }
 0x209   :  { %v522_v10 = vpack.c.bf16 %v520_v1, %v518_v47  ;;  %v5022_v50 = vld [vmem:[#allocation15 + $0x59c] sm:$0xf0] }
 0x20a   :  { %915 = vmatmul.bf16.vlgmr.msrb.gmra.mxu3 %v521_v48  ;;  %943 = vmatmul.bf16.vlgmr.msrb.gmra.mxu1 %v521_v48  ;;  %v4443_v40 = vor.u32 %v5022_v50, %v4442_v38  ;;  %v4698_v41 = vld [vmem:[#allocation15 + $0x780] sm:$0xf] }
 0x20b   :  { %929 = vmatmul.bf16.vlgmr.msra.gmra.mxu0 %v522_v10  ;;  %957 = vmatmul.bf16.vlgmr.msrb.gmra.mxu2 %v522_v10  ;;  %v5086_v42 = vld [vmem:[#allocation15 + $0x79c] sm:$0xf0] }
 0x20c   :  { %v4699_v43 = vor.u32 %v5086_v42, %v4698_v41  ;;  %v3898_v3 = vld [vmem:[#allocation15 + $0x140] sm:$0xf] }
 0x20d   :  { %v4886_v44 = vld [vmem:[#allocation15 + $0x15c] sm:$0xf0] }
 0x20e   :  { %v4154_v46 = vld [vmem:[#allocation15 + $0x340] sm:$0xf]  ;;  %v3899_v1 = vor.u32 %v4886_v44, %v3898_v3 }
 0x20f   :  { %v4998_v30 = vld [vmem:[#allocation15 + $0x4dc] sm:$0xf0] }
 0x210   :  { %v3802_v38 = vld [vmem:[#allocation15 + $0x80] sm:$0xf] }
 0x211   :  { %v4862_v50 = vld [vmem:[#allocation15 + $0x9c] sm:$0xf0] }
 0x212   :  { %v3803_v41 = vor.u32 %v4862_v50, %v3802_v38  ;;  %v4926_v42 = vld [vmem:[#allocation15 + $0x29c] sm:$0xf0]  ;;  %v5090_v50 = vld [vmem:[#allocation15 + $0x7c4] sm:$0xf] }
 0x213   :  { %v4990_v44 = vld [vmem:[#allocation15 + $0x49c] sm:$0xf0] }
 0x214   :  { %v4974_v21 = vld [vmem:[#allocation15 + $0x41c] sm:$0xf0] }
 0x21a   :  { %971 = vmatmul.bf16.vlgmr.msra.gmra.mxu3 %v521_v48  ;;  %999 = vmatmul.bf16.vlgmr.msra.gmra.mxu1 %v521_v48  ;;  %v4950_v48 = vld [vmem:[#allocation15 + $0x35c] sm:$0xf0] }
 0x21b   :  { %985 = vmatmul.bf16.vlgmr.msrb.gmra.mxu0 %v522_v10  ;;  %1013 = vmatmul.bf16.vlgmr.msra.gmra.mxu2 %v522_v10  ;;  %v4410_v10 = vld [vmem:[#allocation15 + $0x540] sm:$0xf] }
 0x287   :  { %v944_v18 = vpop.f32.mrf.mxu1 }
 0x288   :  { %v930_v7 = vpop.f32.mrf.mxu0 }
 0x28d   :  { %v916_v49 = vpop.f32.mrf.mxu3 }
 0x28e   :  { %v958_v51 = vpop.f32.mrf.mxu2  ;;  %v5603_v56 = vadd.f32 %v930_v7, %v916_v49  ;;  %v5014_v7 = vld [vmem:[#allocation15 + $0x55c] sm:$0xf0] }
 0x28f   :  { %v946_v53 = vpop.f32.mrf.mxu1  ;;  %v5605_v57 = vadd.f32 %v958_v51, %v944_v18  ;;  %v4155_v18 = vor.u32 %v4950_v48, %v4154_v46  ;;  %v4411_v49 = vor.u32 %v5014_v7, %v4410_v10  ;;  %v4666_v51 = vld [vmem:[#allocation15 + $0x740] sm:$0xf] }
 0x290   :  { %v932_v52 = vpop.f32.mrf.mxu0  ;;  %v1101_v63 = vmul.f32 %v5603_v56, %v5603_v56  ;;  %v4570_v46 = vld [vmem:[#allocation15 + $0x680] sm:$0xf] }
 0x291   :  { %v1102_v0 = vmul.f32 %v5605_v57, %v5605_v57 }
 0x295   :  { %v918_v54 = vpop.f32.mrf.mxu3 }
 0x296   :  { %v5601_v55 = vadd.f32 %v932_v52, %v918_v54  ;;  %v960_v45 = vpop.f32.mrf.mxu2  ;;  %v5078_v52 = vld [vmem:[#allocation15 + $0x75c] sm:$0xf0] }
 0x297   :  { %v5607_v58 = vadd.f32 %v960_v45, %v946_v53  ;;  %v1000_v2 = vpop.f32.mrf.mxu1  ;;  %v4667_v53 = vor.u32 %v5078_v52, %v4666_v51  ;;  %v3866_v45 = vld [vmem:[#allocation15 + $0x100] sm:$0xf] }
 0x298   :  { %v1105_v59 = vmul.f32 %v5601_v55, %v5601_v55  ;;  %1035 = vmatpush.msrb.mxu3 %v5601_v55  ;;  %v986_v61 = vpop.f32.mrf.mxu0  ;;  %v4854_v51 = vld [vmem:[#allocation15 + $0x5c] sm:$0xf0] }
 0x299   :  { %v1106_v60 = vmul.f32 %v5607_v58, %v5607_v58  ;;  %1055 = vmatpush.msra.mxu0 %v5607_v58  ;;  %v4026_v52 = vld [vmem:[#allocation15 + $0x240] sm:$0xf] }
 0x29a   :  { %1036 = vmatpush.msrb.mxu3 %v5603_v56  ;;  %1123 = vmatpush.msrb.mxu1 %v1105_v59  ;;  %v4878_v59 = vld [vmem:[#allocation15 + $0x11c] sm:$0xf0] }
 0x29b   :  { %1056 = vmatpush.msra.mxu0 %v5605_v57  ;;  %1143 = vmatpush.msrb.mxu2 %v1106_v60  ;;  %v4122_v60 = vld [vmem:[#allocation15 + $0x300] sm:$0xf] }
 0x29c   :  { %3728 = vmatmul.msk.f32.vlgmr.msrb.gmra.mxu3 %vm359_vm4, %v5519_v13  ;;  %3729 = vmatmul.msk.f32.vlgmr.msra.gmra.mxu0 %vm359_vm4, %v5519_v13 }
 0x29d   :  { %1124 = vmatpush.msrb.mxu1 %v1101_v63  ;;  %1144 = vmatpush.msrb.mxu2 %v1102_v0  ;;  %v972_v62 = vpop.f32.mrf.mxu3  ;;  %v4942_v63 = vld [vmem:[#allocation15 + $0x31c] sm:$0xf0] }
 0x29e   :  { %v1014_v4 = vpop.f32.mrf.mxu2  ;;  %3732 = vmatmul.msk.f32.vlgmr.msrb.gmra.mxu1 %vm359_vm4, %v5519_v13  ;;  %3733 = vmatmul.msk.f32.vlgmr.msrb.gmra.mxu2 %vm359_vm4, %v5519_v13  ;;  %v5633_v14 = vadd.f32 %v986_v61, %v972_v62  ;;  %v3867_v61 = vor.u32 %v4878_v59, %v3866_v45  ;;  %v4378_v0 = vld [vmem:[#allocation15 + $0x500] sm:$0xf] }
 0x29f   :  { %v1002_v6 = vpop.f32.mrf.mxu1  ;;  %v5638_v16 = vadd.f32 %v1014_v4, %v1000_v2  ;;  %2891 = vmatpush.bf16.msra.mxu1 %v3963_v23  ;;  %2905 = vmatpush.bf16.msra.mxu2 %v4219_v27  ;;  %v5006_v2 = vld [vmem:[#allocation15 + $0x51c] sm:$0xf0] }
 0x2a0   :  { %v988_v5 = vpop.f32.mrf.mxu0  ;;  %v1103_v11 = vmul.f32 %v5633_v14, %v5633_v14  ;;  %v4934_v27 = vld [vmem:[#allocation15 + $0x2dc] sm:$0xf0] }
 0x2a1   :  { %v1104_v19 = vmul.f32 %v5638_v16, %v5638_v16  ;;  %v4091_v31 = vor.u32 %v4934_v27, %v4090_v22  ;;  %v4282_v45 = vld [vmem:[#allocation15 + $0x440] sm:$0xf] }
 0x2a2   :  { %v4982_v59 = vld [vmem:[#allocation15 + $0x45c] sm:$0xf0] }
 0x2a3   :  { %2906 = vmatpush.bf16.msra.mxu2 %v4187_v39  ;;  %v4058_v39 = vld [vmem:[#allocation15 + $0x280] sm:$0xf] }
 0x2a4   :  { %v4059_v3 = vor.u32 %v4926_v42, %v4058_v39  ;;  %v4732_v39 = vld [vmem:[#allocation15 + $0x7e0] sm:$0xf0] }
 0x2a5   :  { %v974_v37 = vpop.f32.mrf.mxu3 }
 0x2a6   :  { %v5629_v8 = vadd.f32 %v988_v5, %v974_v37  ;;  %v1016_v9 = vpop.f32.mrf.mxu2  ;;  %v4123_v5 = vor.u32 %v4942_v63, %v4122_v60  ;;  %v4379_v37 = vor.u32 %v5006_v2, %v4378_v0  ;;  %v4283_v63 = vor.u32 %v4982_v59, %v4282_v45  ;;  %v4538_v0 = vld [vmem:[#allocation15 + $0x640] sm:$0xf] }
 0x2a7   :  { %v5631_v12 = vadd.f32 %v1016_v9, %v1002_v6  ;;  %2907 = vmatpush.bf16.msra.mxu2 %v4155_v18  ;;  %v4634_v6 = vld [vmem:[#allocation15 + $0x700] sm:$0xf] }
 0x2a8   :  { %v1107_v15 = vmul.f32 %v5629_v8, %v5629_v8  ;;  %1075 = vmatpush.msra.mxu3 %v5629_v8  ;;  %v5070_v9 = vld [vmem:[#allocation15 + $0x71c] sm:$0xf0] }
 0x2a9   :  { %v1108_v17 = vmul.f32 %v5631_v12, %v5631_v12  ;;  %1095 = vmatpush.msrb.mxu0 %v5631_v12  ;;  %v5046_v2 = vld [vmem:[#allocation15 + $0x65c] sm:$0xf0] }
 0x2aa   :  { %1076 = vmatpush.msra.mxu3 %v5633_v14 }
 0x2ab   :  { %1096 = vmatpush.msrb.mxu0 %v5638_v16  ;;  %3730 = vmatmul.msk.f32.vlgmr.msra.gmra.mxu3 %vm359_vm4, %v5519_v13 }
 0x2ac   :  { %3731 = vmatmul.msk.f32.vlgmr.msrb.gmra.mxu0 %vm359_vm4, %v5519_v13  ;;  %1163 = vmatpush.msrb.mxu3 %v1107_v15 }
 0x2ad   :  { %1183 = vmatpush.msra.mxu0 %v1108_v17  ;;  %v4635_v17 = vor.u32 %v5070_v9, %v4634_v6  ;;  %2908 = vmatpush.bf16.msra.mxu2 %v4123_v5  ;;  %v3738_v5 = vld [vmem:[#allocation15] sm:$0xf] }
 0x2ae   :  { %1164 = vmatpush.msrb.mxu3 %v1103_v11  ;;  %v3994_v6 = vld [vmem:[#allocation15 + $0x200] sm:$0xf] }
 0x2af   :  { %1184 = vmatpush.msra.mxu0 %v1104_v19 }
 0x2b0   :  { %2919 = vmatpush.bf16.msra.mxu3 %v4475_v28  ;;  %v4346_v28 = vld [vmem:[#allocation15 + $0x4c0] sm:$0xf] }
 0x2b1   :  { %2933 = vmatpush.bf16.msrb.mxu0 %v4731_v32  ;;  %v4347_v32 = vor.u32 %v4998_v30, %v4346_v28  ;;  %2909 = vmatpush.bf16.msra.mxu2 %v4091_v31  ;;  %v3964_v28 = vld [vmem:[#allocation15 + $0x1e0] sm:$0xf0] }
 0x2b2   :  { %v4962_v30 = vld [vmem:[#allocation15 + $0x3c4] sm:$0xf] }
 0x2b3   :  { %3734 = vmatmul.msk.f32.vlgmr.msrb.gmra.mxu3 %vm359_vm4, %v5519_v13  ;;  %v4220_v31 = vld [vmem:[#allocation15 + $0x3e0] sm:$0xf0] }
 0x2b4   :  { %3735 = vmatmul.msk.f32.vlgmr.msra.gmra.mxu0 %vm359_vm4, %v5519_v13  ;;  %v3931_v13 = vor.u32 %v4894_v34, %v3930_v33  ;;  %2920 = vmatpush.bf16.msra.mxu3 %v4443_v40  ;;  %v4602_v33 = vld [vmem:[#allocation15 + $0x6c0] sm:$0xf] }
 0x2b5   :  { %2934 = vmatpush.bf16.msrb.mxu0 %v4699_v43  ;;  %v5062_v34 = vld [vmem:[#allocation15 + $0x6dc] sm:$0xf0]  ;;  %2910 = vmatpush.bf16.msra.mxu2 %v4059_v3  ;;  %v3932_v3 = vld [vmem:[#allocation15 + $0x1a0] sm:$0xf0] }
 0x2b6   :  { %2892 = vmatpush.bf16.msra.mxu1 %v3931_v13  ;;  %v4603_v36 = vor.u32 %v5062_v34, %v4602_v33  ;;  %v4314_v43 = vld [vmem:[#allocation15 + $0x480] sm:$0xf]  ;;  %v5026_v33 = vld [vmem:[#allocation15 + $0x5c4] sm:$0xf] }
 0x2b7   :  { %v4315_v10 = vor.u32 %v4990_v44, %v4314_v43  ;;  %v4476_v34 = vld [vmem:[#allocation15 + $0x5e0] sm:$0xf0] }
 0x2b8   :  { %2921 = vmatpush.bf16.msra.mxu3 %v4411_v49  ;;  %v3770_v49 = vld [vmem:[#allocation15 + $0x40] sm:$0xf]  ;;  %v4479_v42 = vor.u32 %v5026_v33, %v4476_v34  ;;  %v4890_v43 = vld [vmem:[#allocation15 + $0x184] sm:$0xf] }
 0x2b9   :  { %2935 = vmatpush.bf16.msrb.mxu0 %v4667_v53  ;;  %v4918_v53 = vld [vmem:[#allocation15 + $0x25c] sm:$0xf0]  ;;  %v3771_v60 = vor.u32 %v4854_v51, %v3770_v49  ;;  %v4444_v51 = vld [vmem:[#allocation15 + $0x5a0] sm:$0xf0] }
 0x2ba   :  { %2893 = vmatpush.bf16.msra.mxu1 %v3899_v1  ;;  %v4124_v33 = vld [vmem:[#allocation15 + $0x320] sm:$0xf0] }
 0x2bc   :  { %2922 = vmatpush.bf16.msra.mxu3 %v4379_v37  ;;  %v4846_v37 = vld [vmem:[#allocation15 + $0x1c] sm:$0xf0] }
 0x2bd   :  { %2936 = vmatpush.bf16.msrb.mxu0 %v4635_v17 }
 0x2be   :  { %2894 = vmatpush.bf16.msra.mxu1 %v3867_v61  ;;  %v4027_v61 = vor.u32 %v4918_v53, %v4026_v52  ;;  %v5082_v52 = vld [vmem:[#allocation15 + $0x784] sm:$0xf] }
 0x2c0   :  { %2923 = vmatpush.bf16.msra.mxu3 %v4347_v32  ;;  %2911 = vmatpush.bf16.msra.mxu2 %v4027_v61  ;;  %v4882_v61 = vld [vmem:[#allocation15 + $0x144] sm:$0xf] }
 0x2c1   :  { %2937 = vmatpush.bf16.msrb.mxu0 %v4603_v36 }
 0x2c2   :  { %2895 = vmatpush.bf16.msra.mxu1 %v3835_v26  ;;  %v4898_v26 = vld [vmem:[#allocation15 + $0x1c4] sm:$0xf] }
 0x2c3   :  { %v3967_v38 = vor.u32 %v4898_v26, %v3964_v28  ;;  %v4668_v26 = vld [vmem:[#allocation15 + $0x760] sm:$0xf0] }
 0x2c4   :  { %2924 = vmatpush.bf16.msra.mxu3 %v4315_v10  ;;  %v4188_v10 = vld [vmem:[#allocation15 + $0x3a0] sm:$0xf0] }
 0x2c5   :  { %v3868_v28 = vld [vmem:[#allocation15 + $0x120] sm:$0xf0] }
 0x2c6   :  { %2896 = vmatpush.bf16.msra.mxu1 %v3803_v41  ;;  %v4223_v41 = vor.u32 %v4962_v30, %v4220_v31 }
 0x2c8   :  { %2925 = vmatpush.bf16.msra.mxu3 %v4283_v63 }
 0x2ca   :  { %2897 = vmatpush.bf16.msra.mxu1 %v3771_v60  ;;  %v4700_v60 = vld [vmem:[#allocation15 + $0x7a0] sm:$0xf0] }
 0x319   :  { %v1058_v47 = vpop.f32.mrf.mxu0 }
 0x31a   :  { %v5658_v54 = vmul.f32 %v1058_v47, %v5542_v29  ;;  %v5054_v47 = vld [vmem:[#allocation15 + $0x69c] sm:$0xf0] }
 0x31b   :  { %v1126_v62 = vpop.f32.mrf.mxu1  ;;  %v4571_v7 = vor.u32 %v5054_v47, %v4570_v46  ;;  %v4735_v46 = vor.u32 %v5090_v50, %v4732_v39  ;;  %v3935_v47 = vor.u32 %v4890_v43, %v3932_v3  ;;  %v4636_v43 = vld [vmem:[#allocation15 + $0x720] sm:$0xf0] }
 0x31c   :  { %v1198_v11 = vmul.f32 %v5658_v54, %v5658_v54  ;;  %v1193_v23 = vmul.f32 %v1126_v62, %v5542_v29 }
 0x31d   :  { %2938 = vmatpush.bf16.msrb.mxu0 %v4571_v7  ;;  %v5018_v7 = vld [vmem:[#allocation15 + $0x584] sm:$0xf] }
 0x31e   :  { %v4447_v59 = vor.u32 %v5018_v7, %v4444_v51  ;;  %v4994_v7 = vld [vmem:[#allocation15 + $0x4c4] sm:$0xf] }
 0x31f   :  { %v1038_v4 = vpop.f32.mrf.mxu3 }
 0x320   :  { %v5661_v15 = vmul.f32 %v1038_v4, %v5542_v29  ;;  %v4539_v4 = vor.u32 %v5046_v2, %v4538_v0 }
 0x321   :  { %v1146_v19 = vpop.f32.mrf.mxu2 }
 0x322   :  { %v1197_v24 = vmul.f32 %v5661_v15, %v5661_v15  ;;  %v1194_v25 = vmul.f32 %v1146_v19, %v5542_v29  ;;  %2939 = vmatpush.bf16.msrb.mxu0 %v4539_v4  ;;  %v4910_v19 = vld [vmem:[#allocation15 + $0x21c] sm:$0xf0]  ;;  %v4703_v4 = vor.u32 %v5082_v52, %v4700_v60  ;;  %v5058_v52 = vld [vmem:[#allocation15 + $0x6c4] sm:$0xf] }
 0x323   :  { %v3995_v22 = vor.u32 %v4910_v19, %v3994_v6 }
 0x324   :  { %v1201_v35 = vsub.f32 %v1193_v23, %v1197_v24  ;;  %v1202_v13 = vsub.f32 %v1194_v25, %v1198_v11  ;;  %v3739_v11 = vor.u32 %v4846_v37, %v3738_v5  ;;  %v4251_v23 = vor.u32 %v4974_v21, %v4250_v20  ;;  %v4506_v24 = vld [vmem:[#allocation15 + $0x600] sm:$0xf]  ;;  %v3900_v5 = vld [vmem:[#allocation15 + $0x160] sm:$0xf0] }
 0x325   :  { %v5038_v25 = vld [vmem:[#allocation15 + $0x61c] sm:$0xf0]  ;;  %2912 = vmatpush.bf16.msra.mxu2 %v3995_v22  ;;  %v4946_v37 = vld [vmem:[#allocation15 + $0x344] sm:$0xf] }
 0x326   :  { %v1206_v40 = vmax.f32 %v1202_v13, 0.0  ;;  %v1205_v1 = vmax.f32 %v1201_v35, 0.0  ;;  %v4507_v27 = vor.u32 %v5038_v25, %v4506_v24  ;;  %2898 = vmatpush.bf16.msra.mxu1 %v3739_v11  ;;  %2926 = vmatpush.bf16.msra.mxu3 %v4251_v23  ;;  %v4156_v11 = vld [vmem:[#allocation15 + $0x360] sm:$0xf0] }
 0x327   :  { %v4159_v21 = vor.u32 %v4946_v37, %v4156_v11  ;;  %v5010_v22 = vld [vmem:[#allocation15 + $0x544] sm:$0xf] }
 0x328   :  { %v5669_v48 = vadd.f32 1e-05, %v1206_v40  ;;  %v5671_v62 = vadd.f32 1e-05, %v1205_v1  ;;  %2940 = vmatpush.bf16.msrb.mxu0 %v4507_v27  ;;  %v4954_v1 = vld [vmem:[#allocation15 + $0x384] sm:$0xf] }
 0x329   :  { %v1098_v18 = vpop.f32.mrf.mxu0  ;;  %2961 = vmatpush.bf16.msrb.mxu2 %v4223_v41  ;;  %v4191_v49 = vor.u32 %v4954_v1, %v4188_v10  ;;  %v4412_v23 = vld [vmem:[#allocation15 + $0x560] sm:$0xf0] }
 0x32a   :  { %5125 = vrsqrt.f32 %v5669_v48  ;;  %v5675_v9 = vmul.f32 %v1098_v18, %v5542_v29  ;;  %2947 = vmatpush.bf16.msrb.mxu1 %v3967_v38  ;;  %2975 = vmatpush.bf16.msrb.mxu3 %v4479_v42  ;;  %v5074_v24 = vld [vmem:[#allocation15 + $0x744] sm:$0xf]  ;;  %v4415_v25 = vor.u32 %v5010_v22, %v4412_v23  ;;  %vm1229_vm15 = vweird.f32 %v5669_v48 }
 0x32b   :  { %5127 = vrsqrt.f32 %v5671_v62  ;;  %v4874_v27 = vld [vmem:[#allocation15 + $0x104] sm:$0xf]  ;;  %v4671_v31 = vor.u32 %v5074_v24, %v4668_v26  ;;  %vm1219_vm8 = vweird.f32 %v5671_v62 }
 0x32c   :  { %v1200_v13 = vmul.f32 %v5675_v9, %v5675_v9  ;;  %2989 = vmatpush.bf16.msra.mxu0 %v4735_v46  ;;  %v3871_v34 = vor.u32 %v4874_v27, %v3868_v28  ;;  %v5066_v38 = vld [vmem:[#allocation15 + $0x704] sm:$0xf] }
 0x32d   :  { %2962 = vmatpush.bf16.msrb.mxu2 %v4191_v49  ;;  %v4866_v46 = vld [vmem:[#allocation15 + $0xc4] sm:$0xf] }
 0x32e   :  { %v1078_v17 = vpop.f32.mrf.mxu3  ;;  %2948 = vmatpush.bf16.msrb.mxu1 %v3935_v47  ;;  %2976 = vmatpush.bf16.msrb.mxu3 %v4447_v59  ;;  %v3836_v47 = vld [vmem:[#allocation15 + $0xe0] sm:$0xf0] }
 0x32f   :  { %v5684_v40 = vmul.f32 %v1078_v17, %v5542_v29  ;;  %v3903_v17 = vor.u32 %v4882_v61, %v3900_v5  ;;  %v4930_v1 = vld [vmem:[#allocation15 + $0x2c4] sm:$0xf]  ;;  %v3839_v51 = vor.u32 %v4866_v46, %v3836_v47 }
 0x330   :  { %v5678_v35 = vpop.eup %5125  ;;  %2990 = vmatpush.bf16.msra.mxu0 %v4703_v4  ;;  %v4092_v10 = vld [vmem:[#allocation15 + $0x2e0] sm:$0xf0] }
 0x331   :  { %v1186_v32 = vpop.f32.mrf.mxu0  ;;  %v1224_v18 = vmul.f32 %v5678_v35, %v5669_v48  ;;  %v5688_v63 = vpop.eup %5127  ;;  %v1199_v0 = vmul.f32 %v5684_v40, %v5684_v40  ;;  %2963 = vmatpush.bf16.msrb.mxu2 %v4159_v21  ;;  %v4095_v59 = vor.u32 %v4930_v1, %v4092_v10  ;;  %v4858_v4 = vld [vmem:[#allocation15 + $0x84] sm:$0xf]  ;;  %vm1230_vm14 = vweird.f32 %v5678_v35 }
 0x332   :  { %v1196_v36 = vmul.f32 %v1186_v32, %v5542_v29  ;;  %v4938_v32 = vld [vmem:[#allocation15 + $0x304] sm:$0xf]  ;;  %2949 = vmatpush.bf16.msrb.mxu1 %v3903_v17  ;;  %2977 = vmatpush.bf16.msrb.mxu3 %v4415_v25  ;;  %vm5725_vm1 = vmor %vm1229_vm15, %vm1230_vm14  ;;  %vm1220_vm4 = vweird.f32 %v5688_v63 }
 0x333   :  { %v1225_v19 = vmul.f32 %v5678_v35, %v1224_v18  ;;  %v4127_v41 = vor.u32 %v4938_v32, %v4124_v33  ;;  %v4348_v18 = vld [vmem:[#allocation15 + $0x4e0] sm:$0xf0]  ;;  %vm1221_vm10 = vmor %vm1219_vm8, %vm1220_vm4 }
 0x334   :  { %v1204_v44 = vsub.f32 %v1196_v36, %v1200_v13  ;;  %v5002_v13 = vld [vmem:[#allocation15 + $0x504] sm:$0xf]  ;;  %2991 = vmatpush.bf16.msra.mxu0 %v4671_v31  ;;  %v4351_v60 = vor.u32 %v4994_v7, %v4348_v18 }
 0x335   :  { %v4380_v36 = vld [vmem:[#allocation15 + $0x520] sm:$0xf0]  ;;  %v1226_v50 = vmul.f32 0.5, %v1225_v19  ;;  %2964 = vmatpush.bf16.msrb.mxu2 %v4127_v41 }
 0x336   :  { %v1208_v53 = vmax.f32 %v1204_v44, 0.0  ;;  %v1166_v45 = vpop.f32.mrf.mxu3  ;;  %v4383_v42 = vor.u32 %v5002_v13, %v4380_v36  ;;  %v4639_v44 = vor.u32 %v5066_v38, %v4636_v43  ;;  %2950 = vmatpush.bf16.msrb.mxu1 %v3871_v34  ;;  %v3804_v5 = vld [vmem:[#allocation15 + $0xa0] sm:$0xf0] }
 0x337   :  { %v1195_v2 = vmul.f32 %v1166_v45, %v5542_v29  ;;  %v1214_v29 = vmul.f32 %v5688_v63, %v5671_v62  ;;  %v4922_v17 = vld [vmem:[#allocation15 + $0x284] sm:$0xf] }
 0x338   :  { %v5693_v6 = vadd.f32 1e-05, %v1208_v53  ;;  %v4604_v53 = vld [vmem:[#allocation15 + $0x6e0] sm:$0xf0]  ;;  %2978 = vmatpush.bf16.msrb.mxu3 %v4383_v42  ;;  %2992 = vmatpush.bf16.msra.mxu0 %v4639_v44 }
 0x339   :  { %v1203_v20 = vsub.f32 %v1195_v2, %v1199_v0  ;;  %v1215_v3 = vmul.f32 %v5688_v63, %v1214_v29  ;;  %v1227_v0 = vsub.f32 1.5, %v1226_v50  ;;  %v4607_v2 = vor.u32 %v5058_v52, %v4604_v53  ;;  %v4060_v11 = vld [vmem:[#allocation15 + $0x2a0] sm:$0xf0]  ;;  %2965 = vmatpush.bf16.msrb.mxu2 %v4095_v59  ;;  %v4903_v59 = vld [vmem:[#allocation15 + $0x1e4] sm:$0xf0] }
 0x33a   :  { %5129 = vrsqrt.f32 %v5693_v6  ;;  %v4986_v19 = vld [vmem:[#allocation15 + $0x484] sm:$0xf]  ;;  %2951 = vmatpush.bf16.msrb.mxu1 %v3839_v51  ;;  %v4063_v25 = vor.u32 %v4922_v17, %v4060_v11  ;;  %vm1249_vm2 = vweird.f32 %v5693_v6 }
 0x33b   :  { %v1207_v30 = vmax.f32 %v1203_v20, 0.0  ;;  %v5707_v61 = vmul.f32 0.5, %v1215_v3  ;;  %v3807_v20 = vor.u32 %v4858_v4, %v3804_v5  ;;  %v4316_v21 = vld [vmem:[#allocation15 + $0x4a0] sm:$0xf0]  ;;  %v1228_v41 = vmul.f32 %v5678_v35, %v1227_v0 }
 0x33c   :  { %v5050_v22 = vld [vmem:[#allocation15 + $0x684] sm:$0xf]  ;;  %2979 = vmatpush.bf16.msrb.mxu3 %v4351_v60  ;;  %v4319_v26 = vor.u32 %v4986_v19, %v4316_v21  ;;  %2993 = vmatpush.bf16.msra.mxu0 %v4607_v2 }
 0x33d   :  { %v5699_v39 = vadd.f32 1e-05, %v1207_v30  ;;  %v4572_v23 = vld [vmem:[#allocation15 + $0x6a0] sm:$0xf0]  ;;  %v1217_v50 = vsub.f32 1.5, %v5707_v61  ;;  %2966 = vmatpush.bf16.msrb.mxu2 %v4063_v25  ;;  %v1232_v0 = vsel %vm5725_vm1, %v5678_v35, %v1228_v41 }
 0x33e   :  { %v4850_v27 = vld [vmem:[#allocation15 + $0x44] sm:$0xf]  ;;  %v4575_v31 = vor.u32 %v5050_v22, %v4572_v23  ;;  %2952 = vmatpush.bf16.msrb.mxu1 %v3807_v20  ;;  %v1257_v19 = vrot.slane %v1232_v0, 7  ;;  %v1019_v22 = vld [vmem:[#allocation12] sm:$0xf] }
 0x33f   :  { %5131 = vrsqrt.f32 %v5699_v39  ;;  %v3772_v28 = vld [vmem:[#allocation15 + $0x60] sm:$0xf0]  ;;  %v1218_v5 = vmul.f32 %v5688_v63, %v1217_v50  ;;  %vm1239_vm6 = vweird.f32 %v5699_v39 }
 0x340   :  { %v5703_v49 = vpop.eup %5129  ;;  %v4914_v32 = vld [vmem:[#allocation15 + $0x244] sm:$0xf]  ;;  %v3775_v43 = vor.u32 %v4850_v27, %v3772_v28  ;;  %2980 = vmatpush.bf16.msrb.mxu3 %v4319_v26  ;;  %2994 = vmatpush.bf16.msra.mxu0 %v4575_v31 }
 0x341   :  { %v1244_v45 = vmul.f32 %v5703_v49, %v5693_v6  ;;  %v4028_v33 = vld [vmem:[#allocation15 + $0x260] sm:$0xf0]  ;;  %vm1250_vm0 = vweird.f32 %v5703_v49 }
 0x342   :  { %v4978_v34 = vld [vmem:[#allocation15 + $0x444] sm:$0xf]  ;;  %v4031_v46 = vor.u32 %v4914_v32, %v4028_v33  ;;  %2953 = vmatpush.bf16.msrb.mxu1 %v3775_v43  ;;  %vm5738_vm5 = vmor %vm1249_vm2, %vm1250_vm0 }
 0x343   :  { %v1245_v37 = vmul.f32 %v5703_v49, %v1244_v45  ;;  %v4284_v36 = vld [vmem:[#allocation15 + $0x460] sm:$0xf0] }
 0x344   :  { %v5042_v38 = vld [vmem:[#allocation15 + $0x644] sm:$0xf]  ;;  %v4287_v47 = vor.u32 %v4978_v34, %v4284_v36  ;;  %2967 = vmatpush.bf16.msrb.mxu2 %v4031_v46  ;;  %v1020_v36 = vld [vmem:[#allocation14] sm:$0xf] }
 0x345   :  { %v5710_v24 = vpop.eup %5131  ;;  %v1246_v29 = vmul.f32 0.5, %v1245_v37  ;;  %v4540_v3 = vld [vmem:[#allocation15 + $0x660] sm:$0xf0] }
 0x346   :  { %v1234_v30 = vmul.f32 %v5710_v24, %v5699_v39  ;;  %v4842_v44 = vld [vmem:[#allocation15 + $0x4] sm:$0xf]  ;;  %v4543_v52 = vor.u32 %v5042_v38, %v4540_v3  ;;  %vm1240_vm3 = vweird.f32 %v5710_v24  ;;  %2981 = vmatpush.bf16.msrb.mxu3 %v4287_v47  ;;  %v1222_v39 = vsel %vm1221_vm10, %v5688_v63, %v1218_v5 }
 0x347   :  { %v1247_v13 = vsub.f32 1.5, %v1246_v29  ;;  %v3740_v1 = vld [vmem:[#allocation15 + $0x20] sm:$0xf0]  ;;  %vm1241_vm7 = vmor %vm1239_vm6, %vm1240_vm3  ;;  %v1260_v23 = vsel %vm483_vm11, %v1222_v39, %v1257_v19 }
 0x348   :  { %v1235_v42 = vmul.f32 %v5710_v24, %v1234_v30  ;;  %v4906_v10 = vld [vmem:[#allocation15 + $0x204] sm:$0xf]  ;;  %v3743_v4 = vor.u32 %v4842_v44, %v3740_v1  ;;  %2995 = vmatpush.bf16.msra.mxu0 %v4543_v52 }
 0x349   :  { %v3996_v7 = vld [vmem:[#allocation15 + $0x220] sm:$0xf0]  ;;  %v1248_v18 = vmul.f32 %v5703_v49, %v1247_v13 }
 0x34a   :  { %v1236_v51 = vmul.f32 0.5, %v1235_v42  ;;  %v4970_v53 = vld [vmem:[#allocation15 + $0x404] sm:$0xf]  ;;  %v3999_v6 = vor.u32 %v4906_v10, %v3996_v7  ;;  %2954 = vmatpush.bf16.msrb.mxu1 %v3743_v4 }
 0x34b   :  { %v4252_v45 = vld [vmem:[#allocation15 + $0x420] sm:$0xf0]  ;;  %v1252_v35 = vsel %vm5738_vm5, %v5703_v49, %v1248_v18 }
 0x34c   :  { %v5034_v60 = vld [vmem:[#allocation15 + $0x604] sm:$0xf]  ;;  %v1237_v2 = vsub.f32 1.5, %v1236_v51  ;;  %v4255_v37 = vor.u32 %v4970_v53, %v4252_v45  ;;  %v1259_v49 = vrot.slane %v1252_v35, 5  ;;  %2968 = vmatpush.bf16.msrb.mxu2 %v3999_v6  ;;  %v3970_v45 = vld [vmem:[#allocation15 + $0x1c8] sm:$0xf] }
 0x34d   :  { %v4508_v61 = vld [vmem:[#allocation15 + $0x620] sm:$0xf0]  ;;  %v5031_v35 = vld [vmem:[#allocation15 + $0x5e4] sm:$0xf0] }
 0x34e   :  { %v1238_v17 = vmul.f32 %v5710_v24, %v1237_v2  ;;  %v4511_v11 = vor.u32 %v5034_v60, %v4508_v61  ;;  %2982 = vmatpush.bf16.msrb.mxu3 %v4255_v37  ;;  %v4226_v60 = vld [vmem:[#allocation15 + $0x3c8] sm:$0xf] }
 0x34f   :  { %v4967_v61 = vld [vmem:[#allocation15 + $0x3e4] sm:$0xf0] }
 0x350   :  { %v1242_v20 = vsel %vm1241_vm7, %v5710_v24, %v1238_v17  ;;  %2996 = vmatpush.bf16.msra.mxu0 %v4511_v11  ;;  %v4482_v37 = vld [vmem:[#allocation15 + $0x5c8] sm:$0xf] }
 0x351   :  { %v1258_v21 = vrot.slane %v1242_v20, 6 }
 0x353   :  { %v1262_v62 = vsel %vm1261_vm9, %v1258_v21, %v1259_v49  ;;  %v4738_v49 = vld [vmem:[#allocation15 + $0x7c8] sm:$0xf] }
 0x354   :  { %v1264_v24 = vsel %vm1263_vm12, %v1260_v23, %v1262_v62  ;;  %v5095_v21 = vld [vmem:[#allocation15 + $0x7e4] sm:$0xf0]  ;;  %v4227_v23 = vor.u32 %v4967_v61, %v4226_v60 }
 0x355   :  { %v1266_v29 = vmul.f32 %v1264_v24, %v1019_v22  ;;  %v3971_v22 = vor.u32 %v4903_v59, %v3970_v45  ;;  %v3842_v60 = vld [vmem:[#allocation15 + $0xc8] sm:$0xf] }
 0x356   :  { %v4871_v61 = vld [vmem:[#allocation15 + $0xe4] sm:$0xf0] }
 0x357   :  { %v1268_v25 = vperm.slane %v1266_v29, 0  ;;  %v1269_v26 = vperm.slane %v1266_v29, 1  ;;  %v1270_v27 = vperm.slane %v1266_v29, 2  ;;  %v1271_v28 = vperm.slane %v1266_v29, 3 }
 0x359   :  { %v1277_v30 = vmul.f32 %v1269_v26, %v5658_v54  ;;  %v1278_v31 = vmul.f32 %v1270_v27, %v5684_v40  ;;  %v1279_v32 = vmul.f32 %v1271_v28, %v5675_v9  ;;  %v1276_v63 = vmul.f32 %v1268_v25, %v5661_v15 }
 0x35a   :  { %v1292_v43 = vmul.f32 %v1268_v25, %v5603_v56  ;;  %v1293_v54 = vmul.f32 %v1269_v26, %v5605_v57  ;;  %v1294_v40 = vmul.f32 %v1270_v27, %v5633_v14  ;;  %v1295_v9 = vmul.f32 %v1271_v28, %v5638_v16 }
 0x35b   :  { %v1284_v33 = vrot.slane %v1277_v30, 7  ;;  %v1285_v34 = vrot.slane %v1278_v31, 6  ;;  %v1286_v13 = vrot.slane %v1279_v32, 5  ;;  %v1296_v47 = vmul.f32 %v1268_v25, %v5601_v55  ;;  %v4194_v31 = vld [vmem:[#allocation15 + $0x388] sm:$0xf] }
 0x35c   :  { %v1297_v1 = vmul.f32 %v1269_v26, %v5607_v58  ;;  %v1298_v10 = vmul.f32 %v1270_v27, %v5629_v8  ;;  %v1299_v7 = vmul.f32 %v1271_v28, %v5631_v12  ;;  %v3938_v26 = vld [vmem:[#allocation15 + $0x188] sm:$0xf]  ;;  %v4483_v28 = vor.u32 %v5031_v35, %v4482_v37 }
 0x35d   :  { %v1287_v38 = vsel %vm483_vm11, %v1276_v63, %v1284_v33  ;;  %v1288_v50 = vsel %vm1261_vm9, %v1285_v34, %v1286_v13  ;;  %v4895_v27 = vld [vmem:[#allocation15 + $0x1a4] sm:$0xf0]  ;;  %v4739_v30 = vor.u32 %v5095_v21, %v4738_v49 }
 0x35e   :  { %v1289_v41 = vsel %vm1263_vm12, %v1287_v38, %v1288_v50  ;;  %v4959_v32 = vld [vmem:[#allocation15 + $0x3a4] sm:$0xf0]  ;;  %v3939_v38 = vor.u32 %v4895_v27, %v3938_v26 }
 0x35f   :  { %v1291_v42 = vsub.f32 %v1020_v36, %v1289_v41  ;;  %v4450_v63 = vld [vmem:[#allocation15 + $0x588] sm:$0xf]  ;;  %v4195_v50 = vor.u32 %v4959_v32, %v4194_v31 }
 0x360   :  { %v5023_v34 = vld [vmem:[#allocation15 + $0x5a4] sm:$0xf0] }
 0x361   :  { %v1301_v15 = vperm.slane %v1291_v42, 0  ;;  %v1302_v3 = vperm.slane %v1291_v42, 1  ;;  %v1303_v44 = vperm.slane %v1291_v42, 2  ;;  %v1304_v46 = vperm.slane %v1291_v42, 3  ;;  %v4706_v13 = vld [vmem:[#allocation15 + $0x788] sm:$0xf] }
 0x362   :  { %v5087_v36 = vld [vmem:[#allocation15 + $0x7a4] sm:$0xf0] }
 0x363   :  { %v1309_v18 = vadd.f32 %v1301_v15, %v1292_v43  ;;  %v1310_v56 = vadd.f32 %v1302_v3, %v1293_v54  ;;  %v1311_v51 = vadd.f32 %v1303_v44, %v1294_v40  ;;  %v1312_v57 = vadd.f32 %v1304_v46, %v1295_v9  ;;  %v3906_v41 = vld [vmem:[#allocation15 + $0x148] sm:$0xf] }
 0x364   :  { %v1313_v52 = vadd.f32 %v1301_v15, %v1296_v47  ;;  %v1314_v14 = vadd.f32 %v1302_v3, %v1297_v1  ;;  %v1315_v53 = vadd.f32 %v1303_v44, %v1298_v10  ;;  %v1316_v16 = vadd.f32 %v1304_v46, %v1299_v7  ;;  %v4887_v42 = vld [vmem:[#allocation15 + $0x164] sm:$0xf0] }
 0x365   :  { %v1317_v0 = vmul.f32 0.01, %v1309_v18  ;;  %v1318_v55 = vmul.f32 0.01, %v1310_v56  ;;  %v1319_v2 = vmul.f32 0.01, %v1311_v51  ;;  %v4451_v43 = vor.u32 %v5023_v34, %v4450_v63 }
 0x366   :  { %v1321_v58 = vmul.f32 0.01, %v1313_v52  ;;  %v1322_v4 = vmul.f32 0.01, %v1314_v14  ;;  %v1323_v8 = vmul.f32 0.01, %v1315_v53  ;;  %v4707_v54 = vor.u32 %v5087_v36, %v4706_v13 }
 0x367   :  { %v1325_v5 = vmax.f32 %v1309_v18, %v1317_v0  ;;  %v1326_v12 = vmax.f32 %v1310_v56, %v1318_v55  ;;  %v1327_v48 = vmax.f32 %v1311_v51, %v1319_v2  ;;  %v1320_v6 = vmul.f32 0.01, %v1312_v57  ;;  %v4162_v40 = vld [vmem:[#allocation15 + $0x348] sm:$0xf] }
 0x368   :  { %v1329_v17 = vmax.f32 %v1313_v52, %v1321_v58  ;;  %v1330_v11 = vmax.f32 %v1314_v14, %v1322_v4  ;;  %v1331_v19 = vmax.f32 %v1315_v53, %v1323_v8  ;;  %v1324_v20 = vmul.f32 0.01, %v1316_v16  ;;  %v4951_v9 = vld [vmem:[#allocation15 + $0x364] sm:$0xf0] }
 0x369   :  { %v1328_v39 = vmax.f32 %v1312_v57, %v1320_v6  ;;  %v4418_v15 = vld [vmem:[#allocation15 + $0x548] sm:$0xf]  ;;  %v3907_v47 = vor.u32 %v4887_v42, %v3906_v41  ;;  %v4163_v1 = vor.u32 %v4951_v9, %v4162_v40 }
 0x36a   :  { %v5772_v62 = vpack.c.bf16 %v1329_v17, %v1325_v5  ;;  %v5774_v24 = vpack.c.bf16 %v1330_v11, %v1326_v12  ;;  %v5776_v29 = vpack.c.bf16 %v1331_v19, %v1327_v48  ;;  %v1332_v25 = vmax.f32 %v1316_v16, %v1324_v20  ;;  %v5015_v3 = vld [vmem:[#allocation15 + $0x564] sm:$0xf0] }
 0x36b   :  { %v4674_v44 = vld [vmem:[#allocation15 + $0x748] sm:$0xf]  ;;  %v4419_v18 = vor.u32 %v5015_v3, %v4418_v15  ;;  %v3843_v48 = vor.u32 %v4871_v61, %v3842_v60  ;;  %v4891_v61 = vld [vmem:[#allocation15 + $0x18c] sm:$0xf] }
 0x36c   :  { %2899 = vmatmul.bf16.vlgmr.msra.gmra.mxu1 %v5772_v62  ;;  %2913 = vmatmul.bf16.vlgmr.msra.gmra.mxu2 %v5774_v24  ;;  %v5780_v33 = vpack.c.bf16 %v1332_v25, %v1328_v39  ;;  %v5079_v46 = vld [vmem:[#allocation15 + $0x764] sm:$0xf0] }
 0x36d   :  { %2927 = vmatmul.bf16.vlgmr.msra.gmra.mxu3 %v5776_v29  ;;  %3003 = vmatpush.bf16.msra.mxu1 %v3971_v22  ;;  %v3874_v10 = vld [vmem:[#allocation15 + $0x108] sm:$0xf]  ;;  %v4675_v56 = vor.u32 %v5079_v46, %v4674_v44  ;;  %v4899_v44 = vld [vmem:[#allocation15 + $0x1cc] sm:$0xf] }
 0x36e   :  { %2941 = vmatmul.bf16.vlgmr.msrb.gmra.mxu0 %v5780_v33  ;;  %3017 = vmatpush.bf16.msra.mxu2 %v4227_v23  ;;  %v4879_v7 = vld [vmem:[#allocation15 + $0x124] sm:$0xf0]  ;;  %v3972_v46 = vld [vmem:[#allocation15 + $0x1e8] sm:$0xf0] }
 0x36f   :  { %3031 = vmatpush.bf16.msra.mxu3 %v4483_v28  ;;  %3045 = vmatpush.bf16.msrb.mxu0 %v4739_v30  ;;  %v4130_v51 = vld [vmem:[#allocation15 + $0x308] sm:$0xf]  ;;  %v3875_v45 = vor.u32 %v4879_v7, %v3874_v10  ;;  %v4963_v10 = vld [vmem:[#allocation15 + $0x3cc] sm:$0xf] }
 0x370   :  { %v4943_v57 = vld [vmem:[#allocation15 + $0x324] sm:$0xf0] }
 0x371   :  { %3004 = vmatpush.bf16.msra.mxu1 %v3939_v38  ;;  %v4386_v52 = vld [vmem:[#allocation15 + $0x508] sm:$0xf]  ;;  %v4131_v59 = vor.u32 %v4943_v57, %v4130_v51  ;;  %v4484_v51 = vld [vmem:[#allocation15 + $0x5e8] sm:$0xf0] }
 0x372   :  { %3018 = vmatpush.bf16.msra.mxu2 %v4195_v50  ;;  %v5007_v14 = vld [vmem:[#allocation15 + $0x524] sm:$0xf0] }
 0x373   :  { %3032 = vmatpush.bf16.msra.mxu3 %v4451_v43  ;;  %3046 = vmatpush.bf16.msrb.mxu0 %v4707_v54  ;;  %v4642_v53 = vld [vmem:[#allocation15 + $0x708] sm:$0xf]  ;;  %v4387_v0 = vor.u32 %v5007_v14, %v4386_v52  ;;  %v3975_v52 = vor.u32 %v4899_v44, %v3972_v46  ;;  %v5091_v14 = vld [vmem:[#allocation15 + $0x7cc] sm:$0xf] }
 0x374   :  { %v5071_v16 = vld [vmem:[#allocation15 + $0x724] sm:$0xf0]  ;;  %v5059_v44 = vld [vmem:[#allocation15 + $0x6cc] sm:$0xf] }
 0x375   :  { %3005 = vmatpush.bf16.msra.mxu1 %v3907_v47  ;;  %v4643_v55 = vor.u32 %v5071_v16, %v4642_v53  ;;  %v4098_v2 = vld [vmem:[#allocation15 + $0x2c8] sm:$0xf]  ;;  %v4740_v53 = vld [vmem:[#allocation15 + $0x7e8] sm:$0xf0] }
 0x376   :  { %3019 = vmatpush.bf16.msra.mxu2 %v4163_v1  ;;  %v4935_v58 = vld [vmem:[#allocation15 + $0x2e4] sm:$0xf0]  ;;  %v4612_v46 = vld [vmem:[#allocation15 + $0x6e8] sm:$0xf0] }
 0x377   :  { %3033 = vmatpush.bf16.msra.mxu3 %v4419_v18  ;;  %3047 = vmatpush.bf16.msrb.mxu0 %v4675_v56  ;;  %v4354_v4 = vld [vmem:[#allocation15 + $0x4c8] sm:$0xf]  ;;  %v4099_v6 = vor.u32 %v4935_v58, %v4098_v2  ;;  %v4228_v18 = vld [vmem:[#allocation15 + $0x3e8] sm:$0xf0]  ;;  %v4743_v2 = vor.u32 %v5091_v14, %v4740_v53 }
 0x378   :  { %v4999_v8 = vld [vmem:[#allocation15 + $0x4e4] sm:$0xf0]  ;;  %v5027_v56 = vld [vmem:[#allocation15 + $0x5cc] sm:$0xf] }
 0x379   :  { %v4610_v5 = vld [vmem:[#allocation15 + $0x6c8] sm:$0xf]  ;;  %3006 = vmatpush.bf16.msra.mxu1 %v3875_v45  ;;  %v4355_v17 = vor.u32 %v4999_v8, %v4354_v4  ;;  %v4487_v60 = vor.u32 %v5027_v56, %v4484_v51  ;;  %v4196_v58 = vld [vmem:[#allocation15 + $0x3a8] sm:$0xf0]  ;;  %v4615_v51 = vor.u32 %v5059_v44, %v4612_v46  ;;  %v4714_v44 = vld [vmem:[#allocation15 + $0x790] sm:$0xf] }
 0x37a   :  { %v5063_v12 = vld [vmem:[#allocation15 + $0x6e4] sm:$0xf0]  ;;  %3020 = vmatpush.bf16.msra.mxu2 %v4131_v59  ;;  %v4231_v59 = vor.u32 %v4963_v10, %v4228_v18  ;;  %v5019_v4 = vld [vmem:[#allocation15 + $0x58c] sm:$0xf]  ;;  %v5088_v46 = vld [vmem:[#allocation15 + $0x7ac] sm:$0xf0] }
 0x37b   :  { %v3810_v37 = vld [vmem:[#allocation15 + $0x88] sm:$0xf]  ;;  %3034 = vmatpush.bf16.msra.mxu3 %v4387_v0  ;;  %3048 = vmatpush.bf16.msrb.mxu0 %v4643_v55  ;;  %v4611_v11 = vor.u32 %v5063_v12, %v4610_v5  ;;  %v3940_v0 = vld [vmem:[#allocation15 + $0x1a8] sm:$0xf0] }
 0x37c   :  { %v4863_v35 = vld [vmem:[#allocation15 + $0xa4] sm:$0xf0]  ;;  %2955 = vmatmul.bf16.vlgmr.msrb.gmra.mxu1 %v5772_v62  ;;  %2969 = vmatmul.bf16.vlgmr.msrb.gmra.mxu2 %v5774_v24  ;;  %v4955_v55 = vld [vmem:[#allocation15 + $0x38c] sm:$0xf] }
 0x37d   :  { %v4066_v19 = vld [vmem:[#allocation15 + $0x288] sm:$0xf]  ;;  %2983 = vmatmul.bf16.vlgmr.msrb.gmra.mxu3 %v5776_v29  ;;  %3007 = vmatpush.bf16.msra.mxu1 %v3843_v48  ;;  %v3811_v23 = vor.u32 %v4863_v35, %v3810_v37  ;;  %v4452_v8 = vld [vmem:[#allocation15 + $0x5a8] sm:$0xf0]  ;;  %v3943_v48 = vor.u32 %v4891_v61, %v3940_v0 }
 0x37e   :  { %v4927_v20 = vld [vmem:[#allocation15 + $0x2a4] sm:$0xf0]  ;;  %2997 = vmatmul.bf16.vlgmr.msra.gmra.mxu0 %v5780_v33  ;;  %3021 = vmatpush.bf16.msra.mxu2 %v4099_v6  ;;  %v5083_v5 = vld [vmem:[#allocation15 + $0x78c] sm:$0xf]  ;;  %v4199_v6 = vor.u32 %v4955_v55, %v4196_v58  ;;  %v4455_v37 = vor.u32 %v5019_v4, %v4452_v8 }
 0x37f   :  { %v4322_v49 = vld [vmem:[#allocation15 + $0x488] sm:$0xf]  ;;  %v4067_v25 = vor.u32 %v4927_v20, %v4066_v19  ;;  %3035 = vmatpush.bf16.msra.mxu3 %v4355_v17  ;;  %3049 = vmatpush.bf16.msrb.mxu0 %v4611_v11  ;;  %v4708_v12 = vld [vmem:[#allocation15 + $0x7a8] sm:$0xf0] }
 0x380   :  { %v4991_v21 = vld [vmem:[#allocation15 + $0x4a4] sm:$0xf0]  ;;  %v4883_v35 = vld [vmem:[#allocation15 + $0x14c] sm:$0xf]  ;;  %v4711_v19 = vor.u32 %v5083_v5, %v4708_v12 }
 0x381   :  { %v4578_v39 = vld [vmem:[#allocation15 + $0x688] sm:$0xf]  ;;  %v4323_v28 = vor.u32 %v4991_v21, %v4322_v49  ;;  %3008 = vmatpush.bf16.msra.mxu1 %v3811_v23  ;;  %v3908_v17 = vld [vmem:[#allocation15 + $0x168] sm:$0xf0] }
 0x382   :  { %v5055_v22 = vld [vmem:[#allocation15 + $0x6a4] sm:$0xf0]  ;;  %3022 = vmatpush.bf16.msra.mxu2 %v4067_v25  ;;  %v4947_v11 = vld [vmem:[#allocation15 + $0x34c] sm:$0xf]  ;;  %v3911_v23 = vor.u32 %v4883_v35, %v3908_v17 }
 0x383   :  { %v3778_v26 = vld [vmem:[#allocation15 + $0x48] sm:$0xf]  ;;  %v4579_v30 = vor.u32 %v5055_v22, %v4578_v39  ;;  %3036 = vmatpush.bf16.msra.mxu3 %v4323_v28  ;;  %v4164_v20 = vld [vmem:[#allocation15 + $0x368] sm:$0xf0] }
 0x384   :  { %v4855_v27 = vld [vmem:[#allocation15 + $0x64] sm:$0xf0]  ;;  %v5011_v49 = vld [vmem:[#allocation15 + $0x54c] sm:$0xf]  ;;  %v4167_v25 = vor.u32 %v4947_v11, %v4164_v20 }
 0x385   :  { %v4034_v31 = vld [vmem:[#allocation15 + $0x248] sm:$0xf]  ;;  %v3779_v38 = vor.u32 %v4855_v27, %v3778_v26  ;;  %3050 = vmatpush.bf16.msrb.mxu0 %v4579_v30  ;;  %v4420_v21 = vld [vmem:[#allocation15 + $0x568] sm:$0xf0] }
 0x386   :  { %v4919_v32 = vld [vmem:[#allocation15 + $0x264] sm:$0xf0]  ;;  %v5075_v39 = vld [vmem:[#allocation15 + $0x74c] sm:$0xf]  ;;  %v4423_v26 = vor.u32 %v5011_v49, %v4420_v21 }
 0x387   :  { %v4290_v63 = vld [vmem:[#allocation15 + $0x448] sm:$0xf]  ;;  %v4035_v42 = vor.u32 %v4919_v32, %v4034_v31  ;;  %3009 = vmatpush.bf16.msra.mxu1 %v3779_v38  ;;  %v4676_v22 = vld [vmem:[#allocation15 + $0x768] sm:$0xf0] }
 0x388   :  { %v4983_v34 = vld [vmem:[#allocation15 + $0x464] sm:$0xf0]  ;;  %v4875_v27 = vld [vmem:[#allocation15 + $0x10c] sm:$0xf]  ;;  %v4679_v31 = vor.u32 %v5075_v39, %v4676_v22 }
 0x389   :  { %v4546_v13 = vld [vmem:[#allocation15 + $0x648] sm:$0xf]  ;;  %v4291_v9 = vor.u32 %v4983_v34, %v4290_v63  ;;  %3023 = vmatpush.bf16.msra.mxu2 %v4035_v42  ;;  %v3876_v28 = vld [vmem:[#allocation15 + $0x128] sm:$0xf0] }
 0x38a   :  { %v5047_v36 = vld [vmem:[#allocation15 + $0x664] sm:$0xf0]  ;;  %v4939_v30 = vld [vmem:[#allocation15 + $0x30c] sm:$0xf]  ;;  %v3879_v38 = vor.u32 %v4875_v27, %v3876_v28  ;;  %v4968_v28 = vld [vmem:[#allocation15 + $0x3ec] sm:$0xf0] }
 0x38b   :  { %v3746_v50 = vld [vmem:[#allocation15 + $0x8] sm:$0xf]  ;;  %v4547_v15 = vor.u32 %v5047_v36, %v4546_v13  ;;  %3037 = vmatpush.bf16.msra.mxu3 %v4291_v9  ;;  %v4132_v32 = vld [vmem:[#allocation15 + $0x328] sm:$0xf0] }
 0x38c   :  { %v4847_v41 = vld [vmem:[#allocation15 + $0x24] sm:$0xf0]  ;;  %v5003_v63 = vld [vmem:[#allocation15 + $0x50c] sm:$0xf] }
 0x38d   :  { %v4002_v43 = vld [vmem:[#allocation15 + $0x208] sm:$0xf]  ;;  %v3747_v7 = vor.u32 %v4847_v41, %v3746_v50  ;;  %3051 = vmatpush.bf16.msrb.mxu0 %v4547_v15  ;;  %v4388_v34 = vld [vmem:[#allocation15 + $0x528] sm:$0xf0]  ;;  %v4135_v50 = vor.u32 %v4939_v30, %v4132_v32  ;;  %v4490_v30 = vld [vmem:[#allocation15 + $0x5d0] sm:$0xf] }
 0x38e   :  { %v4911_v54 = vld [vmem:[#allocation15 + $0x224] sm:$0xf0]  ;;  %v5067_v13 = vld [vmem:[#allocation15 + $0x70c] sm:$0xf]  ;;  %v4391_v41 = vor.u32 %v5003_v63, %v4388_v34  ;;  %v4746_v34 = vld [vmem:[#allocation15 + $0x7d0] sm:$0xf] }
 0x38f   :  { %v4258_v40 = vld [vmem:[#allocation15 + $0x408] sm:$0xf]  ;;  %v4003_v57 = vor.u32 %v4911_v54, %v4002_v43  ;;  %3010 = vmatpush.bf16.msra.mxu1 %v3747_v7  ;;  %v4644_v36 = vld [vmem:[#allocation15 + $0x728] sm:$0xf0] }
 0x390   :  { %v4975_v3 = vld [vmem:[#allocation15 + $0x424] sm:$0xf0]  ;;  %v4867_v42 = vld [vmem:[#allocation15 + $0xcc] sm:$0xf] }
 0x391   :  { %v4514_v47 = vld [vmem:[#allocation15 + $0x608] sm:$0xf]  ;;  %v4259_v16 = vor.u32 %v4975_v3, %v4258_v40  ;;  %3024 = vmatpush.bf16.msra.mxu2 %v4003_v57  ;;  %v3844_v43 = vld [vmem:[#allocation15 + $0xe8] sm:$0xf0]  ;;  %v4647_v40 = vor.u32 %v5067_v13, %v4644_v36  ;;  %v5096_v13 = vld [vmem:[#allocation15 + $0x7ec] sm:$0xf0] }
 0x392   :  { %v5039_v1 = vld [vmem:[#allocation15 + $0x624] sm:$0xf0]  ;;  %3011 = vmatmul.bf16.vlgmr.msra.gmra.mxu1 %v5772_v62  ;;  %v4931_v54 = vld [vmem:[#allocation15 + $0x2cc] sm:$0xf] }
 0x393   :  { %v4515_v45 = vor.u32 %v5039_v1, %v4514_v47  ;;  %3059 = vmatpush.bf16.msrb.mxu1 %v3975_v52  ;;  %3038 = vmatpush.bf16.msra.mxu3 %v4259_v16  ;;  %v4100_v9 = vld [vmem:[#allocation15 + $0x2e8] sm:$0xf0]  ;;  %v3847_v47 = vor.u32 %v4867_v42, %v3844_v43  ;;  %v3946_v42 = vld [vmem:[#allocation15 + $0x190] sm:$0xf] }
 0x394   :  { %3025 = vmatmul.bf16.vlgmr.msra.gmra.mxu2 %v5774_v24  ;;  %v4995_v15 = vld [vmem:[#allocation15 + $0x4cc] sm:$0xf]  ;;  %v4103_v1 = vor.u32 %v4931_v54, %v4100_v9  ;;  %v4896_v43 = vld [vmem:[#allocation15 + $0x1ac] sm:$0xf0] }
 0x395   :  { %3052 = vmatpush.bf16.msrb.mxu0 %v4515_v45  ;;  %3073 = vmatpush.bf16.msrb.mxu2 %v4231_v59  ;;  %v4356_v3 = vld [vmem:[#allocation15 + $0x4e8] sm:$0xf0]  ;;  %v4202_v54 = vld [vmem:[#allocation15 + $0x390] sm:$0xf] }
 0x396   :  { %3039 = vmatmul.bf16.vlgmr.msra.gmra.mxu3 %v5776_v29  ;;  %v4359_v10 = vor.u32 %v4995_v15, %v4356_v3  ;;  %v4859_v7 = vld [vmem:[#allocation15 + $0x8c] sm:$0xf]  ;;  %v4960_v9 = vld [vmem:[#allocation15 + $0x3ac] sm:$0xf0] }
 0x397   :  { %3087 = vmatpush.bf16.msrb.mxu3 %v4487_v60  ;;  %3060 = vmatpush.bf16.msrb.mxu1 %v3943_v48  ;;  %v3812_v18 = vld [vmem:[#allocation15 + $0xa8] sm:$0xf0]  ;;  %v4458_v15 = vld [vmem:[#allocation15 + $0x590] sm:$0xf] }
 0x398   :  { %3053 = vmatmul.bf16.vlgmr.msrb.gmra.mxu0 %v5780_v33  ;;  %v4923_v56 = vld [vmem:[#allocation15 + $0x28c] sm:$0xf]  ;;  %v3815_v45 = vor.u32 %v4859_v7, %v3812_v18  ;;  %v5024_v3 = vld [vmem:[#allocation15 + $0x5ac] sm:$0xf0] }
 0x399   :  { %3101 = vmatpush.bf16.msra.mxu0 %v4743_v2  ;;  %3074 = vmatpush.bf16.msrb.mxu2 %v4199_v6  ;;  %v4068_v57 = vld [vmem:[#allocation15 + $0x2a8] sm:$0xf0]  ;;  %v3914_v7 = vld [vmem:[#allocation15 + $0x150] sm:$0xf] }
 0x39a   :  { %v4987_v52 = vld [vmem:[#allocation15 + $0x48c] sm:$0xf]  ;;  %v4071_v59 = vor.u32 %v4923_v56, %v4068_v57  ;;  %v4888_v18 = vld [vmem:[#allocation15 + $0x16c] sm:$0xf0] }
 0x39b   :  { %3088 = vmatpush.bf16.msrb.mxu3 %v4455_v37  ;;  %3061 = vmatpush.bf16.msrb.mxu1 %v3911_v23  ;;  %v4324_v14 = vld [vmem:[#allocation15 + $0x4a8] sm:$0xf0]  ;;  %v3978_v23 = vld [vmem:[#allocation15 + $0x1d0] sm:$0xf] }
 0x39c   :  { %v5051_v53 = vld [vmem:[#allocation15 + $0x68c] sm:$0xf]  ;;  %v4327_v60 = vor.u32 %v4987_v52, %v4324_v14  ;;  %v4170_v56 = vld [vmem:[#allocation15 + $0x350] sm:$0xf] }
 0x39d   :  { %3102 = vmatpush.bf16.msra.mxu0 %v4711_v19  ;;  %3075 = vmatpush.bf16.msrb.mxu2 %v4167_v25  ;;  %v4580_v16 = vld [vmem:[#allocation15 + $0x6a8] sm:$0xf0]  ;;  %v4904_v25 = vld [vmem:[#allocation15 + $0x1ec] sm:$0xf0] }
 0x39e   :  { %v4851_v61 = vld [vmem:[#allocation15 + $0x4c] sm:$0xf]  ;;  %v4583_v2 = vor.u32 %v5051_v53, %v4580_v16  ;;  %v4952_v57 = vld [vmem:[#allocation15 + $0x36c] sm:$0xf0] }
 0x39f   :  { %3089 = vmatpush.bf16.msrb.mxu3 %v4423_v26  ;;  %3062 = vmatpush.bf16.msrb.mxu1 %v3879_v38  ;;  %v3780_v0 = vld [vmem:[#allocation15 + $0x68] sm:$0xf0]  ;;  %v4234_v26 = vld [vmem:[#allocation15 + $0x3d0] sm:$0xf]  ;;  %v3979_v38 = vor.u32 %v4904_v25, %v3978_v23 }
 0x3a0   :  { %v4915_v55 = vld [vmem:[#allocation15 + $0x24c] sm:$0xf]  ;;  %v3783_v48 = vor.u32 %v4851_v61, %v3780_v0  ;;  %v4426_v52 = vld [vmem:[#allocation15 + $0x550] sm:$0xf] }
 0x3a1   :  { %3103 = vmatpush.bf16.msra.mxu0 %v4679_v31  ;;  %3076 = vmatpush.bf16.msrb.mxu2 %v4135_v50  ;;  %v4036_v58 = vld [vmem:[#allocation15 + $0x268] sm:$0xf0]  ;;  %v5032_v31 = vld [vmem:[#allocation15 + $0x5ec] sm:$0xf0]  ;;  %v4235_v50 = vor.u32 %v4968_v28, %v4234_v26 }
 0x3a2   :  { %v4979_v4 = vld [vmem:[#allocation15 + $0x44c] sm:$0xf]  ;;  %v4039_v35 = vor.u32 %v4915_v55, %v4036_v58  ;;  %v5016_v14 = vld [vmem:[#allocation15 + $0x56c] sm:$0xf0] }
 0x3a3   :  { %3090 = vmatpush.bf16.msrb.mxu3 %v4391_v41  ;;  %3063 = vmatpush.bf16.msrb.mxu1 %v3847_v47  ;;  %v4292_v8 = vld [vmem:[#allocation15 + $0x468] sm:$0xf0]  ;;  %v4491_v41 = vor.u32 %v5032_v31, %v4490_v30  ;;  %v3947_v47 = vor.u32 %v4896_v43, %v3946_v42  ;;  %v4682_v53 = vld [vmem:[#allocation15 + $0x750] sm:$0xf] }
 0x3a4   :  { %v5043_v5 = vld [vmem:[#allocation15 + $0x64c] sm:$0xf]  ;;  %v4295_v17 = vor.u32 %v4979_v4, %v4292_v8  ;;  %v5080_v16 = vld [vmem:[#allocation15 + $0x76c] sm:$0xf0] }
 0x3a5   :  { %3104 = vmatpush.bf16.msra.mxu0 %v4647_v40  ;;  %3077 = vmatpush.bf16.msrb.mxu2 %v4103_v1  ;;  %v4548_v12 = vld [vmem:[#allocation15 + $0x668] sm:$0xf0]  ;;  %v4747_v40 = vor.u32 %v5096_v13, %v4746_v34  ;;  %v4203_v1 = vor.u32 %v4960_v9, %v4202_v54  ;;  %v3882_v61 = vld [vmem:[#allocation15 + $0x110] sm:$0xf] }
 0x3a6   :  { %v4843_v6 = vld [vmem:[#allocation15 + $0xc] sm:$0xf]  ;;  %v4551_v49 = vor.u32 %v5043_v5, %v4548_v12  ;;  %v4880_v0 = vld [vmem:[#allocation15 + $0x12c] sm:$0xf0] }
 0x3a7   :  { %3091 = vmatpush.bf16.msrb.mxu3 %v4359_v10  ;;  %3064 = vmatpush.bf16.msrb.mxu1 %v3815_v45  ;;  %v3748_v37 = vld [vmem:[#allocation15 + $0x28] sm:$0xf0]  ;;  %v4459_v10 = vor.u32 %v5024_v3, %v4458_v15  ;;  %v3915_v45 = vor.u32 %v4888_v18, %v3914_v7  ;;  %v4138_v55 = vld [vmem:[#allocation15 + $0x310] sm:$0xf] }
 0x3a8   :  { %v4907_v11 = vld [vmem:[#allocation15 + $0x20c] sm:$0xf]  ;;  %v3751_v27 = vor.u32 %v4843_v6, %v3748_v37  ;;  %v4944_v58 = vld [vmem:[#allocation15 + $0x32c] sm:$0xf0] }
 0x3a9   :  { %3105 = vmatpush.bf16.msra.mxu0 %v4615_v51  ;;  %3078 = vmatpush.bf16.msrb.mxu2 %v4071_v59  ;;  %v4004_v19 = vld [vmem:[#allocation15 + $0x228] sm:$0xf0]  ;;  %v4715_v51 = vor.u32 %v5088_v46, %v4714_v44  ;;  %v4171_v59 = vor.u32 %v4952_v57, %v4170_v56  ;;  %v4394_v4 = vld [vmem:[#allocation15 + $0x510] sm:$0xf]  ;;  %v4139_v6 = vor.u32 %v4944_v58, %v4138_v55  ;;  %v5028_v55 = vld [vmem:[#allocation15 + $0x5d4] sm:$0xf] }
 0x3aa   :  { %v4971_v20 = vld [vmem:[#allocation15 + $0x40c] sm:$0xf]  ;;  %v4007_v32 = vor.u32 %v4907_v11, %v4004_v19  ;;  %v5008_v8 = vld [vmem:[#allocation15 + $0x52c] sm:$0xf0] }
 0x3ab   :  { %3092 = vmatpush.bf16.msrb.mxu3 %v4327_v60  ;;  %v4260_v21 = vld [vmem:[#allocation15 + $0x428] sm:$0xf0]  ;;  %3065 = vmatpush.bf16.msrb.mxu1 %v3783_v48  ;;  %v4427_v60 = vor.u32 %v5016_v14, %v4426_v52  ;;  %v4650_v5 = vld [vmem:[#allocation15 + $0x710] sm:$0xf]  ;;  %v3883_v48 = vor.u32 %v4880_v0, %v3882_v61  ;;  %v4395_v37 = vor.u32 %v5008_v8, %v4394_v4  ;;  %v4236_v0 = vld [vmem:[#allocation15 + $0x3f0] sm:$0xf0] }
 0x3ac   :  { %v5035_v39 = vld [vmem:[#allocation15 + $0x60c] sm:$0xf]  ;;  %v4263_v63 = vor.u32 %v4971_v20, %v4260_v21  ;;  %v5072_v12 = vld [vmem:[#allocation15 + $0x72c] sm:$0xf0]  ;;  %v5092_v8 = vld [vmem:[#allocation15 + $0x7d4] sm:$0xf] }
 0x3ad   :  { %3106 = vmatpush.bf16.msra.mxu0 %v4583_v2  ;;  %v4516_v22 = vld [vmem:[#allocation15 + $0x628] sm:$0xf0]  ;;  %3079 = vmatpush.bf16.msrb.mxu2 %v4039_v35  ;;  %v4683_v2 = vor.u32 %v5080_v16, %v4682_v53  ;;  %v3850_v35 = vld [vmem:[#allocation15 + $0xd0] sm:$0xf]  ;;  %v4651_v19 = vor.u32 %v5072_v12, %v4650_v5  ;;  %v4748_v5 = vld [vmem:[#allocation15 + $0x7f0] sm:$0xf0] }
 0x3ae   :  { %v4519_v36 = vor.u32 %v5035_v39, %v4516_v22  ;;  %v4106_v11 = vld [vmem:[#allocation15 + $0x2d0] sm:$0xf] }
 0x3af   :  { %3093 = vmatpush.bf16.msrb.mxu3 %v4295_v17  ;;  %3066 = vmatpush.bf16.msrb.mxu1 %v3751_v27  ;;  %v4872_v17 = vld [vmem:[#allocation15 + $0xec] sm:$0xf0] }
 0x3b0   :  { %v4936_v20 = vld [vmem:[#allocation15 + $0x2ec] sm:$0xf0]  ;;  %v3851_v23 = vor.u32 %v4872_v17, %v3850_v35  ;;  %v4892_v35 = vld [vmem:[#allocation15 + $0x194] sm:$0xf] }
 0x3b1   :  { %3107 = vmatpush.bf16.msra.mxu0 %v4551_v49  ;;  %3080 = vmatpush.bf16.msrb.mxu2 %v4007_v32  ;;  %v4362_v49 = vld [vmem:[#allocation15 + $0x4d0] sm:$0xf]  ;;  %v4107_v25 = vor.u32 %v4936_v20, %v4106_v11  ;;  %v3948_v17 = vld [vmem:[#allocation15 + $0x1b0] sm:$0xf0] }
 0x3b2   :  { %3067 = vmatmul.bf16.vlgmr.msrb.gmra.mxu1 %v5772_v62  ;;  %v5000_v21 = vld [vmem:[#allocation15 + $0x4ec] sm:$0xf0]  ;;  %v4956_v11 = vld [vmem:[#allocation15 + $0x394] sm:$0xf] }
 0x3b3   :  { %3094 = vmatpush.bf16.msrb.mxu3 %v4263_v63  ;;  %3115 = vmatpush.bf16.msra.mxu1 %v3979_v38  ;;  %v4618_v39 = vld [vmem:[#allocation15 + $0x6d0] sm:$0xf]  ;;  %v4363_v26 = vor.u32 %v5000_v21, %v4362_v49  ;;  %v4204_v20 = vld [vmem:[#allocation15 + $0x3b0] sm:$0xf0] }
 0x3b4   :  { %3081 = vmatmul.bf16.vlgmr.msrb.gmra.mxu2 %v5774_v24  ;;  %v5064_v22 = vld [vmem:[#allocation15 + $0x6ec] sm:$0xf0]  ;;  %v5020_v49 = vld [vmem:[#allocation15 + $0x594] sm:$0xf] }
 0x3b5   :  { %3108 = vmatpush.bf16.msra.mxu0 %v4519_v36  ;;  %3129 = vmatpush.bf16.msra.mxu2 %v4235_v50  ;;  %v3818_v27 = vld [vmem:[#allocation15 + $0x90] sm:$0xf]  ;;  %v4619_v31 = vor.u32 %v5064_v22, %v4618_v39  ;;  %v4460_v21 = vld [vmem:[#allocation15 + $0x5b0] sm:$0xf0] }
 0x3b6   :  { %3095 = vmatmul.bf16.vlgmr.msrb.gmra.mxu3 %v5776_v29  ;;  %v4864_v28 = vld [vmem:[#allocation15 + $0xac] sm:$0xf0]  ;;  %v5084_v39 = vld [vmem:[#allocation15 + $0x794] sm:$0xf] }
 0x3b7   :  { %3143 = vmatpush.bf16.msra.mxu3 %v4491_v41  ;;  %3116 = vmatpush.bf16.msra.mxu1 %v3947_v47  ;;  %v4074_v30 = vld [vmem:[#allocation15 + $0x290] sm:$0xf]  ;;  %v3819_v38 = vor.u32 %v4864_v28, %v3818_v27  ;;  %v4716_v22 = vld [vmem:[#allocation15 + $0x7b0] sm:$0xf0] }
 0x3b8   :  { %3109 = vmatmul.bf16.vlgmr.msra.gmra.mxu0 %v5780_v33  ;;  %v4928_v32 = vld [vmem:[#allocation15 + $0x2ac] sm:$0xf0]  ;;  %v4884_v27 = vld [vmem:[#allocation15 + $0x154] sm:$0xf] }
 0x3b9   :  { %3157 = vmatpush.bf16.msrb.mxu0 %v4747_v40  ;;  %3130 = vmatpush.bf16.msra.mxu2 %v4203_v1  ;;  %v4330_v63 = vld [vmem:[#allocation15 + $0x490] sm:$0xf]  ;;  %v4075_v50 = vor.u32 %v4928_v32, %v4074_v30  ;;  %v3916_v28 = vld [vmem:[#allocation15 + $0x170] sm:$0xf0] }
 0x3ba   :  { %v4992_v34 = vld [vmem:[#allocation15 + $0x4ac] sm:$0xf0]  ;;  %v4948_v30 = vld [vmem:[#allocation15 + $0x354] sm:$0xf] }
 0x3bb   :  { %3144 = vmatpush.bf16.msra.mxu3 %v4459_v10  ;;  %3117 = vmatpush.bf16.msra.mxu1 %v3915_v45  ;;  %v4586_v13 = vld [vmem:[#allocation15 + $0x690] sm:$0xf]  ;;  %v4331_v41 = vor.u32 %v4992_v34, %v4330_v63  ;;  %v4900_v45 = vld [vmem:[#allocation15 + $0x1d4] sm:$0xf] }
 0x3bc   :  { %v5056_v36 = vld [vmem:[#allocation15 + $0x6ac] sm:$0xf0]  ;;  %v4172_v32 = vld [vmem:[#allocation15 + $0x370] sm:$0xf0] }
 0x3bd   :  { %3158 = vmatpush.bf16.msrb.mxu0 %v4715_v51  ;;  %3131 = vmatpush.bf16.msra.mxu2 %v4171_v59  ;;  %v3786_v42 = vld [vmem:[#allocation15 + $0x50] sm:$0xf]  ;;  %v4587_v40 = vor.u32 %v5056_v36, %v4586_v13  ;;  %v3980_v59 = vld [vmem:[#allocation15 + $0x1f0] sm:$0xf0] }
 0x3be   :  { %v4856_v43 = vld [vmem:[#allocation15 + $0x6c] sm:$0xf0]  ;;  %v5012_v63 = vld [vmem:[#allocation15 + $0x554] sm:$0xf] }
 0x3bf   :  { %3145 = vmatpush.bf16.msra.mxu3 %v4427_v60  ;;  %3118 = vmatpush.bf16.msra.mxu1 %v3883_v48  ;;  %v4042_v54 = vld [vmem:[#allocation15 + $0x250] sm:$0xf]  ;;  %v3787_v47 = vor.u32 %v4856_v43, %v3786_v42  ;;  %v4964_v60 = vld [vmem:[#allocation15 + $0x3d4] sm:$0xf]  ;;  %v3983_v48 = vor.u32 %v4900_v45, %v3980_v59 }
 0x3c0   :  { %v4920_v9 = vld [vmem:[#allocation15 + $0x26c] sm:$0xf0]  ;;  %v4428_v34 = vld [vmem:[#allocation15 + $0x570] sm:$0xf0] }
 0x3c1   :  { %3159 = vmatpush.bf16.msrb.mxu0 %v4683_v2  ;;  %3132 = vmatpush.bf16.msra.mxu2 %v4139_v6  ;;  %v4298_v15 = vld [vmem:[#allocation15 + $0x450] sm:$0xf]  ;;  %v4043_v7 = vor.u32 %v4920_v9, %v4042_v54  ;;  %v4492_v2 = vld [vmem:[#allocation15 + $0x5f0] sm:$0xf0]  ;;  %v4239_v6 = vor.u32 %v4964_v60, %v4236_v0 }
 0x3c2   :  { %v4984_v3 = vld [vmem:[#allocation15 + $0x46c] sm:$0xf0]  ;;  %v5076_v13 = vld [vmem:[#allocation15 + $0x754] sm:$0xf] }
 0x3c3   :  { %3146 = vmatpush.bf16.msra.mxu3 %v4395_v37  ;;  %3119 = vmatpush.bf16.msra.mxu1 %v3851_v23  ;;  %v4554_v44 = vld [vmem:[#allocation15 + $0x650] sm:$0xf]  ;;  %v4299_v18 = vor.u32 %v4984_v3, %v4298_v15  ;;  %v4495_v37 = vor.u32 %v5028_v55, %v4492_v2  ;;  %v3951_v23 = vor.u32 %v4892_v35, %v3948_v17  ;;  %v4684_v36 = vld [vmem:[#allocation15 + $0x770] sm:$0xf0] }
 0x3c4   :  { %v5048_v46 = vld [vmem:[#allocation15 + $0x66c] sm:$0xf0]  ;;  %v4876_v42 = vld [vmem:[#allocation15 + $0x114] sm:$0xf] }
 0x3c5   :  { %3160 = vmatpush.bf16.msrb.mxu0 %v4651_v19  ;;  %3133 = vmatpush.bf16.msra.mxu2 %v4107_v25  ;;  %v3754_v1 = vld [vmem:[#allocation15 + $0x10] sm:$0xf]  ;;  %v4555_v52 = vor.u32 %v5048_v46, %v4554_v44  ;;  %v4751_v19 = vor.u32 %v5092_v8, %v4748_v5  ;;  %v4207_v25 = vor.u32 %v4956_v11, %v4204_v20  ;;  %v3884_v43 = vld [vmem:[#allocation15 + $0x130] sm:$0xf0] }
 0x3c6   :  { %v4848_v10 = vld [vmem:[#allocation15 + $0x2c] sm:$0xf0]  ;;  %v4940_v54 = vld [vmem:[#allocation15 + $0x314] sm:$0xf] }
 0x3c7   :  { %3147 = vmatpush.bf16.msra.mxu3 %v4363_v26  ;;  %3120 = vmatpush.bf16.msra.mxu1 %v3819_v38  ;;  %v4010_v56 = vld [vmem:[#allocation15 + $0x210] sm:$0xf]  ;;  %v3755_v61 = vor.u32 %v4848_v10, %v3754_v1  ;;  %v4463_v26 = vor.u32 %v5020_v49, %v4460_v21  ;;  %v3919_v38 = vor.u32 %v4884_v27, %v3916_v28  ;;  %v4140_v9 = vld [vmem:[#allocation15 + $0x330] sm:$0xf0] }
 0x3c8   :  { %v4912_v51 = vld [vmem:[#allocation15 + $0x22c] sm:$0xf0]  ;;  %v5004_v15 = vld [vmem:[#allocation15 + $0x514] sm:$0xf]  ;;  %v4143_v1 = vor.u32 %v4940_v54, %v4140_v9  ;;  %v4498_v54 = vld [vmem:[#allocation15 + $0x5d8] sm:$0xf] }
 0x3c9   :  { %3161 = vmatpush.bf16.msrb.mxu0 %v4619_v31  ;;  %3134 = vmatpush.bf16.msra.mxu2 %v4075_v50  ;;  %v4266_v57 = vld [vmem:[#allocation15 + $0x410] sm:$0xf]  ;;  %v4011_v58 = vor.u32 %v4912_v51, %v4010_v56  ;;  %v4719_v31 = vor.u32 %v5084_v39, %v4716_v22  ;;  %v4175_v50 = vor.u32 %v4948_v30, %v4172_v32  ;;  %v4396_v3 = vld [vmem:[#allocation15 + $0x530] sm:$0xf0] }
 0x3ca   :  { %v4976_v14 = vld [vmem:[#allocation15 + $0x42c] sm:$0xf0]  ;;  %v5068_v44 = vld [vmem:[#allocation15 + $0x714] sm:$0xf]  ;;  %v4399_v10 = vor.u32 %v5004_v15, %v4396_v3  ;;  %v4754_v3 = vld [vmem:[#allocation15 + $0x7d8] sm:$0xf] }
 0x3cb   :  { %3148 = vmatpush.bf16.msra.mxu3 %v4331_v41  ;;  %v4522_v53 = vld [vmem:[#allocation15 + $0x610] sm:$0xf]  ;;  %3121 = vmatpush.bf16.msra.mxu1 %v3787_v47  ;;  %v4267_v4 = vor.u32 %v4976_v14, %v4266_v57  ;;  %v4431_v41 = vor.u32 %v5012_v63, %v4428_v34  ;;  %v4652_v46 = vld [vmem:[#allocation15 + $0x730] sm:$0xf0]  ;;  %v3887_v47 = vor.u32 %v4876_v42, %v3884_v43  ;;  %v4969_v43 = vld [vmem:[#allocation15 + $0x3f4] sm:$0xf0] }
 0x3cc   :  { %v5040_v16 = vld [vmem:[#allocation15 + $0x62c] sm:$0xf0]  ;;  %v4932_v56 = vld [vmem:[#allocation15 + $0x2d4] sm:$0xf]  ;;  %v4655_v51 = vor.u32 %v5068_v44, %v4652_v46  ;;  %v5097_v44 = vld [vmem:[#allocation15 + $0x7f4] sm:$0xf0] }
 0x3cd   :  { %3162 = vmatpush.bf16.msrb.mxu0 %v4587_v40  ;;  %3135 = vmatpush.bf16.msra.mxu2 %v4043_v7  ;;  %v4523_v12 = vor.u32 %v5040_v16, %v4522_v53  ;;  %v4687_v40 = vor.u32 %v5076_v13, %v4684_v36  ;;  %v4868_v7 = vld [vmem:[#allocation15 + $0xd4] sm:$0xf] }
 0x3ce   :  { %v4108_v57 = vld [vmem:[#allocation15 + $0x2f0] sm:$0xf0] }
 0x3cf   :  { %3149 = vmatpush.bf16.msra.mxu3 %v4299_v18  ;;  %3122 = vmatpush.bf16.msra.mxu1 %v3755_v61  ;;  %v3852_v18 = vld [vmem:[#allocation15 + $0xf0] sm:$0xf0]  ;;  %v4111_v59 = vor.u32 %v4932_v56, %v4108_v57  ;;  %v4210_v56 = vld [vmem:[#allocation15 + $0x398] sm:$0xf] }
 0x3d0   :  { %v4364_v14 = vld [vmem:[#allocation15 + $0x4f0] sm:$0xf0]  ;;  %v3855_v45 = vor.u32 %v4868_v7, %v3852_v18  ;;  %v3954_v7 = vld [vmem:[#allocation15 + $0x198] sm:$0xf] }
 0x3d1   :  { %3163 = vmatpush.bf16.msrb.mxu0 %v4555_v52  ;;  %3136 = vmatpush.bf16.msra.mxu2 %v4011_v58  ;;  %v4996_v52 = vld [vmem:[#allocation15 + $0x4d4] sm:$0xf]  ;;  %v4897_v18 = vld [vmem:[#allocation15 + $0x1b4] sm:$0xf0] }
 0x3d2   :  { %3123 = vmatmul.bf16.vlgmr.msra.gmra.mxu1 %v5772_v62  ;;  %v5060_v53 = vld [vmem:[#allocation15 + $0x6d4] sm:$0xf]  ;;  %v4367_v60 = vor.u32 %v4996_v52, %v4364_v14  ;;  %v4961_v57 = vld [vmem:[#allocation15 + $0x3b4] sm:$0xf0] }
 0x3d3   :  { %3150 = vmatpush.bf16.msra.mxu3 %v4267_v4  ;;  %3171 = vmatpush.bf16.msrb.mxu1 %v3983_v48  ;;  %v4620_v16 = vld [vmem:[#allocation15 + $0x6f0] sm:$0xf0]  ;;  %v4466_v52 = vld [vmem:[#allocation15 + $0x598] sm:$0xf] }
 0x3d4   :  { %3137 = vmatmul.bf16.vlgmr.msra.gmra.mxu2 %v5774_v24  ;;  %v4860_v61 = vld [vmem:[#allocation15 + $0x94] sm:$0xf]  ;;  %v4623_v2 = vor.u32 %v5060_v53, %v4620_v16  ;;  %v5025_v14 = vld [vmem:[#allocation15 + $0x5b4] sm:$0xf0] }
 0x3d5   :  { %3164 = vmatpush.bf16.msrb.mxu0 %v4523_v12  ;;  %3185 = vmatpush.bf16.msrb.mxu2 %v4239_v6  ;;  %v3820_v0 = vld [vmem:[#allocation15 + $0xb0] sm:$0xf0]  ;;  %v4722_v53 = vld [vmem:[#allocation15 + $0x798] sm:$0xf] }
 0x3d6   :  { %3151 = vmatmul.bf16.vlgmr.msra.gmra.mxu3 %v5776_v29  ;;  %v4924_v55 = vld [vmem:[#allocation15 + $0x294] sm:$0xf]  ;;  %v3823_v48 = vor.u32 %v4860_v61, %v3820_v0  ;;  %v5089_v16 = vld [vmem:[#allocation15 + $0x7b4] sm:$0xf0] }
 0x3d7   :  { %3199 = vmatpush.bf16.msrb.mxu3 %v4495_v37  ;;  %3172 = vmatpush.bf16.msrb.mxu1 %v3951_v23  ;;  %v4076_v58 = vld [vmem:[#allocation15 + $0x2b0] sm:$0xf0]  ;;  %v3922_v61 = vld [vmem:[#allocation15 + $0x158] sm:$0xf] }
 0x3d8   :  { %3165 = vmatmul.bf16.vlgmr.msrb.gmra.mxu0 %v5780_v33  ;;  %v4988_v4 = vld [vmem:[#allocation15 + $0x494] sm:$0xf]  ;;  %v4079_v6 = vor.u32 %v4924_v55, %v4076_v58  ;;  %v4889_v0 = vld [vmem:[#allocation15 + $0x174] sm:$0xf0] }
 0x3d9   :  { %3213 = vmatpush.bf16.msra.mxu0 %v4751_v19  ;;  %3186 = vmatpush.bf16.msrb.mxu2 %v4207_v25  ;;  %v4332_v8 = vld [vmem:[#allocation15 + $0x4b0] sm:$0xf0]  ;;  %v4178_v55 = vld [vmem:[#allocation15 + $0x358] sm:$0xf] }
 0x3da   :  { %v5052_v5 = vld [vmem:[#allocation15 + $0x694] sm:$0xf]  ;;  %v4335_v37 = vor.u32 %v4988_v4, %v4332_v8  ;;  %v4953_v58 = vld [vmem:[#allocation15 + $0x374] sm:$0xf0] }
 0x3db   :  { %3200 = vmatpush.bf16.msrb.mxu3 %v4463_v26  ;;  %3173 = vmatpush.bf16.msrb.mxu1 %v3919_v38  ;;  %v4588_v12 = vld [vmem:[#allocation15 + $0x6b0] sm:$0xf0]  ;;  %v3986_v38 = vld [vmem:[#allocation15 + $0x1d8] sm:$0xf] }
 0x3dc   :  { %v4852_v35 = vld [vmem:[#allocation15 + $0x54] sm:$0xf]  ;;  %v4591_v19 = vor.u32 %v5052_v5, %v4588_v12  ;;  %v4434_v4 = vld [vmem:[#allocation15 + $0x558] sm:$0xf] }
 0x3dd   :  { %3214 = vmatpush.bf16.msra.mxu0 %v4719_v31  ;;  %3187 = vmatpush.bf16.msrb.mxu2 %v4175_v50  ;;  %v3788_v17 = vld [vmem:[#allocation15 + $0x70] sm:$0xf0]  ;;  %v4905_v50 = vld [vmem:[#allocation15 + $0x1f4] sm:$0xf0] }
 0x3de   :  { %v4916_v11 = vld [vmem:[#allocation15 + $0x254] sm:$0xf]  ;;  %v3791_v23 = vor.u32 %v4852_v35, %v3788_v17  ;;  %v5017_v8 = vld [vmem:[#allocation15 + $0x574] sm:$0xf0] }
 0x3df   :  { %3201 = vmatpush.bf16.msrb.mxu3 %v4431_v41  ;;  %3174 = vmatpush.bf16.msrb.mxu1 %v3887_v47  ;;  %v4044_v20 = vld [vmem:[#allocation15 + $0x270] sm:$0xf0]  ;;  %v4242_v41 = vld [vmem:[#allocation15 + $0x3d8] sm:$0xf]  ;;  %v3987_v47 = vor.u32 %v4905_v50, %v3986_v38  ;;  %v4435_v35 = vor.u32 %v5017_v8, %v4434_v4 }
 0x3e0   :  { %v4980_v49 = vld [vmem:[#allocation15 + $0x454] sm:$0xf]  ;;  %v4047_v27 = vor.u32 %v4916_v11, %v4044_v20  ;;  %v4690_v5 = vld [vmem:[#allocation15 + $0x758] sm:$0xf] }
 0x3e1   :  { %3215 = vmatpush.bf16.msra.mxu0 %v4687_v40  ;;  %3188 = vmatpush.bf16.msrb.mxu2 %v4143_v1  ;;  %v4300_v21 = vld [vmem:[#allocation15 + $0x470] sm:$0xf0]  ;;  %v5033_v40 = vld [vmem:[#allocation15 + $0x5f4] sm:$0xf0]  ;;  %v4243_v1 = vor.u32 %v4969_v43, %v4242_v41 }
 0x3e2   :  { %v5044_v39 = vld [vmem:[#allocation15 + $0x654] sm:$0xf]  ;;  %v4303_v28 = vor.u32 %v4980_v49, %v4300_v21  ;;  %v5081_v12 = vld [vmem:[#allocation15 + $0x774] sm:$0xf0] }
 0x3e3   :  { %3202 = vmatpush.bf16.msrb.mxu3 %v4399_v10  ;;  %3175 = vmatpush.bf16.msrb.mxu1 %v3855_v45  ;;  %v4556_v22 = vld [vmem:[#allocation15 + $0x670] sm:$0xf0]  ;;  %v4499_v10 = vor.u32 %v5033_v40, %v4498_v54  ;;  %v3955_v45 = vor.u32 %v4897_v18, %v3954_v7  ;;  %v3890_v17 = vld [vmem:[#allocation15 + $0x118] sm:$0xf]  ;;  %v4691_v20 = vor.u32 %v5081_v12, %v4690_v5 }
 0x3e4   :  { %v4844_v25 = vld [vmem:[#allocation15 + $0x14] sm:$0xf]  ;;  %v4559_v63 = vor.u32 %v5044_v39, %v4556_v22  ;;  %v4881_v11 = vld [vmem:[#allocation15 + $0x134] sm:$0xf0] }
 0x3e5   :  { %3216 = vmatpush.bf16.msra.mxu0 %v4655_v51  ;;  %3189 = vmatpush.bf16.msrb.mxu2 %v4111_v59  ;;  %v3756_v26 = vld [vmem:[#allocation15 + $0x30] sm:$0xf0]  ;;  %v4755_v51 = vor.u32 %v5097_v44, %v4754_v3  ;;  %v4211_v59 = vor.u32 %v4961_v57, %v4210_v56  ;;  %v4945_v49 = vld [vmem:[#allocation15 + $0x334] sm:$0xf0] }
 0x3e6   :  { %v4908_v30 = vld [vmem:[#allocation15 + $0x214] sm:$0xf]  ;;  %v3759_v42 = vor.u32 %v4844_v25, %v3756_v26  ;;  %v4402_v21 = vld [vmem:[#allocation15 + $0x518] sm:$0xf] }
 0x3e7   :  { %3203 = vmatpush.bf16.msrb.mxu3 %v4367_v60  ;;  %3176 = vmatpush.bf16.msrb.mxu1 %v3823_v48  ;;  %v4012_v31 = vld [vmem:[#allocation15 + $0x230] sm:$0xf0]  ;;  %v4467_v60 = vor.u32 %v5025_v14, %v4466_v52  ;;  %v3923_v48 = vor.u32 %v4889_v0, %v3922_v61  ;;  %v5009_v39 = vld [vmem:[#allocation15 + $0x534] sm:$0xf0] }
 0x3e8   :  { %v4972_v32 = vld [vmem:[#allocation15 + $0x414] sm:$0xf]  ;;  %v4015_v9 = vor.u32 %v4908_v30, %v4012_v31  ;;  %v4658_v22 = vld [vmem:[#allocation15 + $0x718] sm:$0xf]  ;;  %v4403_v30 = vor.u32 %v5009_v39, %v4402_v21 }
 0x3e9   :  { %3217 = vmatpush.bf16.msra.mxu0 %v4623_v2  ;;  %3190 = vmatpush.bf16.msrb.mxu2 %v4079_v6  ;;  %v4268_v34 = vld [vmem:[#allocation15 + $0x430] sm:$0xf0]  ;;  %v4723_v2 = vor.u32 %v5089_v16, %v4722_v53  ;;  %v2900_v6 = vpop.f32.mrf.mxu1  ;;  %v3858_v31 = vld [vmem:[#allocation15 + $0xd8] sm:$0xf] }
 0x3ea   :  { %v5036_v13 = vld [vmem:[#allocation15 + $0x614] sm:$0xf]  ;;  %v4271_v15 = vor.u32 %v4972_v32, %v4268_v34  ;;  %v4873_v32 = vld [vmem:[#allocation15 + $0xf4] sm:$0xf0] }
 0x3eb   :  { %3204 = vmatpush.bf16.msrb.mxu3 %v4335_v37  ;;  %v4524_v36 = vld [vmem:[#allocation15 + $0x630] sm:$0xf0]  ;;  %3177 = vmatpush.bf16.msrb.mxu1 %v3791_v23  ;;  %v4179_v37 = vor.u32 %v4953_v58, %v4178_v55  ;;  %v5073_v23 = vld [vmem:[#allocation15 + $0x734] sm:$0xf0]  ;;  %v5809_v26 = vpop.f32.mrf.mxu0  ;;  %v3859_v40 = vor.u32 %v4873_v32, %v3858_v31  ;;  %v4965_v31 = vld [vmem:[#allocation15 + $0x3dc] sm:$0xf] }
 0x3ec   :  { %v4527_v46 = vor.u32 %v5036_v13, %v4524_v36  ;;  %v5807_v25 = vld [vmem:[%s5865_s11] sm:$0xff]  ;;  %v4659_v34 = vor.u32 %v5073_v23, %v4658_v22  ;;  %s5410_s11 = smov [#allocation17]  }
 0x3ed   :  { %3218 = vmatpush.bf16.msra.mxu0 %v4591_v19  ;;  %3191 = vmatpush.bf16.msrb.mxu2 %v4047_v27  ;;  %v4146_v19 = vld [vmem:[#allocation15 + $0x318] sm:$0xf]  ;;  %v3891_v27 = vor.u32 %v4881_v11, %v3890_v17  ;;  %v1595_v54 = vperm.slane %v5807_v25, 0  ;;  %s3375_s30 = sshll.u32 %s5410_s11, 4  ;;  %s3376_s30 = int_to_ptr.vmem [resolvable:$true] %s3375_s30 }
 0x3ee   :  { %v4937_v36 = vld [vmem:[#allocation15 + $0x2f4] sm:$0xf0] }
 0x3ef   :  { %3205 = vmatpush.bf16.msrb.mxu3 %v4303_v28  ;;  %3178 = vmatpush.bf16.msrb.mxu1 %v3759_v42  ;;  %v4147_v28 = vor.u32 %v4945_v49, %v4146_v19  ;;  %v2914_v13 = vpop.f32.mrf.mxu2  ;;  %v4370_v38 = vld [vmem:[#allocation15 + $0x4d8] sm:$0xf] }
 0x3f0   :  { %v5001_v50 = vld [vmem:[#allocation15 + $0x4f4] sm:$0xf0]  ;;  %v5811_v41 = vpop.f32.mrf.mxu3 }
 0x3f1   :  { %3219 = vmatpush.bf16.msra.mxu0 %v4559_v63  ;;  %3192 = vmatpush.bf16.msrb.mxu2 %v4015_v9  ;;  %v4114_v63 = vld [vmem:[#allocation15 + $0x2d8] sm:$0xf]  ;;  %v5814_v9 = vpop.f32.mrf.mxu1  ;;  %v4371_v3 = vor.u32 %v5001_v50, %v4370_v38 }
 0x3f2   :  { %3179 = vmatmul.bf16.vlgmr.msrb.gmra.mxu1 %v5772_v62  ;;  %v4626_v42 = vld [vmem:[#allocation15 + $0x6d8] sm:$0xf] }
 0x3f3   :  { %3206 = vmatpush.bf16.msrb.mxu3 %v4271_v15  ;;  %3227 = vmatpush.bf16.msra.mxu1 %v3987_v47  ;;  %v5065_v43 = vld [vmem:[#allocation15 + $0x6f4] sm:$0xf0]  ;;  %v4115_v15 = vor.u32 %v4937_v36, %v4114_v63  ;;  %v4500_v36 = vld [vmem:[#allocation15 + $0x5f8] sm:$0xf0] }
 0x3f4   :  { %3193 = vmatmul.bf16.vlgmr.msrb.gmra.mxu2 %v5774_v24  ;;  %v3826_v44 = vld [vmem:[#allocation15 + $0x98] sm:$0xf] }
 0x3f5   :  { %3220 = vmatpush.bf16.msra.mxu0 %v4527_v46  ;;  %3241 = vmatpush.bf16.msra.mxu2 %v4243_v1  ;;  %v4865_v46 = vld [vmem:[#allocation15 + $0xb4] sm:$0xf0]  ;;  %v4627_v1 = vor.u32 %v5065_v43, %v4626_v42  ;;  %v5093_v43 = vld [vmem:[#allocation15 + $0x7dc] sm:$0xf] }
 0x3f6   :  { %3207 = vmatmul.bf16.vlgmr.msrb.gmra.mxu3 %v5776_v29  ;;  %v4082_v47 = vld [vmem:[#allocation15 + $0x298] sm:$0xf]  ;;  %v3827_v57 = vor.u32 %v4865_v46, %v3826_v44 }
 0x3f7   :  { %3255 = vmatpush.bf16.msra.mxu3 %v4499_v10  ;;  %3228 = vmatpush.bf16.msra.mxu1 %v3955_v45  ;;  %v4929_v10 = vld [vmem:[#allocation15 + $0x2b4] sm:$0xf0]  ;;  %v2916_v0 = vpop.f32.mrf.mxu2 }
 0x3f8   :  { %3221 = vmatmul.bf16.vlgmr.msra.gmra.mxu0 %v5780_v33  ;;  %v4338_v7 = vld [vmem:[#allocation15 + $0x498] sm:$0xf]  ;;  %v4083_v52 = vor.u32 %v4929_v10, %v4082_v47  ;;  %v5820_v4 = vpop.f32.mrf.mxu3 }
 0x3f9   :  { %3269 = vmatpush.bf16.msrb.mxu0 %v4755_v51  ;;  %3242 = vmatpush.bf16.msra.mxu2 %v4211_v59  ;;  %v4993_v18 = vld [vmem:[#allocation15 + $0x4b4] sm:$0xf0]  ;;  %v2901_v59 = vadd.f32 %v2900_v6, %v1595_v54 }
 0x3fa   :  { %v4594_v56 = vld [vmem:[#allocation15 + $0x698] sm:$0xf]  ;;  %v4339_v14 = vor.u32 %v4993_v18, %v4338_v7  ;;  %v4893_v7 = vld [vmem:[#allocation15 + $0x19c] sm:$0xf] }
 0x3fb   :  { %3256 = vmatpush.bf16.msra.mxu3 %v4467_v60  ;;  %3229 = vmatpush.bf16.msra.mxu1 %v3923_v48  ;;  %v5057_v51 = vld [vmem:[#allocation15 + $0x6b4] sm:$0xf0]  ;;  %v5818_v60 = vpop.f32.mrf.mxu0  ;;  %v2915_v12 = vadd.f32 %v2914_v13, %v2901_v59  ;;  %v5029_v13 = vld [vmem:[#allocation15 + $0x5dc] sm:$0xf] }
 0x3fc   :  { %v3794_v53 = vld [vmem:[#allocation15 + $0x58] sm:$0xf]  ;;  %v4595_v61 = vor.u32 %v5057_v51, %v4594_v56  ;;  %v4503_v47 = vor.u32 %v5029_v13, %v4500_v36  ;;  %v3956_v18 = vld [vmem:[#allocation15 + $0x1b8] sm:$0xf0] }
 0x3fd   :  { %3270 = vmatpush.bf16.msrb.mxu0 %v4723_v2  ;;  %3243 = vmatpush.bf16.msra.mxu2 %v4179_v37  ;;  %v4857_v16 = vld [vmem:[#allocation15 + $0x74] sm:$0xf0]  ;;  %v1596_v37 = vperm.slane %v5807_v25, 1  ;;  %v2929_v32 = vadd.f32 %v5811_v41, %v2915_v12  ;;  %v4957_v56 = vld [vmem:[#allocation15 + $0x39c] sm:$0xf] }
 0x3fe   :  { %v4050_v45 = vld [vmem:[#allocation15 + $0x258] sm:$0xf]  ;;  %v3795_v48 = vor.u32 %v4857_v16, %v3794_v53  ;;  %v4212_v53 = vld [vmem:[#allocation15 + $0x3b8] sm:$0xf0] }
 0x3ff   :  { %3257 = vmatpush.bf16.msra.mxu3 %v4435_v35  ;;  %3230 = vmatpush.bf16.msra.mxu1 %v3891_v27  ;;  %v4921_v55 = vld [vmem:[#allocation15 + $0x274] sm:$0xf0]  ;;  %v2956_v35 = vpop.f32.mrf.mxu1  ;;  %v2970_v44 = vpop.f32.mrf.mxu2  ;;  %v2943_v51 = vadd.f32 %v5809_v26, %v2929_v32  ;;  %v5021_v16 = vld [vmem:[#allocation15 + $0x59c] sm:$0xf]  ;;  %v4215_v26 = vor.u32 %v4957_v56, %v4212_v53 }
 0x400   :  { %v4306_v2 = vld [vmem:[#allocation15 + $0x458] sm:$0xf]  ;;  %v4051_v11 = vor.u32 %v4921_v55, %v4050_v45  ;;  %v2957_v38 = vadd.f32 %v2956_v35, %v1596_v37  ;;  %v2984_v10 = vpop.f32.mrf.mxu3  ;;  %v5085_v45 = vld [vmem:[#allocation15 + $0x79c] sm:$0xf]  ;;  %v3959_v55 = vor.u32 %v4893_v7, %v3956_v18 }
 0x401   :  { %3271 = vmatpush.bf16.msrb.mxu0 %v4691_v20  ;;  %3244 = vmatpush.bf16.msra.mxu2 %v4147_v28  ;;  %v4985_v58 = vld [vmem:[#allocation15 + $0x474] sm:$0xf0]  ;;  %v4901_v28 = vld [vmem:[#allocation15 + $0x1dc] sm:$0xf]  ;;  %5133 = vtanh.f32 %v2943_v51 }
 0x402   :  { %v4562_v8 = vld [vmem:[#allocation15 + $0x658] sm:$0xf]  ;;  %v4307_v19 = vor.u32 %v4985_v58, %v4306_v2  ;;  %v4724_v59 = vld [vmem:[#allocation15 + $0x7b8] sm:$0xf0] }
 0x403   :  { %3258 = vmatpush.bf16.msra.mxu3 %v4403_v30  ;;  %3231 = vmatpush.bf16.msra.mxu1 %v3859_v40  ;;  %v5049_v5 = vld [vmem:[#allocation15 + $0x674] sm:$0xf0]  ;;  %v3988_v30 = vld [vmem:[#allocation15 + $0x1f8] sm:$0xf0] }
 0x404   :  { %v3762_v17 = vld [vmem:[#allocation15 + $0x18] sm:$0xf]  ;;  %v4563_v39 = vor.u32 %v5049_v5, %v4562_v8  ;;  %v4756_v40 = vld [vmem:[#allocation15 + $0x7f8] sm:$0xf0] }
 0x405   :  { %3272 = vmatpush.bf16.msrb.mxu0 %v4659_v34  ;;  %3245 = vmatpush.bf16.msra.mxu2 %v4115_v15  ;;  %v4849_v6 = vld [vmem:[#allocation15 + $0x34] sm:$0xf0]  ;;  %v4244_v34 = vld [vmem:[#allocation15 + $0x3f8] sm:$0xf0]  ;;  %v2903_v15 = vadd.f32 %v5814_v9, %v1595_v54 }
 0x406   :  { %v4018_v20 = vld [vmem:[#allocation15 + $0x218] sm:$0xf]  ;;  %v3763_v63 = vor.u32 %v4849_v6, %v3762_v17  ;;  %v4247_v46 = vor.u32 %v4965_v31, %v4244_v34  ;;  %v4468_v54 = vld [vmem:[#allocation15 + $0x5b8] sm:$0xf0] }
 0x407   :  { %3259 = vmatpush.bf16.msra.mxu3 %v4371_v3  ;;  %3232 = vmatpush.bf16.msra.mxu1 %v3827_v57  ;;  %v4913_v49 = vld [vmem:[#allocation15 + $0x234] sm:$0xf0]  ;;  %v3991_v3 = vor.u32 %v4901_v28, %v3988_v30  ;;  %v2917_v57 = vadd.f32 %v2916_v0, %v2903_v15  ;;  %v4471_v0 = vor.u32 %v5021_v16, %v4468_v54  ;;  %v4885_v58 = vld [vmem:[#allocation15 + $0x15c] sm:$0xf] }
 0x408   :  { %v4274_v21 = vld [vmem:[#allocation15 + $0x418] sm:$0xf]  ;;  %v4019_v50 = vor.u32 %v4913_v49, %v4018_v20  ;;  %v3924_v8 = vld [vmem:[#allocation15 + $0x178] sm:$0xf0]  ;;  %v2972_v49 = vpop.f32.mrf.mxu2 }
 0x409   :  { %3273 = vmatpush.bf16.msrb.mxu0 %v4627_v1  ;;  %3246 = vmatpush.bf16.msra.mxu2 %v4083_v52  ;;  %v4977_v22 = vld [vmem:[#allocation15 + $0x434] sm:$0xf0]  ;;  %v2971_v1 = vadd.f32 %v2970_v44, %v2957_v38  ;;  %v2998_v52 = vpop.f32.mrf.mxu0  ;;  %v4949_v5 = vld [vmem:[#allocation15 + $0x35c] sm:$0xf]  ;;  %v2931_v12 = vadd.f32 %v5820_v4, %v2917_v57  ;;  %v3927_v4 = vor.u32 %v4885_v58, %v3924_v8 }
 0x40a   :  { %v4530_v23 = vld [vmem:[#allocation15 + $0x618] sm:$0xf]  ;;  %v4275_v42 = vor.u32 %v4977_v22, %v4274_v21  ;;  %v4180_v35 = vld [vmem:[#allocation15 + $0x378] sm:$0xf0] }
 0x40b   :  { %3260 = vmatpush.bf16.msra.mxu3 %v4339_v14  ;;  %v5041_v27 = vld [vmem:[#allocation15 + $0x634] sm:$0xf0]  ;;  %3233 = vmatpush.bf16.msra.mxu1 %v3795_v48  ;;  %v4759_v14 = vor.u32 %v5093_v43, %v4756_v40  ;;  %v2985_v9 = vadd.f32 %v2984_v10, %v2971_v1  ;;  %v4727_v48 = vor.u32 %v5085_v45, %v4724_v59  ;;  %v5013_v17 = vld [vmem:[#allocation15 + $0x55c] sm:$0xf] }
 0x40c   :  { %v4531_v41 = vor.u32 %v5041_v27, %v4530_v23  ;;  %v4436_v6 = vld [vmem:[#allocation15 + $0x578] sm:$0xf0]  ;;  %v4183_v21 = vor.u32 %v4949_v5, %v4180_v35  ;;  %v2945_v30 = vadd.f32 %v5818_v60, %v2931_v12 }
 0x40d   :  { %3274 = vmatpush.bf16.msrb.mxu0 %v4595_v61  ;;  %3247 = vmatpush.bf16.msra.mxu2 %v4051_v11  ;;  %v2958_v61 = vpop.f32.mrf.mxu1  ;;  %v2999_v2 = vadd.f32 %v2998_v52, %v2985_v9  ;;  %v4692_v20 = vld [vmem:[#allocation15 + $0x778] sm:$0xf0] }
 0x40e   :  { %v2959_v11 = vadd.f32 %v2958_v61, %v1596_v37  ;;  %v4877_v23 = vld [vmem:[#allocation15 + $0x11c] sm:$0xf]  ;;  %v2986_v37 = vpop.f32.mrf.mxu3 }
 0x40f   :  { %3261 = vmatpush.bf16.msra.mxu3 %v4307_v19  ;;  %3234 = vmatpush.bf16.msra.mxu1 %v3763_v63  ;;  %5135 = vtanh.f32 %v2999_v2  ;;  %v5077_v19 = vld [vmem:[#allocation15 + $0x75c] sm:$0xf] }
 0x410   :  { %v2973_v22 = vadd.f32 %v2972_v49, %v2959_v11  ;;  %v3892_v27 = vld [vmem:[#allocation15 + $0x138] sm:$0xf0]  ;;  %v4695_v31 = vor.u32 %v5077_v19, %v4692_v20  ;;  %5137 = vtanh.f32 %v2945_v30 }
 0x411   :  { %3275 = vmatpush.bf16.msrb.mxu0 %v4563_v39  ;;  %3248 = vmatpush.bf16.msra.mxu2 %v4019_v50  ;;  %v4439_v39 = vor.u32 %v5013_v17, %v4436_v6  ;;  %v4941_v28 = vld [vmem:[#allocation15 + $0x31c] sm:$0xf]  ;;  %v5134_v50 = vpop.eup %5133  ;;  %v3895_v43 = vor.u32 %v4877_v23, %v3892_v27 }
 0x412   :  { %3235 = vmatmul.bf16.vlgmr.msra.gmra.mxu1 %v5772_v62  ;;  %v4148_v32 = vld [vmem:[#allocation15 + $0x338] sm:$0xf0]  ;;  %v2987_v13 = vadd.f32 %v2986_v37, %v2973_v22 }
 0x413   :  { %3262 = vmatpush.bf16.msra.mxu3 %v4275_v42  ;;  %3283 = vmatpush.bf16.msrb.mxu1 %v3991_v3  ;;  %v5005_v63 = vld [vmem:[#allocation15 + $0x51c] sm:$0xf]  ;;  %v3000_v42 = vpop.f32.mrf.mxu0 }
 0x414   :  { %3249 = vmatmul.bf16.vlgmr.msra.gmra.mxu2 %v5774_v24  ;;  %v4404_v34 = vld [vmem:[#allocation15 + $0x538] sm:$0xf0]  ;;  %v3001_v15 = vadd.f32 %v3000_v42, %v2987_v13 }
 0x415   :  { %3276 = vmatpush.bf16.msrb.mxu0 %v4531_v41  ;;  %3297 = vmatpush.bf16.msrb.mxu2 %v4247_v46  ;;  %v5069_v36 = vld [vmem:[#allocation15 + $0x71c] sm:$0xf]  ;;  %v5136_v40 = vpop.eup %5135  ;;  %v4151_v41 = vor.u32 %v4941_v28, %v4148_v32  ;;  %v4407_v3 = vor.u32 %v5005_v63, %v4404_v34 }
 0x416   :  { %3263 = vmatmul.bf16.vlgmr.msra.gmra.mxu3 %v5776_v29  ;;  %v4660_v38 = vld [vmem:[#allocation15 + $0x738] sm:$0xf0]  ;;  %5139 = vtanh.f32 %v3001_v15 }
 0x417   :  { %3311 = vmatpush.bf16.msrb.mxu3 %v4503_v47  ;;  %3284 = vmatpush.bf16.msrb.mxu1 %v3959_v55  ;;  %v4869_v60 = vld [vmem:[#allocation15 + $0xdc] sm:$0xf]  ;;  %v3355_v47 = vpack.c.bf16 %v5136_v40, %v5134_v50  ;;  %v4663_v1 = vor.u32 %v5069_v36, %v4660_v38  ;;  %v3026_v42 = vpop.f32.mrf.mxu2 }
 0x418   :  { %3277 = vmatmul.bf16.vlgmr.msrb.gmra.mxu0 %v5780_v33  ;;  %v3860_v44 = vld [vmem:[#allocation15 + $0xf8] sm:$0xf0] }
 0x419   :  { %3325 = vmatpush.bf16.msra.mxu0 %v4759_v14  ;;  %3298 = vmatpush.bf16.msrb.mxu2 %v4215_v26  ;;  %v4933_v46 = vld [vmem:[#allocation15 + $0x2dc] sm:$0xf]  ;;  %3363 = vst [vmem:[#allocation17] sm:$0xff] %v3355_v47  ;;  %v3863_v57 = vor.u32 %v4869_v60, %v3860_v44  ;;  %v5138_v26 = vpop.eup %5137 }
 0x41a   :  { %v4116_v10 = vld [vmem:[#allocation15 + $0x2f8] sm:$0xf0] }
 0x41b   :  { %3312 = vmatpush.bf16.msrb.mxu3 %v4471_v0  ;;  %3285 = vmatpush.bf16.msrb.mxu1 %v3927_v4  ;;  %v4997_v7 = vld [vmem:[#allocation15 + $0x4dc] sm:$0xf]  ;;  %v4119_v52 = vor.u32 %v4933_v46, %v4116_v10  ;;  %v3054_v15 = vpop.f32.mrf.mxu0 }
 0x41c   :  { %v4372_v18 = vld [vmem:[#allocation15 + $0x4f8] sm:$0xf0]  ;;  %v5140_v58 = vpop.eup %5139 }
 0x41d   :  { %3326 = vmatpush.bf16.msra.mxu0 %v4727_v48  ;;  %3299 = vmatpush.bf16.msrb.mxu2 %v4183_v21  ;;  %v5061_v56 = vld [vmem:[#allocation15 + $0x6dc] sm:$0xf]  ;;  %v4375_v14 = vor.u32 %v4997_v7, %v4372_v18  ;;  %v3359_v17 = vpack.c.bf16 %v5140_v58, %v5138_v26  ;;  %v3012_v21 = vpop.f32.mrf.mxu1  ;;  %v1598_v7 = vperm.slane %v5807_v25, 3 }
 0x41e   :  { %v4628_v51 = vld [vmem:[#allocation15 + $0x6f8] sm:$0xf0] }
 0x41f   :  { %3313 = vmatpush.bf16.msrb.mxu3 %v4439_v39  ;;  %3286 = vmatpush.bf16.msrb.mxu1 %v3895_v43  ;;  %v4861_v53 = vld [vmem:[#allocation15 + $0x9c] sm:$0xf]  ;;  %v4631_v9 = vor.u32 %v5061_v56, %v4628_v51  ;;  %3367 = vst [vmem:[#allocation17 + $0x20] sm:$0xff] %v3359_v17  ;;  %v3040_v43 = vpop.f32.mrf.mxu3  ;;  %v3028_v44 = vpop.f32.mrf.mxu2 }
 0x420   :  { %v3828_v16 = vld [vmem:[#allocation15 + $0xb8] sm:$0xf0] }
 0x421   :  { %3327 = vmatpush.bf16.msra.mxu0 %v4695_v31  ;;  %3300 = vmatpush.bf16.msrb.mxu2 %v4151_v41  ;;  %v4925_v54 = vld [vmem:[#allocation15 + $0x29c] sm:$0xf]  ;;  %v3831_v0 = vor.u32 %v4861_v53, %v3828_v16 }
 0x422   :  { %v4084_v45 = vld [vmem:[#allocation15 + $0x2b8] sm:$0xf0] }
 0x423   :  { %3314 = vmatpush.bf16.msrb.mxu3 %v4407_v3  ;;  %v4989_v59 = vld [vmem:[#allocation15 + $0x49c] sm:$0xf]  ;;  %3287 = vmatpush.bf16.msrb.mxu1 %v3863_v57  ;;  %v4087_v8 = vor.u32 %v4925_v54, %v4084_v45  ;;  %v1597_v3 = vperm.slane %v5807_v25, 2 }
 0x424   :  { %v4340_v61 = vld [vmem:[#allocation15 + $0x4b8] sm:$0xf0] }
 0x425   :  { %3328 = vmatpush.bf16.msra.mxu0 %v4663_v1  ;;  %v5053_v55 = vld [vmem:[#allocation15 + $0x69c] sm:$0xf]  ;;  %3301 = vmatpush.bf16.msrb.mxu2 %v4119_v52  ;;  %v4343_v5 = vor.u32 %v4989_v59, %v4340_v61  ;;  %v3014_v41 = vpop.f32.mrf.mxu1  ;;  %v3013_v60 = vadd.f32 %v3012_v21, %v1597_v3  ;;  %v3056_v1 = vpop.f32.mrf.mxu0 }
 0x426   :  { %v4596_v2 = vld [vmem:[#allocation15 + $0x6b8] sm:$0xf0]  ;;  %v3015_v51 = vadd.f32 %v3014_v41, %v1597_v3 }
 0x427   :  { %3315 = vmatpush.bf16.msrb.mxu3 %v4375_v14  ;;  %v4853_v12 = vld [vmem:[#allocation15 + $0x5c] sm:$0xf]  ;;  %v4599_v6 = vor.u32 %v5053_v55, %v4596_v2  ;;  %3288 = vmatpush.bf16.msrb.mxu1 %v3831_v0  ;;  %v3042_v46 = vpop.f32.mrf.mxu3  ;;  %v3027_v47 = vadd.f32 %v3026_v42, %v3013_v60 }
 0x428   :  { %v3796_v48 = vld [vmem:[#allocation15 + $0x78] sm:$0xf0] }
 0x429   :  { %v4917_v35 = vld [vmem:[#allocation15 + $0x25c] sm:$0xf]  ;;  %3329 = vmatpush.bf16.msra.mxu0 %v4631_v9  ;;  %v3799_v39 = vor.u32 %v4853_v12, %v3796_v48  ;;  %3302 = vmatpush.bf16.msrb.mxu2 %v4087_v8  ;;  %v3041_v18 = vadd.f32 %v3040_v43, %v3027_v47 }
 0x42a   :  { %v4052_v11 = vld [vmem:[#allocation15 + $0x278] sm:$0xf0] }
 0x42b   :  { %v4981_v19 = vld [vmem:[#allocation15 + $0x45c] sm:$0xf]  ;;  %3316 = vmatpush.bf16.msrb.mxu3 %v4343_v5  ;;  %v4055_v22 = vor.u32 %v4917_v35, %v4052_v11  ;;  %3289 = vmatpush.bf16.msrb.mxu1 %v3799_v39  ;;  %v3055_v14 = vadd.f32 %v3054_v15, %v3041_v18 }
 0x42c   :  { %v4308_v20 = vld [vmem:[#allocation15 + $0x478] sm:$0xf0] }
 0x42d   :  { %v5045_v4 = vld [vmem:[#allocation15 + $0x65c] sm:$0xf]  ;;  %v4311_v23 = vor.u32 %v4981_v19, %v4308_v20  ;;  %3330 = vmatpush.bf16.msra.mxu0 %v4599_v6  ;;  %3303 = vmatpush.bf16.msrb.mxu2 %v4055_v22  ;;  %5141 = vtanh.f32 %v3055_v14 }
 0x42e   :  { %v4564_v49 = vld [vmem:[#allocation15 + $0x678] sm:$0xf0] }
 0x42f   :  { %v4845_v27 = vld [vmem:[#allocation15 + $0x1c] sm:$0xf]  ;;  %v4567_v31 = vor.u32 %v5045_v4, %v4564_v49  ;;  %3317 = vmatpush.bf16.msrb.mxu3 %v4311_v23  ;;  %v3068_v10 = vpop.f32.mrf.mxu1  ;;  %v1599_v4 = vperm.slane %v5807_v25, 4 }
 0x430   :  { %v3764_v28 = vld [vmem:[#allocation15 + $0x38] sm:$0xf0]  ;;  %v3069_v56 = vadd.f32 %v3068_v10, %v1598_v7 }
 0x431   :  { %v4909_v30 = vld [vmem:[#allocation15 + $0x21c] sm:$0xf]  ;;  %v3767_v36 = vor.u32 %v4845_v27, %v3764_v28  ;;  %3331 = vmatpush.bf16.msra.mxu0 %v4567_v31  ;;  %v1600_v28 = vperm.slane %v5807_v25, 5 }
 0x432   :  { %v4020_v37 = vld [vmem:[#allocation15 + $0x238] sm:$0xf0] }
 0x433   :  { %v4973_v32 = vld [vmem:[#allocation15 + $0x41c] sm:$0xf]  ;;  %v4023_v38 = vor.u32 %v4909_v30, %v4020_v37  ;;  %3290 = vmatpush.bf16.msrb.mxu1 %v3767_v36  ;;  %v5142_v26 = vpop.eup %5141 }
 0x434   :  { %v4276_v63 = vld [vmem:[#allocation15 + $0x438] sm:$0xf0] }
 0x435   :  { %v5037_v34 = vld [vmem:[#allocation15 + $0x61c] sm:$0xf]  ;;  %v4279_v50 = vor.u32 %v4973_v32, %v4276_v63  ;;  %3304 = vmatpush.bf16.msrb.mxu2 %v4023_v38  ;;  %v3110_v53 = vpop.f32.mrf.mxu0 }
 0x436   :  { %v4532_v13 = vld [vmem:[#allocation15 + $0x638] sm:$0xf0]  ;;  %3291 = vmatmul.bf16.vlgmr.msrb.gmra.mxu1 %v5772_v62 }
 0x437   :  { %v4535_v40 = vor.u32 %v5037_v34, %v4532_v13  ;;  %3318 = vmatpush.bf16.msrb.mxu3 %v4279_v50  ;;  %v3082_v62 = vpop.f32.mrf.mxu2  ;;  %v3070_v16 = vpop.f32.mrf.mxu1 }
 0x438   :  { %3305 = vmatmul.bf16.vlgmr.msrb.gmra.mxu2 %v5774_v24  ;;  %v3083_v52 = vadd.f32 %v3082_v62, %v3069_v56  ;;  %v3029_v24 = vadd.f32 %v3028_v44, %v3015_v51  ;;  %v3071_v9 = vadd.f32 %v3070_v16, %v1598_v7 }
 0x439   :  { %3332 = vmatpush.bf16.msra.mxu0 %v4535_v40  ;;  %v3096_v57 = vpop.f32.mrf.mxu3 }
 0x43a   :  { %3319 = vmatmul.bf16.vlgmr.msrb.gmra.mxu3 %v5776_v29  ;;  %v3097_v29 = vadd.f32 %v3096_v57, %v3083_v52  ;;  %v3043_v54 = vadd.f32 %v3042_v46, %v3029_v24 }
 0x43c   :  { %3333 = vmatmul.bf16.vlgmr.msra.gmra.mxu0 %v5780_v33  ;;  %v3111_v33 = vadd.f32 %v3110_v53, %v3097_v29  ;;  %v3057_v61 = vadd.f32 %v3056_v1, %v3043_v54  ;;  %v1601_v29 = vperm.slane %v5807_v25, 6 }
 0x43d   :  { %v3112_v0 = vpop.f32.mrf.mxu0 }
 0x43e   :  { %5143 = vtanh.f32 %v3111_v33 }
 0x43f   :  { %v3084_v45 = vpop.f32.mrf.mxu2  ;;  %5145 = vtanh.f32 %v3057_v61  ;;  %v1602_v61 = vperm.slane %v5807_v25, 7 }
 0x440   :  { %v3085_v59 = vadd.f32 %v3084_v45, %v3071_v9 }
 0x441   :  { %v3098_v55 = vpop.f32.mrf.mxu3 }
 0x442   :  { %v3099_v2 = vadd.f32 %v3098_v55, %v3085_v59 }
 0x444   :  { %v5144_v58 = vpop.eup %5143  ;;  %v3113_v8 = vadd.f32 %v3112_v0, %v3099_v2 }
 0x445   :  { %v3356_v5 = vpack.c.bf16 %v5144_v58, %v5142_v26  ;;  %v5146_v12 = vpop.eup %5145 }
 0x446   :  { %5147 = vtanh.f32 %v3113_v8 }
 0x447   :  { %3364 = vst [vmem:[#allocation17 + $0x8] sm:$0xff] %v3356_v5 }
 0x44c   :  { %v5148_v48 = vpop.eup %5147 }
 0x44d   :  { %v3360_v35 = vpack.c.bf16 %v5148_v48, %v5146_v12 }
 0x44f   :  { %3368 = vst [vmem:[#allocation17 + $0x28] sm:$0xff] %v3360_v35  ;;  %v3124_v17 = vpop.f32.mrf.mxu1 }
 0x450   :  { %v3125_v49 = vadd.f32 %v3124_v17, %v1599_v4 }
 0x455   :  { %v3166_v19 = vpop.f32.mrf.mxu0 }
 0x457   :  { %v3138_v6 = vpop.f32.mrf.mxu2  ;;  %v3126_v20 = vpop.f32.mrf.mxu1 }
 0x458   :  { %v3139_v22 = vadd.f32 %v3138_v6, %v3125_v49  ;;  %v3127_v37 = vadd.f32 %v3126_v20, %v1599_v4 }
 0x459   :  { %v3152_v11 = vpop.f32.mrf.mxu3 }
 0x45a   :  { %v3153_v30 = vadd.f32 %v3152_v11, %v3139_v22 }
 0x45c   :  { %v3167_v13 = vadd.f32 %v3166_v19, %v3153_v30 }
 0x45d   :  { %v3168_v23 = vpop.f32.mrf.mxu0 }
 0x45e   :  { %5149 = vtanh.f32 %v3167_v13 }
 0x45f   :  { %v3140_v21 = vpop.f32.mrf.mxu2 }
 0x460   :  { %v3141_v36 = vadd.f32 %v3140_v21, %v3127_v37 }
 0x461   :  { %v3154_v39 = vpop.f32.mrf.mxu3 }
 0x462   :  { %v3155_v40 = vadd.f32 %v3154_v39, %v3141_v36 }
 0x464   :  { %v3169_v60 = vadd.f32 %v3168_v23, %v3155_v40  ;;  %v5150_v47 = vpop.eup %5149 }
 0x46f   :  { %v3180_v27 = vpop.f32.mrf.mxu1 }
 0x470   :  { %v3181_v31 = vadd.f32 %v3180_v27, %v1600_v28 }
 0x475   :  { %v3222_v38 = vpop.f32.mrf.mxu0 }
 0x477   :  { %v3194_v32 = vpop.f32.mrf.mxu2  ;;  %v3182_v42 = vpop.f32.mrf.mxu1 }
 0x478   :  { %v3195_v34 = vadd.f32 %v3194_v32, %v3181_v31  ;;  %v3183_v15 = vadd.f32 %v3182_v42, %v1600_v28 }
 0x479   :  { %v3208_v63 = vpop.f32.mrf.mxu3 }
 0x47a   :  { %v3209_v50 = vadd.f32 %v3208_v63, %v3195_v34 }
 0x47c   :  { %v3223_v43 = vadd.f32 %v3222_v38, %v3209_v50 }
 0x47d   :  { %v3224_v1 = vpop.f32.mrf.mxu0 }
 0x47e   :  { %5151 = vtanh.f32 %v3223_v43 }
 0x47f   :  { %v3196_v41 = vpop.f32.mrf.mxu2  ;;  %5153 = vtanh.f32 %v3169_v60 }
 0x480   :  { %v3197_v3 = vadd.f32 %v3196_v41, %v3183_v15 }
 0x481   :  { %v3210_v44 = vpop.f32.mrf.mxu3 }
 0x482   :  { %v3211_v46 = vadd.f32 %v3210_v44, %v3197_v3 }
 0x484   :  { %v5152_v10 = vpop.eup %5151  ;;  %v3225_v7 = vadd.f32 %v3224_v1, %v3211_v46 }
 0x485   :  { %v3357_v18 = vpack.c.bf16 %v5152_v10, %v5150_v47  ;;  %v5154_v56 = vpop.eup %5153 }
 0x486   :  { %5155 = vtanh.f32 %v3225_v7 }
 0x487   :  { %3365 = vst [vmem:[#allocation17 + $0x10] sm:$0xff] %v3357_v18 }
 0x48c   :  { %v5156_v51 = vpop.eup %5155 }
 0x48d   :  { %v3361_v62 = vpack.c.bf16 %v5156_v51, %v5154_v56 }
 0x48f   :  { %3369 = vst [vmem:[#allocation17 + $0x30] sm:$0xff] %v3361_v62  ;;  %v3236_v57 = vpop.f32.mrf.mxu1 }
 0x490   :  { %v3237_v16 = vadd.f32 %v3236_v57, %v1601_v29 }
 0x495   :  { %v3278_v24 = vpop.f32.mrf.mxu0 }
 0x497   :  { %v3250_v52 = vpop.f32.mrf.mxu2  ;;  %v3238_v53 = vpop.f32.mrf.mxu1 }
 0x498   :  { %v3251_v9 = vadd.f32 %v3250_v52, %v3237_v16  ;;  %v3239_v26 = vadd.f32 %v3238_v53, %v1601_v29 }
 0x499   :  { %v3264_v14 = vpop.f32.mrf.mxu3 }
 0x49a   :  { %v3265_v55 = vadd.f32 %v3264_v14, %v3251_v9 }
 0x49c   :  { %v3279_v5 = vadd.f32 %v3278_v24, %v3265_v55 }
 0x49d   :  { %v3280_v45 = vpop.f32.mrf.mxu0 }
 0x49e   :  { %5157 = vtanh.f32 %v3279_v5 }
 0x49f   :  { %v3252_v33 = vpop.f32.mrf.mxu2 }
 0x4a0   :  { %v3253_v12 = vadd.f32 %v3252_v33, %v3239_v26 }
 0x4a1   :  { %v3266_v54 = vpop.f32.mrf.mxu3 }
 0x4a2   :  { %v3267_v11 = vadd.f32 %v3266_v54, %v3253_v12 }
 0x4a4   :  { %v3281_v49 = vadd.f32 %v3280_v45, %v3267_v11  ;;  %v5158_v39 = vpop.eup %5157 }
 0x4b3   :  { %v3292_v59 = vpop.f32.mrf.mxu1 }
 0x4b4   :  { %v3293_v2 = vadd.f32 %v3292_v59, %v1602_v61 }
 0x4b9   :  { %v3334_v48 = vpop.f32.mrf.mxu0 }
 0x4bb   :  { %v3306_v0 = vpop.f32.mrf.mxu2  ;;  %v3294_v17 = vpop.f32.mrf.mxu1 }
 0x4bc   :  { %v3307_v8 = vadd.f32 %v3306_v0, %v3293_v2  ;;  %v3295_v19 = vadd.f32 %v3294_v17, %v1602_v61 }
 0x4bd   :  { %v3320_v58 = vpop.f32.mrf.mxu3 }
 0x4be   :  { %v3321_v35 = vadd.f32 %v3320_v58, %v3307_v8 }
 0x4c0   :  { %v3335_v6 = vadd.f32 %v3334_v48, %v3321_v35 }
 0x4c1   :  { %v3336_v22 = vpop.f32.mrf.mxu0 }
 0x4c2   :  { %5159 = vtanh.f32 %v3335_v6 }
 0x4c3   :  { %v3308_v20 = vpop.f32.mrf.mxu2  ;;  %5161 = vtanh.f32 %v3281_v49 }
 0x4c4   :  { %v3309_v4 = vadd.f32 %v3308_v20, %v3295_v19 }
 0x4c5   :  { %v3322_v25 = vpop.f32.mrf.mxu3 }
 0x4c6   :  { %v3323_v21 = vadd.f32 %v3322_v25, %v3309_v4 }
 0x4c8   :  { %v5160_v23 = vpop.eup %5159  ;;  %v3337_v27 = vadd.f32 %v3336_v22, %v3323_v21 }
 0x4c9   :  { %v3358_v28 = vpack.c.bf16 %v5160_v23, %v5158_v39  ;;  %v5162_v30 = vpop.eup %5161 }
 0x4ca   :  { %5163 = vtanh.f32 %v3337_v27 }
 0x4cb   :  { %3366 = vst [vmem:[#allocation17 + $0x18] sm:$0xff] %v3358_v28 }
 0x4d0   :  { %v5164_v31 = vpop.eup %5163 }
 0x4d1   :  { %v3362_v37 = vpack.c.bf16 %v5164_v31, %v5162_v30 }
 0x4d3   :  { %3370 = vst [vmem:[#allocation17 + $0x38] sm:$0xff] %v3362_v37 }
 0x4d4   :  { %3383 = dma.vmem_to_hbm [thread:$0]  %s3376_s30, 1024, %s3378_s15, [#allocation5], %s5407_s23, %s5407_s23, %s5408_s24  }
 0x4d5   :  { %5391 = dma.done.wait [#allocation5], 1024  }
 0x4d6   :  { %5392 = vsyncadd [#allocation5], 4294966272 }
 0x4d7   :  { %3388 = vsyncpa [#allocation4], 1 }
 0x4d8   :  { %3389 = vsyncpa [#allocation7], 1 }
 0x4d9   :  { %3390 = vsyncpa [#allocation10], 1 }
 0x4da   :  { %3391 = vsyncpa [#allocation13], 1 }
 0x4db   :  { %3392 = vsyncpa [#allocation16], 1 }
 0x4dc   :  { %3393 = vsyncpa [#allocation5], 1 }

</bundles_post_ra>
